<compile_context>
chip_gen: v6e
topology: v6e:2x2x1
jax: 0.10.0
libtpu: 0.0.40
codegen_flags: <defaults>
</compile_context>

<pallas_src>
import functools

import jax
import jax.numpy as jnp
from jax.experimental import pallas as pl
from jax.experimental.pallas import tpu as pltpu

H1 = W1 = 16            # input spatial size
C1 = 32                 # conv1 output channels
C2 = 64                 # conv2 output channels
H3 = W3 = 4             # output spatial size
W2P = W1 // 2           # 8  : pooled spatial size after pool1

K1 = 3 * (W1 + 2)       # 54  : conv1 contraction dim (3 kernel rows x padded width)
N1 = W1 * C1            # 512 : conv1 output lanes   (x*32 + c)
K2 = W2P * C1           # 256 : conv2 contraction dim over DENSE pool1 lanes
N2 = W2P * C2           # 512 : conv2 output lanes   (x*64 + c)
NOUT = W3 * C2          # 256 : compacted output lanes


def _cnn_kernel(x_ref, w1_ref, b1_ref, w2_ref, b2_ref, out_ref, p1_ref):
    blk = x_ref.shape[1]                      # batch elements in this grid step

    # ---- conv1 + bias + ReLU: one bf16 MXU matmul, f32 accumulation. ----
    xc = x_ref[...].reshape(H1 * blk, K1)                      # bf16, rows = y*blk+b
    h1 = jnp.dot(xc, w1_ref[...], preferred_element_type=jnp.float32)
    h1 = jnp.maximum(h1 + b1_ref[...], 0.0)                    # (16*blk, 512) f32

    # ---- maxpool 2x2 #1 directly on the in-register value.
    # y-pool: split the row dim (y*blk+b) into (y', pair, b) and max the pair.
    h1 = h1.reshape(H1 // 2, 2, blk, N1)
    p1y = jnp.maximum(h1[:, 0], h1[:, 1])                      # (8, blk, 512)
    # x-pool + lane compaction to the dense pooled layout (x'*32 + ci).
    left = jnp.concatenate(
        [p1y[:, :, (2 * x) * C1:(2 * x + 1) * C1] for x in range(W2P)], axis=2)
    right = jnp.concatenate(
        [p1y[:, :, (2 * x + 1) * C1:(2 * x + 2) * C1] for x in range(W2P)], axis=2)
    p1 = jnp.maximum(left, right).astype(jnp.bfloat16)         # (8, blk, 256)

    # ---- conv2 y-halo: park pool1 rows between two zero planes so the three
    # kernel rows become plain aligned plane-offset reads.
    zplane = jnp.zeros((1, blk, K2), jnp.bfloat16)
    p1_ref[0:1] = zplane
    p1_ref[9:10] = zplane
    p1_ref[1:9] = p1

    # ---- conv2 + bias + ReLU: 3 bf16 MXU matmuls (one per kernel row). ----
    acc = None
    for dy in range(3):
        slab = p1_ref[dy:dy + 8, :, :].reshape(8 * blk, K2)    # bf16, rows = y*blk+b
        term = jnp.dot(slab, w2_ref[dy], preferred_element_type=jnp.float32)
        acc = term if acc is None else acc + term
    a2 = jnp.maximum(acc + b2_ref[...], 0.0)                   # (8*blk, 512) f32

    # ---- maxpool 2x2 #2 + lane compaction straight into the output tile. ----
    a2 = a2.reshape(H3, 2, blk, N2)
    p2y = jnp.maximum(a2[:, 0], a2[:, 1])                      # (4, blk, 512)
    left2 = jnp.concatenate(
        [p2y[:, :, (2 * x) * C2:(2 * x + 1) * C2] for x in range(W3)], axis=2)
    right2 = jnp.concatenate(
        [p2y[:, :, (2 * x + 1) * C2:(2 * x + 2) * C2] for x in range(W3)], axis=2)
    out_ref[...] = jnp.maximum(left2, right2)                  # (4, blk, 256) f32


def _band_w1(w1):
    """OIHW (32,1,3,3) -> (54, 512) bf16 band: row = dy*18+xin, col = x*32+co."""
    dy = jnp.arange(3)[:, None, None, None]
    xin = jnp.arange(W1 + 2)[None, :, None, None]
    x = jnp.arange(W1)[None, None, :, None]
    co = jnp.arange(C1)[None, None, None, :]
    dx = xin - x
    w = w1.astype(jnp.float32)[co, 0, dy, jnp.clip(dx, 0, 2)]
    w = jnp.where((dx >= 0) & (dx <= 2), w, 0.0)
    return w.reshape(K1, N1).astype(jnp.bfloat16)


def _band_w2(w2):
    """OIHW (64,32,3,3) -> (3, 256, 512) bf16 bands over the DENSE pool1
    layout: row = g*32+ci (pooled x' = g), col = x*64+co, dx = g - x + 1."""
    dy = jnp.arange(3)[:, None, None, None, None]
    g = jnp.arange(W2P)[None, :, None, None, None]
    ci = jnp.arange(C1)[None, None, :, None, None]
    x = jnp.arange(W2P)[None, None, None, :, None]
    co = jnp.arange(C2)[None, None, None, None, :]
    dx = g - x + 1
    w = w2.astype(jnp.float32)[co, ci, dy, jnp.clip(dx, 0, 2)]
    w = jnp.where((dx >= 0) & (dx <= 2), w, 0.0)
    return w.reshape(3, K2, N2).astype(jnp.bfloat16)


@functools.partial(jax.jit, static_argnames=("block_n",))
def cnn_feature_extractor(x_nchw, w1, b1, w2, b2, block_n=128):
    """x: (N,1,16,16) f32, weights in PyTorch OIHW layout. Returns (N,64,4,4)."""
    n = x_nchw.shape[0]

    # Batch block: multiple of 16 (clean bf16 sublane packing); keep >= 2 grid
    # steps when the batch allows it so v7x's two TensorCores both get work.
    n16 = 16 * pl.cdiv(n, 16)
    blk = min(block_n, n16)
    if blk == n16 and n16 >= 32:
        blk = n16 // 2
    blk = max(16, (blk // 16) * 16)
    n_pad = blk * pl.cdiv(n, blk)

    x = x_nchw.reshape(n, H1, W1).astype(jnp.float32)
    if n_pad != n:
        x = jnp.concatenate([x, jnp.zeros((n_pad - n, H1, W1), jnp.float32)], 0)

    # Spatial zero-pad, pack the 3 kernel rows side by side and reorder to
    # (y, batch, 3*18). Matmul operands are bf16 (MXU-native on all three gens).
    xpad = jnp.pad(x, ((0, 0), (1, 1), (1, 1)))
    xcols = jnp.concatenate(
        [xpad[:, 0:H1, :], xpad[:, 1:H1 + 1, :], xpad[:, 2:H1 + 2, :]], axis=2)
    xcols = jnp.transpose(xcols, (1, 0, 2)).astype(jnp.bfloat16)   # (16, n_pad, 54)

    w1m, w2m = _band_w1(w1), _band_w2(w2)
    b1t = jnp.tile(b1.astype(jnp.float32), W1).reshape(1, N1)      # f32 epilogue
    b2t = jnp.tile(b2.astype(jnp.float32), W2P).reshape(1, N2)

    # VMEM budget derived from blk (dominant terms scale ~linearly with blk);
    # kept comfortably under v7x's 64 MiB/TC while allowing big blocks.
    vmem_limit = min(56, 8 + blk // 4) * 1024 * 1024

    out = pl.pallas_call(
        _cnn_kernel,
        out_shape=jax.ShapeDtypeStruct((H3, n_pad, NOUT), jnp.float32),
        grid_spec=pltpu.PrefetchScalarGridSpec(
            num_scalar_prefetch=0,
            grid=(n_pad // blk,),
            in_specs=[
                pl.BlockSpec((H1, blk, K1), lambda i: (0, i, 0)),
                pl.BlockSpec((K1, N1), lambda i: (0, 0)),
                pl.BlockSpec((1, N1), lambda i: (0, 0)),
                pl.BlockSpec((3, K2, N2), lambda i: (0, 0, 0)),
                pl.BlockSpec((1, N2), lambda i: (0, 0)),
            ],
            out_specs=pl.BlockSpec((H3, blk, NOUT), lambda i: (0, i, 0)),
            scratch_shapes=[
                pltpu.VMEM((W2P + 2, blk, K2), jnp.bfloat16),   # pool1 (+y-halo)
            ],
        ),
        compiler_params=pltpu.CompilerParams(
            dimension_semantics=("parallel",),          # v7x: feed both TensorCores
            vmem_limit_bytes=vmem_limit),
    )(xcols, w1m, b1t, w2m, b2t)

    # Kernel-native (y, batch, x*64+co) -> NCHW.
    out = jnp.transpose(out, (1, 0, 2)).reshape(n_pad, H3, W3, C2)[:n]   # NHWC
    return jnp.transpose(out, (0, 3, 1, 2))                              # NCHW


def _reference(x, w1, b1, w2, b2):
    dn = ('NCHW', 'OIHW', 'NCHW')
    y = jax.lax.conv_general_dilated(x, w1, (1, 1), 'SAME', dimension_numbers=dn)
    y = jnp.maximum(y + b1[None, :, None, None], 0.0)
    y = jax.lax.reduce_window(y, -jnp.inf, jax.lax.max,
                              (1, 1, 2, 2), (1, 1, 2, 2), 'VALID')
    y = jax.lax.conv_general_dilated(y, w2, (1, 1), 'SAME', dimension_numbers=dn)
    y = jnp.maximum(y + b2[None, :, None, None], 0.0)
    y = jax.lax.reduce_window(y, -jnp.inf, jax.lax.max,
                              (1, 1, 2, 2), (1, 1, 2, 2), 'VALID')
    return y


if __name__ == "__main__":
    key = jax.random.PRNGKey(0)
    kx, kw1, kb1, kw2, kb2 = jax.random.split(key, 5)

    w1 = jax.random.normal(kw1, (C1, 1, 3, 3), jnp.float32) * 0.3   # OIHW
    b1 = jax.random.normal(kb1, (C1,), jnp.float32) * 0.1
    w2 = jax.random.normal(kw2, (C2, C1, 3, 3), jnp.float32) * 0.1  # OIHW
    b2 = jax.random.normal(kb2, (C2,), jnp.float32) * 0.1

    # bf16 matmul operands (two chained convs) -> validate at bf16 tolerance.
    ATOL = RTOL = 5e-2

    # Small primary case (single grid step).
    N = 2
    x = jax.random.normal(kx, (N, 1, H1, W1), jnp.float32)
    out = jax.block_until_ready(cnn_feature_extractor(x, w1, b1, w2, b2))
    assert out.shape == (N, C2, H3, W3), out.shape
    ref = _reference(x, w1, b1, w2, b2)
    if not jnp.allclose(out, ref, atol=ATOL, rtol=RTOL):
        err = jnp.max(jnp.abs(out - ref))
        raise AssertionError(f"mismatch vs reference (N=2): max abs err {err}")

    # Multi-step case: exercises batch blocking, padding and truncation.
    N2B = 40
    x2 = jax.random.normal(kx, (N2B, 1, H1, W1), jnp.float32)
    out2 = jax.block_until_ready(cnn_feature_extractor(x2, w1, b1, w2, b2))
    assert out2.shape == (N2B, C2, H3, W3), out2.shape
    ref2 = _reference(x2, w1, b1, w2, b2)
    if not jnp.allclose(out2, ref2, atol=ATOL, rtol=RTOL):
        err = jnp.max(jnp.abs(out2 - ref2))
        raise AssertionError(f"mismatch vs reference (N=40): max abs err {err}")

    print("KERNEL_OK")
</pallas_src>

<mosaic_0001>
module attributes {stable_mosaic.version = 11 : i64} {
  func.func @_cnn_kernel(%arg0: i32, %arg1: memref<16x16x54xbf16, #tpu.memory_space<vmem>>, %arg2: memref<54x512xbf16, #tpu.memory_space<vmem>>, %arg3: memref<1x512xf32, #tpu.memory_space<vmem>>, %arg4: memref<3x256x512xbf16, #tpu.memory_space<vmem>>, %arg5: memref<1x512xf32, #tpu.memory_space<vmem>>, %arg6: memref<4x16x256xf32, #tpu.memory_space<vmem>>, %arg7: memref<10x16x256xbf16, #tpu.memory_space<vmem>>) attributes {dimension_semantics = [#tpu.dimension_semantics<parallel>], iteration_bounds = array<i64: 1>, scalar_prefetch = 0 : i64, scratch_operands = 1 : i64, tpu.core_type = #tpu.core_type<tc>, window_params = [{transform_indices = @transform_0, window_bounds = array<i64: 16, 16, 54>}, {pipeline_mode = #tpu.pipeline_mode<synchronous>, transform_indices = @transform_1, window_bounds = array<i64: 54, 512>}, {pipeline_mode = #tpu.pipeline_mode<synchronous>, transform_indices = @transform_2, window_bounds = array<i64: 1, 512>}, {pipeline_mode = #tpu.pipeline_mode<synchronous>, transform_indices = @transform_3, window_bounds = array<i64: 3, 256, 512>}, {pipeline_mode = #tpu.pipeline_mode<synchronous>, transform_indices = @transform_4, window_bounds = array<i64: 1, 512>}, {transform_indices = @transform_5, window_bounds = array<i64: 4, 16, 256>}]} {
    %c0 = arith.constant 0 : index
    %c0_0 = arith.constant 0 : index
    %c0_1 = arith.constant 0 : index
    %0 = vector.load %arg1[%c0, %c0_0, %c0_1] : memref<16x16x54xbf16, #tpu.memory_space<vmem>>, vector<16x16x54xbf16>
    %1 = vector.shape_cast %0 : vector<16x16x54xbf16> to vector<256x54xbf16>
    %c0_2 = arith.constant 0 : index
    %c0_3 = arith.constant 0 : index
    %2 = vector.load %arg2[%c0_2, %c0_3] : memref<54x512xbf16, #tpu.memory_space<vmem>>, vector<54x512xbf16>
    %cst = arith.constant dense<0.000000e+00> : vector<256x512xf32>
    %3 = tpu.matmul %1, %2, %cst {dimension_numbers = #tpu.dot_dimension_numbers<[1], [0], [0], [1], [0, 0, 1, 1], [], []>} : vector<256x54xbf16>, vector<54x512xbf16>, vector<256x512xf32> -> vector<256x512xf32>
    %c0_4 = arith.constant 0 : index
    %c0_5 = arith.constant 0 : index
    %4 = vector.load %arg3[%c0_4, %c0_5] : memref<1x512xf32, #tpu.memory_space<vmem>>, vector<1x512xf32>
    %5 = vector.broadcast %4 : vector<1x512xf32> to vector<256x512xf32>
    %6 = arith.addf %3, %5 : vector<256x512xf32>
    %cst_6 = arith.constant 0.000000e+00 : f32
    %7 = vector.broadcast %cst_6 : f32 to vector<256x512xf32>
    %8 = arith.maximumf %6, %7 : vector<256x512xf32>
    %9 = vector.shape_cast %8 : vector<256x512xf32> to vector<8x2x16x512xf32>
    %10 = vector.extract_strided_slice %9 {offsets = [0, 0, 0, 0], sizes = [8, 1, 16, 512], strides = [1, 1, 1, 1]} : vector<8x2x16x512xf32> to vector<8x1x16x512xf32>
    %11 = vector.shape_cast %10 : vector<8x1x16x512xf32> to vector<8x16x512xf32>
    %12 = vector.extract_strided_slice %9 {offsets = [0, 1, 0, 0], sizes = [8, 1, 16, 512], strides = [1, 1, 1, 1]} : vector<8x2x16x512xf32> to vector<8x1x16x512xf32>
    %13 = vector.shape_cast %12 : vector<8x1x16x512xf32> to vector<8x16x512xf32>
    %14 = arith.maximumf %11, %13 : vector<8x16x512xf32>
    %15 = vector.extract_strided_slice %14 {offsets = [0, 0, 0], sizes = [8, 16, 32], strides = [1, 1, 1]} : vector<8x16x512xf32> to vector<8x16x32xf32>
    %16 = vector.extract_strided_slice %14 {offsets = [0, 0, 64], sizes = [8, 16, 32], strides = [1, 1, 1]} : vector<8x16x512xf32> to vector<8x16x32xf32>
    %17 = vector.extract_strided_slice %14 {offsets = [0, 0, 128], sizes = [8, 16, 32], strides = [1, 1, 1]} : vector<8x16x512xf32> to vector<8x16x32xf32>
    %18 = vector.extract_strided_slice %14 {offsets = [0, 0, 192], sizes = [8, 16, 32], strides = [1, 1, 1]} : vector<8x16x512xf32> to vector<8x16x32xf32>
    %19 = vector.extract_strided_slice %14 {offsets = [0, 0, 256], sizes = [8, 16, 32], strides = [1, 1, 1]} : vector<8x16x512xf32> to vector<8x16x32xf32>
    %20 = vector.extract_strided_slice %14 {offsets = [0, 0, 320], sizes = [8, 16, 32], strides = [1, 1, 1]} : vector<8x16x512xf32> to vector<8x16x32xf32>
    %21 = vector.extract_strided_slice %14 {offsets = [0, 0, 384], sizes = [8, 16, 32], strides = [1, 1, 1]} : vector<8x16x512xf32> to vector<8x16x32xf32>
    %22 = vector.extract_strided_slice %14 {offsets = [0, 0, 448], sizes = [8, 16, 32], strides = [1, 1, 1]} : vector<8x16x512xf32> to vector<8x16x32xf32>
    %23 = tpu.concatenate %15, %16, %17, %18, %19, %20, %21, %22 in 2 : vector<8x16x32xf32>, vector<8x16x32xf32>, vector<8x16x32xf32>, vector<8x16x32xf32>, vector<8x16x32xf32>, vector<8x16x32xf32>, vector<8x16x32xf32>, vector<8x16x32xf32> -> vector<8x16x256xf32>
    %24 = vector.extract_strided_slice %14 {offsets = [0, 0, 32], sizes = [8, 16, 32], strides = [1, 1, 1]} : vector<8x16x512xf32> to vector<8x16x32xf32>
    %25 = vector.extract_strided_slice %14 {offsets = [0, 0, 96], sizes = [8, 16, 32], strides = [1, 1, 1]} : vector<8x16x512xf32> to vector<8x16x32xf32>
    %26 = vector.extract_strided_slice %14 {offsets = [0, 0, 160], sizes = [8, 16, 32], strides = [1, 1, 1]} : vector<8x16x512xf32> to vector<8x16x32xf32>
    %27 = vector.extract_strided_slice %14 {offsets = [0, 0, 224], sizes = [8, 16, 32], strides = [1, 1, 1]} : vector<8x16x512xf32> to vector<8x16x32xf32>
    %28 = vector.extract_strided_slice %14 {offsets = [0, 0, 288], sizes = [8, 16, 32], strides = [1, 1, 1]} : vector<8x16x512xf32> to vector<8x16x32xf32>
    %29 = vector.extract_strided_slice %14 {offsets = [0, 0, 352], sizes = [8, 16, 32], strides = [1, 1, 1]} : vector<8x16x512xf32> to vector<8x16x32xf32>
    %30 = vector.extract_strided_slice %14 {offsets = [0, 0, 416], sizes = [8, 16, 32], strides = [1, 1, 1]} : vector<8x16x512xf32> to vector<8x16x32xf32>
    %31 = vector.extract_strided_slice %14 {offsets = [0, 0, 480], sizes = [8, 16, 32], strides = [1, 1, 1]} : vector<8x16x512xf32> to vector<8x16x32xf32>
    %32 = tpu.concatenate %24, %25, %26, %27, %28, %29, %30, %31 in 2 : vector<8x16x32xf32>, vector<8x16x32xf32>, vector<8x16x32xf32>, vector<8x16x32xf32>, vector<8x16x32xf32>, vector<8x16x32xf32>, vector<8x16x32xf32>, vector<8x16x32xf32> -> vector<8x16x256xf32>
    %33 = arith.maximumf %23, %32 : vector<8x16x256xf32>
    %34 = arith.truncf %33 : vector<8x16x256xf32> to vector<8x16x256xbf16>
    %cst_7 = arith.constant 0.000000e+00 : bf16
    %35 = vector.broadcast %cst_7 : bf16 to vector<1x16x256xbf16>
    %c0_8 = arith.constant 0 : index
    %c0_9 = arith.constant 0 : index
    %c0_10 = arith.constant 0 : index
    %36 = vector.load %arg7[%c0_8, %c0_9, %c0_10] : memref<10x16x256xbf16, #tpu.memory_space<vmem>>, vector<1x16x256xbf16>
    tpu.vector_store %arg7[%c0_8, %c0_9, %c0_10], %35 {strides = array<i32>} : memref<10x16x256xbf16, #tpu.memory_space<vmem>>, vector<1x16x256xbf16>,
    %c9 = arith.constant 9 : index
    %c0_11 = arith.constant 0 : index
    %c0_12 = arith.constant 0 : index
    %37 = vector.load %arg7[%c9, %c0_11, %c0_12] : memref<10x16x256xbf16, #tpu.memory_space<vmem>>, vector<1x16x256xbf16>
    tpu.vector_store %arg7[%c9, %c0_11, %c0_12], %35 {strides = array<i32>} : memref<10x16x256xbf16, #tpu.memory_space<vmem>>, vector<1x16x256xbf16>,
    %c1 = arith.constant 1 : index
    %c0_13 = arith.constant 0 : index
    %c0_14 = arith.constant 0 : index
    %38 = vector.load %arg7[%c1, %c0_13, %c0_14] : memref<10x16x256xbf16, #tpu.memory_space<vmem>>, vector<8x16x256xbf16>
    tpu.vector_store %arg7[%c1, %c0_13, %c0_14], %34 {strides = array<i32>} : memref<10x16x256xbf16, #tpu.memory_space<vmem>>, vector<8x16x256xbf16>,
    %c0_15 = arith.constant 0 : index
    %c0_16 = arith.constant 0 : index
    %c0_17 = arith.constant 0 : index
    %39 = vector.load %arg7[%c0_15, %c0_16, %c0_17] : memref<10x16x256xbf16, #tpu.memory_space<vmem>>, vector<8x16x256xbf16>
    %40 = vector.shape_cast %39 : vector<8x16x256xbf16> to vector<128x256xbf16>
    %c0_18 = arith.constant 0 : index
    %c0_19 = arith.constant 0 : index
    %c0_20 = arith.constant 0 : index
    %41 = vector.load %arg4[%c0_18, %c0_19, %c0_20] : memref<3x256x512xbf16, #tpu.memory_space<vmem>>, vector<1x256x512xbf16>
    %42 = vector.shape_cast %41 : vector<1x256x512xbf16> to vector<256x512xbf16>
    %cst_21 = arith.constant dense<0.000000e+00> : vector<128x512xf32>
    %43 = tpu.matmul %40, %42, %cst_21 {dimension_numbers = #tpu.dot_dimension_numbers<[1], [0], [0], [1], [0, 0, 1, 1], [], []>} : vector<128x256xbf16>, vector<256x512xbf16>, vector<128x512xf32> -> vector<128x512xf32>
    %c1_22 = arith.constant 1 : index
    %c0_23 = arith.constant 0 : index
    %c0_24 = arith.constant 0 : index
    %44 = vector.load %arg7[%c1_22, %c0_23, %c0_24] : memref<10x16x256xbf16, #tpu.memory_space<vmem>>, vector<8x16x256xbf16>
    %45 = vector.shape_cast %44 : vector<8x16x256xbf16> to vector<128x256xbf16>
    %c1_25 = arith.constant 1 : index
    %c0_26 = arith.constant 0 : index
    %c0_27 = arith.constant 0 : index
    %46 = vector.load %arg4[%c1_25, %c0_26, %c0_27] : memref<3x256x512xbf16, #tpu.memory_space<vmem>>, vector<1x256x512xbf16>
    %47 = vector.shape_cast %46 : vector<1x256x512xbf16> to vector<256x512xbf16>
    %cst_28 = arith.constant dense<0.000000e+00> : vector<128x512xf32>
    %48 = tpu.matmul %45, %47, %cst_28 {dimension_numbers = #tpu.dot_dimension_numbers<[1], [0], [0], [1], [0, 0, 1, 1], [], []>} : vector<128x256xbf16>, vector<256x512xbf16>, vector<128x512xf32> -> vector<128x512xf32>
    %49 = arith.addf %43, %48 : vector<128x512xf32>
    %c2 = arith.constant 2 : index
    %c0_29 = arith.constant 0 : index
    %c0_30 = arith.constant 0 : index
    %50 = vector.load %arg7[%c2, %c0_29, %c0_30] : memref<10x16x256xbf16, #tpu.memory_space<vmem>>, vector<8x16x256xbf16>
    %51 = vector.shape_cast %50 : vector<8x16x256xbf16> to vector<128x256xbf16>
    %c2_31 = arith.constant 2 : index
    %c0_32 = arith.constant 0 : index
    %c0_33 = arith.constant 0 : index
    %52 = vector.load %arg4[%c2_31, %c0_32, %c0_33] : memref<3x256x512xbf16, #tpu.memory_space<vmem>>, vector<1x256x512xbf16>
    %53 = vector.shape_cast %52 : vector<1x256x512xbf16> to vector<256x512xbf16>
    %cst_34 = arith.constant dense<0.000000e+00> : vector<128x512xf32>
    %54 = tpu.matmul %51, %53, %cst_34 {dimension_numbers = #tpu.dot_dimension_numbers<[1], [0], [0], [1], [0, 0, 1, 1], [], []>} : vector<128x256xbf16>, vector<256x512xbf16>, vector<128x512xf32> -> vector<128x512xf32>
    %55 = arith.addf %49, %54 : vector<128x512xf32>
    %c0_35 = arith.constant 0 : index
    %c0_36 = arith.constant 0 : index
    %56 = vector.load %arg5[%c0_35, %c0_36] : memref<1x512xf32, #tpu.memory_space<vmem>>, vector<1x512xf32>
    %57 = vector.broadcast %56 : vector<1x512xf32> to vector<128x512xf32>
    %58 = arith.addf %55, %57 : vector<128x512xf32>
    %cst_37 = arith.constant 0.000000e+00 : f32
    %59 = vector.broadcast %cst_37 : f32 to vector<128x512xf32>
    %60 = arith.maximumf %58, %59 : vector<128x512xf32>
    %61 = vector.shape_cast %60 : vector<128x512xf32> to vector<4x2x16x512xf32>
    %62 = vector.extract_strided_slice %61 {offsets = [0, 0, 0, 0], sizes = [4, 1, 16, 512], strides = [1, 1, 1, 1]} : vector<4x2x16x512xf32> to vector<4x1x16x512xf32>
    %63 = vector.shape_cast %62 : vector<4x1x16x512xf32> to vector<4x16x512xf32>
    %64 = vector.extract_strided_slice %61 {offsets = [0, 1, 0, 0], sizes = [4, 1, 16, 512], strides = [1, 1, 1, 1]} : vector<4x2x16x512xf32> to vector<4x1x16x512xf32>
    %65 = vector.shape_cast %64 : vector<4x1x16x512xf32> to vector<4x16x512xf32>
    %66 = arith.maximumf %63, %65 : vector<4x16x512xf32>
    %67 = vector.extract_strided_slice %66 {offsets = [0, 0, 0], sizes = [4, 16, 64], strides = [1, 1, 1]} : vector<4x16x512xf32> to vector<4x16x64xf32>
    %68 = vector.extract_strided_slice %66 {offsets = [0, 0, 128], sizes = [4, 16, 64], strides = [1, 1, 1]} : vector<4x16x512xf32> to vector<4x16x64xf32>
    %69 = vector.extract_strided_slice %66 {offsets = [0, 0, 256], sizes = [4, 16, 64], strides = [1, 1, 1]} : vector<4x16x512xf32> to vector<4x16x64xf32>
    %70 = vector.extract_strided_slice %66 {offsets = [0, 0, 384], sizes = [4, 16, 64], strides = [1, 1, 1]} : vector<4x16x512xf32> to vector<4x16x64xf32>
    %71 = tpu.concatenate %67, %68, %69, %70 in 2 : vector<4x16x64xf32>, vector<4x16x64xf32>, vector<4x16x64xf32>, vector<4x16x64xf32> -> vector<4x16x256xf32>
    %72 = vector.extract_strided_slice %66 {offsets = [0, 0, 64], sizes = [4, 16, 64], strides = [1, 1, 1]} : vector<4x16x512xf32> to vector<4x16x64xf32>
    %73 = vector.extract_strided_slice %66 {offsets = [0, 0, 192], sizes = [4, 16, 64], strides = [1, 1, 1]} : vector<4x16x512xf32> to vector<4x16x64xf32>
    %74 = vector.extract_strided_slice %66 {offsets = [0, 0, 320], sizes = [4, 16, 64], strides = [1, 1, 1]} : vector<4x16x512xf32> to vector<4x16x64xf32>
    %75 = vector.extract_strided_slice %66 {offsets = [0, 0, 448], sizes = [4, 16, 64], strides = [1, 1, 1]} : vector<4x16x512xf32> to vector<4x16x64xf32>
    %76 = tpu.concatenate %72, %73, %74, %75 in 2 : vector<4x16x64xf32>, vector<4x16x64xf32>, vector<4x16x64xf32>, vector<4x16x64xf32> -> vector<4x16x256xf32>
    %77 = arith.maximumf %71, %76 : vector<4x16x256xf32>
    %c0_38 = arith.constant 0 : index
    %c0_39 = arith.constant 0 : index
    %c0_40 = arith.constant 0 : index
    %78 = vector.load %arg6[%c0_38, %c0_39, %c0_40] : memref<4x16x256xf32, #tpu.memory_space<vmem>>, vector<4x16x256xf32>
    tpu.vector_store %arg6[%c0_38, %c0_39, %c0_40], %77 {strides = array<i32>} : memref<4x16x256xf32, #tpu.memory_space<vmem>>, vector<4x16x256xf32>,
    return
  }
  func.func @transform_0(%arg0: i32) -> (i32, i32, i32) {
    %c0_i32 = arith.constant 0 : i32
    %c0_i32_0 = arith.constant 0 : i32
    %c0_i32_1 = arith.constant 0 : i32
    return %c0_i32, %arg0, %c0_i32_0 : i32, i32, i32
  }
  func.func @transform_1(%arg0: i32) -> (i32, i32) {
    %c0_i32 = arith.constant 0 : i32
    %c0_i32_0 = arith.constant 0 : i32
    %c0_i32_1 = arith.constant 0 : i32
    return %c0_i32, %c0_i32_0 : i32, i32
  }
  func.func @transform_2(%arg0: i32) -> (i32, i32) {
    %c0_i32 = arith.constant 0 : i32
    %c0_i32_0 = arith.constant 0 : i32
    %c0_i32_1 = arith.constant 0 : i32
    return %c0_i32, %c0_i32_0 : i32, i32
  }
  func.func @transform_3(%arg0: i32) -> (i32, i32, i32) {
    %c0_i32 = arith.constant 0 : i32
    %c0_i32_0 = arith.constant 0 : i32
    %c0_i32_1 = arith.constant 0 : i32
    %c0_i32_2 = arith.constant 0 : i32
    return %c0_i32, %c0_i32_0, %c0_i32_1 : i32, i32, i32
  }
  func.func @transform_4(%arg0: i32) -> (i32, i32) {
    %c0_i32 = arith.constant 0 : i32
    %c0_i32_0 = arith.constant 0 : i32
    %c0_i32_1 = arith.constant 0 : i32
    return %c0_i32, %c0_i32_0 : i32, i32
  }
  func.func @transform_5(%arg0: i32) -> (i32, i32, i32) {
    %c0_i32 = arith.constant 0 : i32
    %c0_i32_0 = arith.constant 0 : i32
    %c0_i32_1 = arith.constant 0 : i32
    return %c0_i32, %arg0, %c0_i32_0 : i32, i32, i32
  }
}

</mosaic_0001>

<bundles_post_ra>
// kernel: tile.13
= control target key start
LH: loop header
LB: loop body
LE: loop exit
PB: predicated region body
PF: predicated region fallthrough
CT: control target
= control target key end

     0   :  { %s28_s0 = inlined_call_operand.vmem [shape: f32[32], index: 0, kind: input, shape index: {}]   ;;  %s29_s1 = inlined_call_operand.vmem [shape: f32[16,32], index: 1, kind: output, shape index: {}]  }
   0x1   :  { %v4_v0 = vld [vmem:[%s28_s0] ss:$0 sm:$0xff] }
   0x2   :  { %5 = vst [vmem:[%s29_s1] sm:$0xff] %v4_v0  ;;  %8 = vst [vmem:[%s29_s1 + $0x8] sm:$0xff] %v4_v0 }

// kernel: tile.14
= control target key start
LH: loop header
LB: loop body
LE: loop exit
PB: predicated region body
PF: predicated region fallthrough
CT: control target
= control target key end

     0   :  { %s62_s8 = smov 96   ;;  %vm3_vm0 = vcmask 261120   ;;  %s64_s15 = smov 64   ;;  %vm9_vm1 = vcmask 1048320   ;;  %vm15_vm2 = vcmask 785920   ;;  %vm21_vm3 = vcmask 523520   ;;  %s99_s0 = inlined_call_operand.vmem [shape: f32[16,32], index: 0, kind: input, shape index: {}]   ;;  %s100_s1 = inlined_call_operand.vmem [shape: f32[1,512], index: 1, kind: output, shape index: {}]  }
   0x1   :  { %v53_v0 = vld [vmem:[%s99_s0 + $0x3] ss:$4 sm:$0xf]   ;;  %v54_v1 = vld [vmem:[%s99_s0 + $0x2] ss:$4 sm:$0xf]  }
   0x2   :  { %7 = vrot.lane.b32.xlu0 %v53_v0, %s62_s8  ;;  %v55_v2 = vld [vmem:[%s99_s0 + $0x1] ss:$4 sm:$0xf]   ;;  %v2_v3 = vld [vmem:[%s99_s0] ss:$4 sm:$0xf]  }
   0x3   :  { %s63_s0 = smov 32   ;;  %4 = vst.msk [vmem:[#allocation0] ss:$8 sm:$0xf] %vm3_vm0, %v2_v3  }
   0x4   :  { %19 = vrot.lane.b32.xlu1 %v55_v2, %s63_s0 }
   0x6   :  { %13 = vrot.lane.b32.xlu0 %v54_v1, %s64_s15 }
  0x74   :  { %v8_v4 = vpop.permute.xlu0 %7  }
  0x75   :  { %10 = vst.msk [vmem:[#allocation0] ss:$8 sm:$0xf] %vm9_vm1, %v8_v4  }
  0x76   :  { %v20_v5 = vpop.permute.xlu1 %19  }
  0x78   :  { %v14_v6 = vpop.permute.xlu0 %13  }
  0x79   :  { %16 = vst.msk [vmem:[#allocation0] ss:$8 sm:$0xf] %vm15_vm2, %v14_v6  }
  0x7a   :  { %22 = vst.msk [vmem:[#allocation0] ss:$8 sm:$0xf] %vm21_vm3, %v20_v5  }
  0x81   :  { %v27_v7 = vld [vmem:[#allocation0] sm:$0x1]  ;;  %v32_v8 = vld [vmem:[#allocation0 + $0x8] sm:$0x1]  ;;  %v38_v9 = vld [vmem:[#allocation0 + $0x10] sm:$0x1] }
  0x82   :  { %30 = vst [vmem:[%s100_s1] sm:$0x1] %v27_v7  ;;  %56 = vst [vmem:[%s100_s1 + $0x1] sm:$0x1] %v32_v8  ;;  %v45_v10 = vld [vmem:[#allocation0 + $0x18] sm:$0x1] }
  0x83   :  { %57 = vst [vmem:[%s100_s1 + $0x2] sm:$0x1] %v38_v9  ;;  %58 = vst [vmem:[%s100_s1 + $0x3] sm:$0x1] %v45_v10 }

// kernel: tile.18
= control target key start
LH: loop header
LB: loop body
LE: loop exit
PB: predicated region body
PF: predicated region fallthrough
CT: control target
= control target key end

     0   :  { %s22_s0 = inlined_call_operand.vmem [shape: f32[64], index: 0, kind: input, shape index: {}]   ;;  %s23_s1 = inlined_call_operand.vmem [shape: f32[8,64], index: 1, kind: output, shape index: {}]  }
   0x1   :  { %v4_v0 = vld [vmem:[%s22_s0] ss:$0 sm:$0xff] }
   0x2   :  { %5 = vst [vmem:[%s23_s1] sm:$0xff] %v4_v0 }

// kernel: tile.19
= control target key start
LH: loop header
LB: loop body
LE: loop exit
PB: predicated region body
PF: predicated region fallthrough
CT: control target
= control target key end

     0   :  { %vm3_vm0 = vcmask 523264   ;;  %s46_s8 = smov 64   ;;  %vm9_vm1 = vcmask 1048064   ;;  %s75_s0 = inlined_call_operand.vmem [shape: f32[8,64], index: 0, kind: input, shape index: {}]   ;;  %s76_s1 = inlined_call_operand.vmem [shape: f32[1,512], index: 1, kind: output, shape index: {}]  }
   0x1   :  { %v41_v0 = vld [vmem:[%s75_s0 + $0x1] ss:$2 sm:$0xf]   ;;  %v2_v1 = vld [vmem:[%s75_s0] ss:$2 sm:$0xf]  }
   0x2   :  { %7 = vrot.lane.b32.xlu0 %v41_v0, %s46_s8  ;;  %4 = vst.msk [vmem:[#allocation0] ss:$8 sm:$0xf] %vm3_vm0, %v2_v1  }
  0x74   :  { %v8_v2 = vpop.permute.xlu0 %7  }
  0x75   :  { %10 = vst.msk [vmem:[#allocation0] ss:$8 sm:$0xf] %vm9_vm1, %v8_v2  }
  0x7c   :  { %v15_v3 = vld [vmem:[#allocation0] sm:$0x1]  ;;  %v20_v4 = vld [vmem:[#allocation0 + $0x8] sm:$0x1]  ;;  %v26_v5 = vld [vmem:[#allocation0 + $0x10] sm:$0x1] }
  0x7d   :  { %18 = vst [vmem:[%s76_s1] sm:$0x1] %v15_v3  ;;  %42 = vst [vmem:[%s76_s1 + $0x1] sm:$0x1] %v20_v4  ;;  %v33_v6 = vld [vmem:[#allocation0 + $0x18] sm:$0x1] }
  0x7e   :  { %43 = vst [vmem:[%s76_s1 + $0x2] sm:$0x1] %v26_v5  ;;  %44 = vst [vmem:[%s76_s1 + $0x3] sm:$0x1] %v33_v6 }

// kernel: cnn_feature_extractor.1
= control target key start
LH: loop header
LB: loop body
LE: loop exit
PB: predicated region body
PF: predicated region fallthrough
CT: control target
= control target key end

     0   :  { %vm288_vm0 = vcmask 1042432   ;;  %v7841_v2 = vmov 0   ;;  %vm239_vm1 = vcmask 441344   ;;  %s5369_s15 = smov 64   ;;  %s5370_s22 = smov 32   ;;  %vm1231_vm2 = vcmask 261120   ;;  %s7831_s1 = inlined_call_operand.vmem [shape: bf16[54,512], index: 1, kind: input, shape index: {}]   ;;  %s7832_s0 = inlined_call_operand.vmem [shape: bf16[16,16,54], index: 0, kind: input, shape index: {}]   ;;  %s7833_s3 = inlined_call_operand.vmem [shape: bf16[3,256,512], index: 3, kind: input, shape index: {}]   ;;  %s7834_s2 = inlined_call_operand.vmem [shape: f32[1,512], index: 2, kind: input, shape index: {}]   ;;  %s7835_s4 = inlined_call_operand.vmem [shape: f32[1,512], index: 4, kind: input, shape index: {}]   ;;  %s7836_s5 = inlined_call_operand.vmem [shape: f32[4,16,256], index: 5, kind: output, shape index: {}]  }
   0x1   :  { %v65_v0 = vld [vmem:[%s7831_s1 + $0x60] sm:$0x77]  ;;  %v66_v1 = vld [vmem:[%s7831_s1 + $0x68] sm:$0x77]  ;;  %333 = vmatprep.mubr.bf16.mxu0 %v7841_v2  ;;  %526 = vmatprep.mubr.bf16.mxu1 %v7841_v2  ;;  %v5065_v23 = vld [vmem:[%s7832_s0 + $0x10] sm:$0xff]   ;;  %vm1248_vm3 = vcmask 523264  }
   0x2   :  { %v4264_v3 = vcombine.high %v65_v0, %v65_v0  ;;  %v4266_v4 = vcombine.high %v66_v1, %v66_v1  ;;  %v4263_v5 = vcombine.low %v65_v0, %v65_v0  ;;  %v4265_v6 = vcombine.low %v66_v1, %v66_v1  ;;  %v5045_v7 = vld [vmem:[%s7831_s1 + $0x44] ss:$16 sps:$4 sm:$0xff]   ;;  %v5047_v8 = vld [vmem:[%s7831_s1 + $0x4c] ss:$16 sps:$4 sm:$0xff]   ;;  %v5049_v11 = vld [vmem:[%s7831_s1 + $0x40] ss:$16 sps:$4 sm:$0xff]  }
   0x3   :  { %v5050_v12 = vld [vmem:[%s7831_s1 + $0x48] ss:$16 sps:$4 sm:$0xff]   ;;  %v5051_v13 = vld [vmem:[%s7831_s1 + $0x24] ss:$16 sps:$4 sm:$0xff]   ;;  %v5053_v14 = vld [vmem:[%s7831_s1 + $0x2c] ss:$16 sps:$4 sm:$0xff]  }
   0x4   :  { %4267 = vmatprep.subr.msk.bf16.mxu0 %vm288_vm0, %v4264_v3  ;;  %4284 = vmatprep.subr.msk.bf16.mxu1 %vm288_vm0, %v4266_v4  ;;  %v290_v9 = vsel %vm288_vm0, %v4263_v5, 0  ;;  %v296_v10 = vsel %vm288_vm0, %v4265_v6, 0  ;;  %v5055_v15 = vld [vmem:[%s7831_s1 + $0x20] ss:$16 sps:$4 sm:$0xff]   ;;  %v5056_v16 = vld [vmem:[%s7831_s1 + $0x28] ss:$16 sps:$4 sm:$0xff]   ;;  %v69_v6 = vlaneseq }
   0x5   :  { %310 = vmatpush1.bf16.msra.mxu0 %v290_v9  ;;  %503 = vmatpush1.bf16.msra.mxu1 %v296_v10  ;;  %v5057_v17 = vld [vmem:[%s7831_s1 + $0x4] ss:$16 sps:$4 sm:$0xff]   ;;  %v5059_v18 = vld [vmem:[%s7831_s1 + $0xc] ss:$16 sps:$4 sm:$0xff]   ;;  %v5061_v19 = vld [vmem:[%s7831_s1] ss:$16 sps:$4 sm:$0xff]  }
   0x6   :  { %311 = vmatprep.subr.bf16.mxu0 %v5045_v7  ;;  %504 = vmatprep.subr.bf16.mxu1 %v5047_v8  ;;  %v5062_v20 = vld [vmem:[%s7831_s1 + $0x8] ss:$16 sps:$4 sm:$0xff]   ;;  %v5063_v21 = vld [vmem:[%s7832_s0] sm:$0xff]   ;;  %v5069_v27 = vld [vmem:[%s7832_s0 + $0x30] sm:$0xff]   ;;  %vm1265_vm4 = vcmask 785408  }
   0x7   :  { %v5064_v22 = vld [vmem:[%s7832_s0 + $0x8] sm:$0xff]   ;;  %v5066_v24 = vld [vmem:[%s7832_s0 + $0x18] sm:$0xff]   ;;  %v5067_v25 = vld [vmem:[%s7832_s0 + $0x20] sm:$0xff]  }
   0x8   :  { %v5068_v26 = vld [vmem:[%s7832_s0 + $0x28] sm:$0xff]   ;;  %v5070_v28 = vld [vmem:[%s7832_s0 + $0x38] sm:$0xff]   ;;  %v5071_v29 = vld [vmem:[%s7832_s0 + $0x40] sm:$0xff]  }
   0x9   :  { %312 = vmatpush1.bf16.msra.mxu0 %v5049_v11  ;;  %505 = vmatpush1.bf16.msra.mxu1 %v5050_v12  ;;  %v5072_v30 = vld [vmem:[%s7832_s0 + $0x48] sm:$0xff]   ;;  %v5073_v31 = vld [vmem:[%s7832_s0 + $0x50] sm:$0xff]   ;;  %v5074_v32 = vld [vmem:[%s7832_s0 + $0x58] sm:$0xff]   ;;  %v5663_v11 = vshrl.u32 %v69_v6, 7 }
   0xa   :  { %313 = vmatprep.subr.bf16.mxu0 %v5051_v13  ;;  %506 = vmatprep.subr.bf16.mxu1 %v5053_v14  ;;  %v5075_v33 = vld [vmem:[%s7832_s0 + $0x60] sm:$0xff]   ;;  %v5076_v34 = vld [vmem:[%s7832_s0 + $0x68] sm:$0xff]   ;;  %v5077_v35 = vld [vmem:[%s7832_s0 + $0x70] sm:$0xff]  }
   0xb   :  { %v5078_v36 = vld [vmem:[%s7832_s0 + $0x78] sm:$0xff]   ;;  %v5079_v37 = vld [vmem:[%s7833_s3 + $0x2e0] ss:$16 sps:$4 sm:$0xff]   ;;  %v5081_v38 = vld [vmem:[%s7833_s3 + $0x2e4] ss:$16 sps:$4 sm:$0xff]   ;;  %7869 = vst [vmem:[#allocation3_spill] sm:$0xff] %v5663_v11 }
   0xc   :  { %v5082_v39 = vld [vmem:[%s7833_s3 + $0x2e8] ss:$16 sps:$4 sm:$0xff]   ;;  %v5084_v40 = vld [vmem:[%s7833_s3 + $0x2ec] ss:$16 sps:$4 sm:$0xff]   ;;  %v5085_v41 = vld [vmem:[%s7833_s3 + $0x2c0] ss:$16 sps:$4 sm:$0xff]  }
   0xd   :  { %314 = vmatpush1.bf16.msra.mxu0 %v5055_v15  ;;  %507 = vmatpush1.bf16.msra.mxu1 %v5056_v16  ;;  %v5087_v42 = vld [vmem:[%s7833_s3 + $0x2c4] ss:$16 sps:$4 sm:$0xff]   ;;  %v5090_v43 = vld [vmem:[%s7833_s3 + $0x2cc] ss:$16 sps:$4 sm:$0xff]   ;;  %v5088_v44 = vld [vmem:[%s7833_s3 + $0x2c8] ss:$16 sps:$4 sm:$0xff]  }
   0xe   :  { %315 = vmatprep.subr.bf16.mxu0 %v5057_v17  ;;  %508 = vmatprep.subr.bf16.mxu1 %v5059_v18  ;;  %v5093_v45 = vld [vmem:[%s7833_s3 + $0x2a4] ss:$16 sps:$4 sm:$0xff]   ;;  %v5096_v46 = vld [vmem:[%s7833_s3 + $0x2ac] ss:$16 sps:$4 sm:$0xff]   ;;  %v5091_v47 = vld [vmem:[%s7833_s3 + $0x2a0] ss:$16 sps:$4 sm:$0xff]  }
   0xf   :  { %v5094_v48 = vld [vmem:[%s7833_s3 + $0x2a8] ss:$16 sps:$4 sm:$0xff]   ;;  %v5099_v49 = vld [vmem:[%s7833_s3 + $0x284] ss:$16 sps:$4 sm:$0xff]   ;;  %v5102_v50 = vld [vmem:[%s7833_s3 + $0x28c] ss:$16 sps:$4 sm:$0xff]  }
  0x10   :  { %v5097_v51 = vld [vmem:[%s7833_s3 + $0x280] ss:$16 sps:$4 sm:$0xff]   ;;  %v5100_v52 = vld [vmem:[%s7833_s3 + $0x288] ss:$16 sps:$4 sm:$0xff]   ;;  %v5105_v53 = vld [vmem:[%s7833_s3 + $0x264] ss:$16 sps:$4 sm:$0xff]  }
  0x11   :  { %316 = vmatpush1.bf16.msra.mxu0 %v5061_v19  ;;  %509 = vmatpush1.bf16.msra.mxu1 %v5062_v20  ;;  %v5108_v54 = vld [vmem:[%s7833_s3 + $0x26c] ss:$16 sps:$4 sm:$0xff]   ;;  %v5103_v55 = vld [vmem:[%s7833_s3 + $0x260] ss:$16 sps:$4 sm:$0xff]   ;;  %v5106_v56 = vld [vmem:[%s7833_s3 + $0x268] ss:$16 sps:$4 sm:$0xff]  }
  0x12   :  { %2233 = vmatprep.subr.bf16.mxu0 %v5081_v38  ;;  %2346 = vmatprep.subr.bf16.mxu1 %v5084_v40  ;;  %v5111_v57 = vld [vmem:[%s7833_s3 + $0x244] ss:$16 sps:$4 sm:$0xff]   ;;  %v5114_v58 = vld [vmem:[%s7833_s3 + $0x24c] ss:$16 sps:$4 sm:$0xff]   ;;  %v5109_v59 = vld [vmem:[%s7833_s3 + $0x240] ss:$16 sps:$4 sm:$0xff]  }
  0x13   :  { %v5112_v60 = vld [vmem:[%s7833_s3 + $0x248] ss:$16 sps:$4 sm:$0xff]   ;;  %v5117_v61 = vld [vmem:[%s7833_s3 + $0x224] ss:$16 sps:$4 sm:$0xff]   ;;  %v5120_v62 = vld [vmem:[%s7833_s3 + $0x22c] ss:$16 sps:$4 sm:$0xff]  }
  0x14   :  { %4268 = vmatmul.mubr.msk.bf16.vlgmr.msra.gmra.mxu0 %vm239_vm1, %v5063_v21  ;;  %4285 = vmatmul.mubr.msk.bf16.vlgmr.msra.gmra.mxu1 %vm239_vm1, %v5063_v21  ;;  %v5115_v63 = vld [vmem:[%s7833_s3 + $0x220] ss:$16 sps:$4 sm:$0xff]   ;;  %v5118_v0 = vld [vmem:[%s7833_s3 + $0x228] ss:$16 sps:$4 sm:$0xff]   ;;  %v5123_v1 = vld [vmem:[%s7833_s3 + $0x204] ss:$16 sps:$4 sm:$0xff]  }
  0x15   :  { %343 = vmatprep.mubr.bf16.mxu0 %v7841_v2  ;;  %536 = vmatprep.mubr.bf16.mxu1 %v7841_v2  ;;  %v5126_v3 = vld [vmem:[%s7833_s3 + $0x20c] ss:$16 sps:$4 sm:$0xff]   ;;  %v5121_v4 = vld [vmem:[%s7833_s3 + $0x200] ss:$16 sps:$4 sm:$0xff]   ;;  %v5124_v5 = vld [vmem:[%s7833_s3 + $0x208] ss:$16 sps:$4 sm:$0xff]  }
  0x16   :  { %2234 = vmatpush1.bf16.msra.mxu0 %v5079_v37  ;;  %2347 = vmatpush1.bf16.msra.mxu1 %v5082_v39  ;;  %v5129_v7 = vld [vmem:[%s7833_s3 + $0x3e4] ss:$16 sps:$4 sm:$0xff]   ;;  %v5132_v8 = vld [vmem:[%s7833_s3 + $0x3ec] ss:$16 sps:$4 sm:$0xff]   ;;  %v5127_v9 = vld [vmem:[%s7833_s3 + $0x3e0] ss:$16 sps:$4 sm:$0xff]  }
  0x17   :  { %2235 = vmatprep.subr.bf16.mxu0 %v5087_v42  ;;  %2348 = vmatprep.subr.bf16.mxu1 %v5090_v43  ;;  %v5130_v10 = vld [vmem:[%s7833_s3 + $0x3e8] ss:$16 sps:$4 sm:$0xff]   ;;  %v5135_v14 = vld [vmem:[%s7833_s3 + $0x3c4] ss:$16 sps:$4 sm:$0xff]   ;;  %v5138_v15 = vld [vmem:[%s7833_s3 + $0x3cc] ss:$16 sps:$4 sm:$0xff]  }
  0x18   :  { %v5674_v16 = vld [vmem:[%s7834_s2] sm:$0xf]  ;;  %v5136_v20 = vld [vmem:[%s7833_s3 + $0x3c8] ss:$16 sps:$4 sm:$0xff]   ;;  %v7840_v21 = vsub.s32 0, %v5663_v11  ;;  %v7837_v38 = vsub.s32 3, %v5663_v11 }
  0x19   :  { %v5133_v19 = vld [vmem:[%s7833_s3 + $0x3c0] ss:$16 sps:$4 sm:$0xff]   ;;  %v5150_v37 = vld [vmem:[%s7833_s3 + $0x38c] ss:$16 sps:$4 sm:$0xff]   ;;  %v5148_v43 = vld [vmem:[%s7833_s3 + $0x388] ss:$16 sps:$4 sm:$0xff]  }
  0x1a   :  { %2236 = vmatpush1.bf16.msra.mxu0 %v5085_v41  ;;  %2349 = vmatpush1.bf16.msra.mxu1 %v5088_v44  ;;  %v5145_v42 = vld [vmem:[%s7833_s3 + $0x380] ss:$16 sps:$4 sm:$0xff]   ;;  %s5368_s0 = smov 96  }
  0x1b   :  { %2237 = vmatprep.subr.bf16.mxu0 %v5093_v45  ;;  %2350 = vmatprep.subr.bf16.mxu1 %v5096_v46 }
  0x1c   :  { %4269 = vmatmul.mubr.msk.bf16.gmra.mxu0 %vm239_vm1, %v5064_v22  ;;  %4286 = vmatmul.mubr.msk.bf16.gmra.mxu1 %vm239_vm1, %v5064_v22  ;;  %v7839_v22 = vsub.s32 2, %v5663_v11 }
  0x1d   :  { %353 = vmatprep.mubr.bf16.mxu0 %v7841_v2  ;;  %546 = vmatprep.mubr.bf16.mxu1 %v7841_v2 }
  0x1e   :  { %2238 = vmatpush1.bf16.msra.mxu0 %v5091_v47  ;;  %2351 = vmatpush1.bf16.msra.mxu1 %v5094_v48 }
  0x1f   :  { %2239 = vmatprep.subr.bf16.mxu0 %v5099_v49  ;;  %2352 = vmatprep.subr.bf16.mxu1 %v5102_v50  ;;  %v7838_v50 = vsub.s32 1, %v5663_v11 }
  0x22   :  { %2240 = vmatpush1.bf16.msra.mxu0 %v5097_v51  ;;  %2353 = vmatpush1.bf16.msra.mxu1 %v5100_v52  ;;  %v5153_v52 = vld [vmem:[%s7833_s3 + $0x364] ss:$16 sps:$4 sm:$0xff]  }
  0x23   :  { %2241 = vmatprep.subr.bf16.mxu0 %v5105_v53  ;;  %2354 = vmatprep.subr.bf16.mxu1 %v5108_v54  ;;  %v5156_v53 = vld [vmem:[%s7833_s3 + $0x36c] ss:$16 sps:$4 sm:$0xff]   ;;  %v5743_v54 = vrot.slane %v5674_v16, %v7837_v38 }
  0x24   :  { %4270 = vmatmul.mubr.msk.bf16.gmra.mxu0 %vm239_vm1, %v5065_v23  ;;  %4287 = vmatmul.mubr.msk.bf16.gmra.mxu1 %vm239_vm1, %v5065_v23  ;;  %v5139_v23 = vld [vmem:[%s7833_s3 + $0x3a0] ss:$16 sps:$4 sm:$0xff]  }
  0x25   :  { %363 = vmatprep.mubr.bf16.mxu0 %v7841_v2  ;;  %556 = vmatprep.mubr.bf16.mxu1 %v7841_v2 }
  0x26   :  { %2242 = vmatpush1.bf16.msra.mxu0 %v5103_v55  ;;  %2355 = vmatpush1.bf16.msra.mxu1 %v5106_v56 }
  0x27   :  { %2243 = vmatprep.subr.bf16.mxu0 %v5111_v57  ;;  %2356 = vmatprep.subr.bf16.mxu1 %v5114_v58 }
  0x2a   :  { %2244 = vmatpush1.bf16.msra.mxu0 %v5109_v59  ;;  %2357 = vmatpush1.bf16.msra.mxu1 %v5112_v60  ;;  %v5151_v60 = vld [vmem:[%s7833_s3 + $0x360] ss:$16 sps:$4 sm:$0xff]  }
  0x2b   :  { %2245 = vmatprep.subr.bf16.mxu0 %v5117_v61  ;;  %2358 = vmatprep.subr.bf16.mxu1 %v5120_v62  ;;  %v5154_v61 = vld [vmem:[%s7833_s3 + $0x368] ss:$16 sps:$4 sm:$0xff]  }
  0x2c   :  { %4271 = vmatmul.mubr.msk.bf16.gmra.mxu0 %vm239_vm1, %v5066_v24  ;;  %4288 = vmatmul.mubr.msk.bf16.gmra.mxu1 %vm239_vm1, %v5066_v24  ;;  %v5141_v24 = vld [vmem:[%s7833_s3 + $0x3a4] ss:$16 sps:$4 sm:$0xff]  }
  0x2d   :  { %373 = vmatprep.mubr.bf16.mxu0 %v7841_v2  ;;  %566 = vmatprep.mubr.bf16.mxu1 %v7841_v2 }
  0x2e   :  { %2246 = vmatpush1.bf16.msra.mxu0 %v5115_v63  ;;  %2359 = vmatpush1.bf16.msra.mxu1 %v5118_v0 }
  0x2f   :  { %2247 = vmatprep.subr.bf16.mxu0 %v5123_v1  ;;  %2360 = vmatprep.subr.bf16.mxu1 %v5126_v3 }
  0x32   :  { %2248 = vmatpush1.bf16.msra.mxu0 %v5121_v4  ;;  %2361 = vmatpush1.bf16.msra.mxu1 %v5124_v5 }
  0x33   :  { %2249 = vmatprep.subr.bf16.mxu0 %v5129_v7  ;;  %2362 = vmatprep.subr.bf16.mxu1 %v5132_v8  ;;  %v5761_v8 = vrot.slane %v5674_v16, %v7838_v50 }
  0x34   :  { %4272 = vmatmul.mubr.msk.bf16.gmra.mxu0 %vm239_vm1, %v5067_v25  ;;  %4289 = vmatmul.mubr.msk.bf16.gmra.mxu1 %vm239_vm1, %v5067_v25 }
  0x35   :  { %383 = vmatprep.mubr.bf16.mxu0 %v7841_v2  ;;  %576 = vmatprep.mubr.bf16.mxu1 %v7841_v2 }
  0x36   :  { %2250 = vmatpush2.bf16.msra.mxu0 %v5127_v9  ;;  %2363 = vmatpush2.bf16.msra.mxu1 %v5130_v10 }
  0x37   :  { %2251 = vmatprep.subr.bf16.mxu0 %v5135_v14  ;;  %2364 = vmatprep.subr.bf16.mxu1 %v5138_v15 }
  0x3a   :  { %2252 = vmatpush2.bf16.msra.mxu0 %v5133_v19  ;;  %2365 = vmatpush2.bf16.msra.mxu1 %v5136_v20 }
  0x3b   :  { %2253 = vmatprep.subr.bf16.mxu0 %v5141_v24  ;;  %v5157_v24 = vld [vmem:[%s7833_s3 + $0x340] ss:$16 sps:$4 sm:$0xff]  }
  0x3c   :  { %4273 = vmatmul.mubr.msk.bf16.gmra.mxu0 %vm239_vm1, %v5068_v26  ;;  %4290 = vmatmul.mubr.msk.bf16.gmra.mxu1 %vm239_vm1, %v5068_v26 }
  0x3d   :  { %393 = vmatprep.mubr.bf16.mxu0 %v7841_v2  ;;  %586 = vmatprep.mubr.bf16.mxu1 %v7841_v2 }
  0x3e   :  { %2254 = vmatpush2.bf16.msra.mxu0 %v5139_v23 }
  0x44   :  { %4274 = vmatmul.mubr.msk.bf16.gmra.mxu0 %vm239_vm1, %v5069_v27  ;;  %4291 = vmatmul.mubr.msk.bf16.gmra.mxu1 %vm239_vm1, %v5069_v27  ;;  %v5142_v27 = vld [vmem:[%s7833_s3 + $0x3a8] ss:$16 sps:$4 sm:$0xff]  }
  0x45   :  { %403 = vmatprep.mubr.bf16.mxu0 %v7841_v2  ;;  %596 = vmatprep.mubr.bf16.mxu1 %v7841_v2 }
  0x4c   :  { %4275 = vmatmul.mubr.msk.bf16.gmra.mxu0 %vm239_vm1, %v5070_v28  ;;  %4292 = vmatmul.mubr.msk.bf16.gmra.mxu1 %vm239_vm1, %v5070_v28  ;;  %v5144_v28 = vld [vmem:[%s7833_s3 + $0x3ac] ss:$16 sps:$4 sm:$0xff]  }
  0x4d   :  { %413 = vmatprep.mubr.bf16.mxu0 %v7841_v2  ;;  %606 = vmatprep.mubr.bf16.mxu1 %v7841_v2 }
  0x4e   :  { %2366 = vmatprep.subr.bf16.mxu1 %v5144_v28 }
  0x4f   :  { %2367 = vmatpush2.bf16.msra.mxu1 %v5142_v27 }
  0x50   :  { %2368 = vmatprep.subr.bf16.mxu1 %v5150_v37 }
  0x53   :  { %2369 = vmatpush2.bf16.msra.mxu1 %v5148_v43 }
  0x54   :  { %4276 = vmatmul.mubr.msk.bf16.gmra.mxu0 %vm239_vm1, %v5071_v29  ;;  %4293 = vmatmul.mubr.msk.bf16.gmra.mxu1 %vm239_vm1, %v5071_v29 }
  0x55   :  { %423 = vmatprep.mubr.bf16.mxu0 %v7841_v2  ;;  %616 = vmatprep.mubr.bf16.mxu1 %v7841_v2 }
  0x56   :  { %2370 = vmatprep.subr.bf16.mxu1 %v5156_v53 }
  0x57   :  { %2371 = vmatpush2.bf16.msra.mxu1 %v5154_v61 }
  0x5c   :  { %4277 = vmatmul.mubr.msk.bf16.gmra.mxu0 %vm239_vm1, %v5072_v30  ;;  %4294 = vmatmul.mubr.msk.bf16.gmra.mxu1 %vm239_vm1, %v5072_v30 }
  0x5d   :  { %433 = vmatprep.mubr.bf16.mxu0 %v7841_v2  ;;  %626 = vmatprep.mubr.bf16.mxu1 %v7841_v2 }
  0x64   :  { %4278 = vmatmul.mubr.msk.bf16.gmra.mxu0 %vm239_vm1, %v5073_v31  ;;  %4295 = vmatmul.mubr.msk.bf16.gmra.mxu1 %vm239_vm1, %v5073_v31  ;;  %v5705_v31 = vrot.slane %v5674_v16, %v7840_v21 }
  0x65   :  { %443 = vmatprep.mubr.bf16.mxu0 %v7841_v2  ;;  %636 = vmatprep.mubr.bf16.mxu1 %v7841_v2 }
  0x6c   :  { %4279 = vmatmul.mubr.msk.bf16.gmra.mxu0 %vm239_vm1, %v5074_v32  ;;  %4296 = vmatmul.mubr.msk.bf16.gmra.mxu1 %vm239_vm1, %v5074_v32  ;;  %v5710_v32 = vrot.slane %v5674_v16, %v7839_v22 }
  0x6d   :  { %453 = vmatprep.mubr.bf16.mxu0 %v7841_v2  ;;  %646 = vmatprep.mubr.bf16.mxu1 %v7841_v2 }
  0x74   :  { %4280 = vmatmul.mubr.msk.bf16.gmra.mxu0 %vm239_vm1, %v5075_v33  ;;  %4297 = vmatmul.mubr.msk.bf16.gmra.mxu1 %vm239_vm1, %v5075_v33 }
  0x75   :  { %463 = vmatprep.mubr.bf16.mxu0 %v7841_v2  ;;  %656 = vmatprep.mubr.bf16.mxu1 %v7841_v2 }
  0x7c   :  { %4281 = vmatmul.mubr.msk.bf16.gmra.mxu0 %vm239_vm1, %v5076_v34  ;;  %4298 = vmatmul.mubr.msk.bf16.gmra.mxu1 %vm239_vm1, %v5076_v34 }
  0x7d   :  { %473 = vmatprep.mubr.bf16.mxu0 %v7841_v2  ;;  %666 = vmatprep.mubr.bf16.mxu1 %v7841_v2 }
  0x84   :  { %4282 = vmatmul.mubr.msk.bf16.gmra.mxu0 %vm239_vm1, %v5077_v35  ;;  %4299 = vmatmul.mubr.msk.bf16.gmra.mxu1 %vm239_vm1, %v5077_v35 }
  0x85   :  { %483 = vmatprep.mubr.bf16.mxu0 %v7841_v2  ;;  %676 = vmatprep.mubr.bf16.mxu1 %v7841_v2 }
  0x8c   :  { %4283 = vmatmul.mubr.msk.bf16.gmra.mxu0 %vm239_vm1, %v5078_v36  ;;  %4300 = vmatmul.mubr.msk.bf16.gmra.mxu1 %vm239_vm1, %v5078_v36  ;;  %v5147_v36 = vld [vmem:[%s7833_s3 + $0x384] ss:$16 sps:$4 sm:$0xff]  }
  0x8d   :  { %2255 = vmatprep.subr.bf16.mxu0 %v5147_v36 }
  0x8e   :  { %2256 = vmatpush2.bf16.msra.mxu0 %v5145_v42 }
  0x8f   :  { %2257 = vmatprep.subr.bf16.mxu0 %v5153_v52 }
  0x92   :  { %2258 = vmatpush2.bf16.msra.mxu0 %v5151_v60  ;;  %v5174_v60 = vld [vmem:[%s7833_s3 + $0x30c] ss:$16 sps:$4 sm:$0xff]  }
  0xd4   :  { %v335_v12 = vpop.f32.mrf.mxu0  ;;  %v528_v13 = vpop.f32.mrf.mxu1 }
  0xd5   :  { %v336_v44 = vadd.f32 %v335_v12, %v5705_v31  ;;  %v529_v45 = vadd.f32 %v528_v13, %v5710_v32  ;;  %v5159_v12 = vld [vmem:[%s7833_s3 + $0x344] ss:$16 sps:$4 sm:$0xff]   ;;  %v5162_v13 = vld [vmem:[%s7833_s3 + $0x34c] ss:$16 sps:$4 sm:$0xff]  }
  0xd6   :  { %v5676_v17 = vpop.f32.mrf.mxu0  ;;  %v5678_v18 = vpop.f32.mrf.mxu1  ;;  %2259 = vmatprep.subr.bf16.mxu0 %v5159_v12  ;;  %2372 = vmatprep.subr.bf16.mxu1 %v5162_v13 }
  0xd7   :  { %v687_v62 = vmax.f32 %v336_v44, 0.0  ;;  %v689_v63 = vmax.f32 %v529_v45, 0.0  ;;  %v531_v27 = vadd.f32 %v5678_v18, %v5743_v54  ;;  %2260 = vmatpush2.bf16.msra.mxu0 %v5157_v24  ;;  %v5165_v18 = vld [vmem:[%s7833_s3 + $0x324] ss:$16 sps:$4 sm:$0xff]   ;;  %v5166_v44 = vld [vmem:[%s7833_s3 + $0x328] ss:$16 sps:$4 sm:$0xff]   ;;  %v338_v45 = vadd.f32 %v5676_v17, %v5761_v8 }
  0xd8   :  { %v339_v25 = vpop.f32.mrf.mxu0  ;;  %v532_v26 = vpop.f32.mrf.mxu1  ;;  %2261 = vmatprep.subr.bf16.mxu0 %v5165_v18 }
  0xd9   :  { %v340_v46 = vadd.f32 %v339_v25, %v5705_v31  ;;  %v533_v47 = vadd.f32 %v532_v26, %v5710_v32  ;;  %v5160_v25 = vld [vmem:[%s7833_s3 + $0x348] ss:$16 sps:$4 sm:$0xff]   ;;  %v688_v61 = vmax.f32 %v338_v45, 0.0 }
  0xda   :  { %v5700_v29 = vpop.f32.mrf.mxu0  ;;  %v534_v30 = vpop.f32.mrf.mxu1  ;;  %2373 = vmatpush2.bf16.msra.mxu1 %v5160_v25 }
  0xdb   :  { %v691_v0 = vmax.f32 %v340_v46, 0.0  ;;  %v693_v1 = vmax.f32 %v533_v47, 0.0  ;;  %v535_v9 = vadd.f32 %v534_v30, %v5743_v54  ;;  %v342_v36 = vadd.f32 %v5700_v29, %v5761_v8 }
  0xdc   :  { %v345_v33 = vpop.f32.mrf.mxu0  ;;  %v538_v34 = vpop.f32.mrf.mxu1  ;;  %v690_v47 = vmax.f32 %v531_v27, 0.0 }
  0xdd   :  { %v346_v35 = vadd.f32 %v345_v33, %v5705_v31  ;;  %v539_v39 = vadd.f32 %v538_v34, %v5710_v32  ;;  %v692_v52 = vmax.f32 %v342_v36, 0.0 }
  0xde   :  { %v5721_v40 = vpop.f32.mrf.mxu0  ;;  %v540_v41 = vpop.f32.mrf.mxu1 }
  0xdf   :  { %v695_v51 = vmax.f32 %v346_v35, 0.0  ;;  %v697_v55 = vmax.f32 %v539_v39, 0.0  ;;  %v541_v10 = vadd.f32 %v540_v41, %v5743_v54  ;;  %v348_v37 = vadd.f32 %v5721_v40, %v5761_v8  ;;  %v5168_v39 = vld [vmem:[%s7833_s3 + $0x32c] ss:$16 sps:$4 sm:$0xff]   ;;  %v5163_v40 = vld [vmem:[%s7833_s3 + $0x320] ss:$16 sps:$4 sm:$0xff]  }
  0xe0   :  { %v349_v48 = vpop.f32.mrf.mxu0  ;;  %v542_v49 = vpop.f32.mrf.mxu1  ;;  %v694_v41 = vmax.f32 %v535_v9, 0.0  ;;  %2374 = vmatprep.subr.bf16.mxu1 %v5168_v39  ;;  %2262 = vmatpush2.bf16.msra.mxu0 %v5163_v40 }
  0xe1   :  { %v350_v56 = vadd.f32 %v349_v48, %v5705_v31  ;;  %v543_v57 = vadd.f32 %v542_v49, %v5710_v32  ;;  %v5771_v14 = vmax.f32 %v687_v62, %v695_v51  ;;  %v5773_v15 = vmax.f32 %v689_v63, %v697_v55  ;;  %2375 = vmatpush2.bf16.msra.mxu1 %v5166_v44  ;;  %v5171_v55 = vld [vmem:[%s7833_s3 + $0x304] ss:$16 sps:$4 sm:$0xff]  }
  0xe2   :  { %v351_v58 = vpop.f32.mrf.mxu0  ;;  %v544_v59 = vpop.f32.mrf.mxu1  ;;  %v698_v42 = vmax.f32 %v541_v10, 0.0  ;;  %v696_v53 = vmax.f32 %v348_v37, 0.0  ;;  %2263 = vmatprep.subr.bf16.mxu0 %v5171_v55  ;;  %2376 = vmatprep.subr.bf16.mxu1 %v5174_v60 }
  0xe3   :  { %v699_v3 = vmax.f32 %v350_v56, 0.0  ;;  %v701_v4 = vmax.f32 %v543_v57, 0.0  ;;  %v545_v5 = vadd.f32 %v544_v59, %v5743_v54  ;;  %v352_v26 = vadd.f32 %v351_v58, %v5761_v8  ;;  %v5169_v59 = vld [vmem:[%s7833_s3 + $0x300] ss:$16 sps:$4 sm:$0xff]  }
  0xe4   :  { %v5754_v6 = vpop.f32.mrf.mxu0  ;;  %v5756_v7 = vpop.f32.mrf.mxu1  ;;  %v5823_v56 = vmax.f32 %v690_v47, %v698_v42  ;;  %2264 = vmatpush2.bf16.msra.mxu0 %v5169_v59  ;;  %v5844_v9 = vmax.f32 %v688_v61, %v696_v53 }
  0xe5   :  { %v5775_v19 = vmax.f32 %v691_v0, %v699_v3  ;;  %v5777_v16 = vmax.f32 %v693_v1, %v701_v4  ;;  %v702_v28 = vmax.f32 %v545_v5, 0.0  ;;  %v700_v46 = vmax.f32 %v352_v26, 0.0  ;;  %v5172_v1 = vld [vmem:[%s7833_s3 + $0x308] ss:$16 sps:$4 sm:$0xff]  }
  0xe6   :  { %v5779_v20 = vpop.f32.mrf.mxu0  ;;  %v5781_v23 = vpop.f32.mrf.mxu1  ;;  %v549_v63 = vadd.f32 %v5756_v7, %v5710_v32  ;;  %2377 = vmatpush2.bf16.msra.mxu1 %v5172_v1  ;;  %v356_v27 = vadd.f32 %v5754_v6, %v5705_v31 }
  0xe7   :  { %v4721_v34 = vpack.i.bf16 %v5777_v16, %v5773_v15  ;;  %v4731_v35 = vpack.i.bf16 %v5775_v19, %v5771_v14  ;;  %v5818_v48 = vmax.f32 %v694_v41, %v702_v28  ;;  %v5834_v62 = vmax.f32 %v692_v52, %v700_v46 }
  0xe8   :  { %v359_v30 = vpop.f32.mrf.mxu0  ;;  %v552_v33 = vpop.f32.mrf.mxu1  ;;  %v705_v28 = vmax.f32 %v549_v63, 0.0  ;;  %v703_v47 = vmax.f32 %v356_v27, 0.0  ;;  %v358_v1 = vadd.f32 %v5779_v20, %v5761_v8 }
  0xe9   :  { %4722 = vrot.lane.b32.xlu0 %v4721_v34, %s5368_s0  ;;  %4732 = vrot.lane.b32.xlu1 %v4731_v35, %s5368_s0  ;;  %v553_v0 = vadd.f32 %v552_v33, %v5710_v32  ;;  %v4746_v5 = vpack.i.bf16 %v5818_v48, %v5823_v56  ;;  %v360_v10 = vadd.f32 %v359_v30, %v5705_v31 }
  0xea   :  { %v5808_v29 = vpop.f32.mrf.mxu0  ;;  %v554_v43 = vpop.f32.mrf.mxu1  ;;  %v4751_v33 = vpack.i.bf16 %v5834_v62, %v5844_v9 }
  0xeb   :  { %v709_v30 = vmax.f32 %v553_v0, 0.0  ;;  %v707_v39 = vmax.f32 %v360_v10, 0.0  ;;  %v555_v41 = vadd.f32 %v554_v43, %v5743_v54 }
  0xec   :  { %v365_v49 = vpop.f32.mrf.mxu0  ;;  %v558_v51 = vpop.f32.mrf.mxu1 }
  0xed   :  { %v559_v17 = vadd.f32 %v558_v51, %v5710_v32  ;;  %4727 = vrot.lane.b32.xlu0 %v4721_v34, %s5369_s15  ;;  %4737 = vrot.lane.b32.xlu1 %v4731_v35, %s5369_s15  ;;  %v366_v7 = vadd.f32 %v365_v49, %v5705_v31  ;;  %v551_v49 = vadd.f32 %v5781_v23, %v5743_v54  ;;  %v710_v60 = vmax.f32 %v555_v41, 0.0 }
  0xee   :  { %v367_v57 = vpop.f32.mrf.mxu0  ;;  %v560_v58 = vpop.f32.mrf.mxu1 }
  0xef   :  { %v713_v12 = vmax.f32 %v559_v17, 0.0  ;;  %v711_v42 = vmax.f32 %v366_v7, 0.0  ;;  %v561_v44 = vadd.f32 %v560_v58, %v5743_v54  ;;  %v362_v58 = vadd.f32 %v5808_v29, %v5761_v8 }
  0xf0   :  { %v369_v3 = vpop.f32.mrf.mxu0  ;;  %v562_v4 = vpop.f32.mrf.mxu1  ;;  %v368_v59 = vadd.f32 %v367_v57, %v5761_v8 }
  0xf1   :  { %v370_v13 = vadd.f32 %v369_v3, %v5705_v31  ;;  %v563_v24 = vadd.f32 %v562_v4, %v5710_v32  ;;  %4747 = vrot.lane.b32.xlu0 %v4746_v5, %s5370_s22  ;;  %4742 = vrot.lane.b32.xlu1 %v4746_v5, %s5369_s15  ;;  %v5858_v40 = vmax.f32 %v705_v28, %v713_v12  ;;  %v714_v63 = vmax.f32 %v561_v44, 0.0 }
  0xf2   :  { %v371_v25 = vpop.f32.mrf.mxu0  ;;  %v564_v26 = vpop.f32.mrf.mxu1  ;;  %v5879_v61 = vmax.f32 %v703_v47, %v711_v42  ;;  %v706_v4 = vmax.f32 %v551_v49, 0.0  ;;  %v708_v7 = vmax.f32 %v362_v58, 0.0  ;;  %v712_v12 = vmax.f32 %v368_v59, 0.0 }
  0xf3   :  { %v715_v34 = vmax.f32 %v370_v13, 0.0  ;;  %v717_v35 = vmax.f32 %v563_v24, 0.0  ;;  %v565_v36 = vadd.f32 %v564_v26, %v5743_v54  ;;  %v372_v43 = vadd.f32 %v371_v25, %v5761_v8 }
  0xf4   :  { %v375_v37 = vpop.f32.mrf.mxu0  ;;  %v568_v18 = vpop.f32.mrf.mxu1  ;;  %v5889_v13 = vmax.f32 %v706_v4, %v714_v63  ;;  %v704_v26 = vmax.f32 %v358_v1, 0.0 }
  0xf5   :  { %v5861_v6 = vmax.f32 %v709_v30, %v717_v35  ;;  %4752 = vrot.lane.b32.xlu0 %v4751_v33, %s5369_s15  ;;  %4757 = vrot.lane.b32.xlu1 %v4751_v33, %s5370_s22  ;;  %v5872_v51 = vmax.f32 %v707_v39, %v715_v34  ;;  %v718_v52 = vmax.f32 %v565_v36, 0.0  ;;  %v716_v3 = vmax.f32 %v372_v43, 0.0 }
  0xf6   :  { %v5865_v45 = vpop.f32.mrf.mxu0  ;;  %v5867_v46 = vpop.f32.mrf.mxu1  ;;  %v569_v28 = vadd.f32 %v568_v18, %v5710_v32  ;;  %v5900_v36 = vmax.f32 %v704_v26, %v712_v12  ;;  %v376_v43 = vadd.f32 %v375_v37, %v5705_v31 }
  0xf7   :  { %v4761_v17 = vpack.i.bf16 %v5861_v6, %v5858_v40  ;;  %v5885_v5 = vmax.f32 %v710_v60, %v718_v52  ;;  %v4771_v57 = vpack.i.bf16 %v5872_v51, %v5879_v61  ;;  %v5894_v27 = vmax.f32 %v708_v7, %v716_v3 }
  0xf8   :  { %v379_v53 = vpop.f32.mrf.mxu0  ;;  %v572_v55 = vpop.f32.mrf.mxu1  ;;  %v721_v52 = vmax.f32 %v569_v28, 0.0  ;;  %v719_v12 = vmax.f32 %v376_v43, 0.0 }
  0xf9   :  { %4762 = vrot.lane.b32.xlu0 %v4761_v17, %s5368_s0  ;;  %4767 = vrot.lane.b32.xlu1 %v4761_v17, %s5369_s15  ;;  %v573_v30 = vadd.f32 %v572_v55, %v5710_v32  ;;  %v4786_v35 = vpack.i.bf16 %v5885_v5, %v5889_v13  ;;  %v380_v39 = vadd.f32 %v379_v53, %v5705_v31 }
  0xfa   :  { %v381_v23 = vpop.f32.mrf.mxu0  ;;  %v574_v0 = vpop.f32.mrf.mxu1  ;;  %v4791_v53 = vpack.i.bf16 %v5894_v27, %v5900_v36 }
  0xfb   :  { %v725_v55 = vmax.f32 %v573_v30, 0.0  ;;  %v723_v1 = vmax.f32 %v380_v39, 0.0  ;;  %v575_v3 = vadd.f32 %v574_v0, %v5743_v54 }
  0xfc   :  { %v385_v29 = vpop.f32.mrf.mxu0  ;;  %v578_v10 = vpop.f32.mrf.mxu1 }
  0xfd   :  { %v579_v24 = vadd.f32 %v578_v10, %v5710_v32  ;;  %4772 = vrot.lane.b32.xlu0 %v4771_v57, %s5368_s0  ;;  %4777 = vrot.lane.b32.xlu1 %v4771_v57, %s5369_s15  ;;  %v386_v41 = vadd.f32 %v385_v29, %v5705_v31  ;;  %v726_v39 = vmax.f32 %v575_v3, 0.0 }
  0xfe   :  { %v387_v20 = vpop.f32.mrf.mxu0  ;;  %v580_v25 = vpop.f32.mrf.mxu1 }
  0xff   :  { %v729_v42 = vmax.f32 %v579_v24, 0.0  ;;  %v727_v4 = vmax.f32 %v386_v41, 0.0  ;;  %v581_v10 = vadd.f32 %v580_v25, %v5743_v54  ;;  %v571_v24 = vadd.f32 %v5867_v46, %v5743_v54 }
 0x100   :  { %v389_v33 = vpop.f32.mrf.mxu0  ;;  %v582_v34 = vpop.f32.mrf.mxu1 }
 0x101   :  { %v390_v44 = vadd.f32 %v389_v33, %v5705_v31  ;;  %v583_v47 = vadd.f32 %v582_v34, %v5710_v32  ;;  %4787 = vrot.lane.b32.xlu0 %v4786_v35, %s5370_s22  ;;  %4782 = vrot.lane.b32.xlu1 %v4786_v35, %s5369_s15  ;;  %v5913_v29 = vmax.f32 %v721_v52, %v729_v42  ;;  %v730_v42 = vmax.f32 %v581_v10, 0.0 }
 0x102   :  { %v391_v18 = vpop.f32.mrf.mxu0  ;;  %v584_v49 = vpop.f32.mrf.mxu1  ;;  %v382_v34 = vadd.f32 %v381_v23, %v5761_v8  ;;  %v388_v35 = vadd.f32 %v387_v20, %v5761_v8  ;;  %v5933_v41 = vmax.f32 %v719_v12, %v727_v4 }
 0x103   :  { %v731_v17 = vmax.f32 %v390_v44, 0.0  ;;  %v733_v58 = vmax.f32 %v583_v47, 0.0  ;;  %v585_v59 = vadd.f32 %v584_v49, %v5743_v54  ;;  %v392_v0 = vadd.f32 %v391_v18, %v5761_v8 }
 0x104   :  { %v395_v60 = vpop.f32.mrf.mxu0  ;;  %v588_v63 = vpop.f32.mrf.mxu1  ;;  %v378_v47 = vadd.f32 %v5865_v45, %v5761_v8  ;;  %v722_v49 = vmax.f32 %v571_v24, 0.0 }
 0x105   :  { %v5916_v37 = vmax.f32 %v725_v55, %v733_v58  ;;  %4792 = vrot.lane.b32.xlu0 %v4791_v53, %s5369_s15  ;;  %4797 = vrot.lane.b32.xlu1 %v4791_v53, %s5370_s22  ;;  %v5927_v26 = vmax.f32 %v723_v1, %v731_v17  ;;  %v734_v28 = vmax.f32 %v585_v59, 0.0  ;;  %v732_v18 = vmax.f32 %v392_v0, 0.0 }
 0x106   :  { %v5920_v57 = vpop.f32.mrf.mxu0  ;;  %v5922_v7 = vpop.f32.mrf.mxu1  ;;  %v724_v55 = vmax.f32 %v382_v34, 0.0  ;;  %v728_v53 = vmax.f32 %v388_v35, 0.0  ;;  %v5943_v17 = vmax.f32 %v722_v49, %v730_v42  ;;  %v720_v1 = vmax.f32 %v378_v47, 0.0 }
 0x107   :  { %v4801_v33 = vpack.i.bf16 %v5916_v37, %v5913_v29  ;;  %v5939_v43 = vmax.f32 %v726_v39, %v734_v28  ;;  %v4811_v20 = vpack.i.bf16 %v5927_v26, %v5933_v41  ;;  %v589_v4 = vadd.f32 %v588_v63, %v5710_v32 }
 0x108   :  { %v399_v25 = vpop.f32.mrf.mxu0  ;;  %v592_v30 = vpop.f32.mrf.mxu1  ;;  %v5948_v3 = vmax.f32 %v724_v55, %v732_v18  ;;  %v5954_v28 = vmax.f32 %v720_v1, %v728_v53  ;;  %v396_v47 = vadd.f32 %v395_v60, %v5705_v31 }
 0x109   :  { %4802 = vrot.lane.b32.xlu0 %v4801_v33, %s5368_s0  ;;  %4807 = vrot.lane.b32.xlu1 %v4801_v33, %s5369_s15  ;;  %v593_v10 = vadd.f32 %v592_v30, %v5710_v32  ;;  %v4826_v0 = vpack.i.bf16 %v5939_v43, %v5943_v17  ;;  %v400_v33 = vadd.f32 %v399_v25, %v5705_v31  ;;  %v737_v18 = vmax.f32 %v589_v4, 0.0 }
 0x10a   :  { %v401_v46 = vpop.f32.mrf.mxu0  ;;  %v594_v44 = vpop.f32.mrf.mxu1  ;;  %v4831_v25 = vpack.i.bf16 %v5948_v3, %v5954_v28 }
 0x10b   :  { %v741_v49 = vmax.f32 %v593_v10, 0.0  ;;  %v595_v1 = vadd.f32 %v594_v44, %v5743_v54 }
 0x10c   :  { %v405_v23 = vpop.f32.mrf.mxu0  ;;  %v598_v52 = vpop.f32.mrf.mxu1 }
 0x10d   :  { %v599_v58 = vadd.f32 %v598_v52, %v5710_v32  ;;  %4812 = vrot.lane.b32.xlu0 %v4811_v20, %s5368_s0  ;;  %4817 = vrot.lane.b32.xlu1 %v4811_v20, %s5369_s15  ;;  %v406_v34 = vadd.f32 %v405_v23, %v5705_v31 }
 0x10e   :  { %v407_v45 = vpop.f32.mrf.mxu0  ;;  %v600_v59 = vpop.f32.mrf.mxu1 }
 0x10f   :  { %v745_v35 = vmax.f32 %v599_v58, 0.0  ;;  %v739_v58 = vmax.f32 %v400_v33, 0.0  ;;  %v591_v33 = vadd.f32 %v5922_v7, %v5743_v54 }
 0x110   :  { %v409_v12 = vpop.f32.mrf.mxu0  ;;  %v602_v24 = vpop.f32.mrf.mxu1 }
 0x111   :  { %v410_v39 = vadd.f32 %v409_v12, %v5705_v31  ;;  %v603_v42 = vadd.f32 %v602_v24, %v5710_v32  ;;  %4827 = vrot.lane.b32.xlu0 %v4826_v0, %s5370_s22  ;;  %4822 = vrot.lane.b32.xlu1 %v4826_v0, %s5369_s15  ;;  %v743_v12 = vmax.f32 %v406_v34, 0.0  ;;  %v5967_v24 = vmax.f32 %v737_v18, %v745_v35 }
 0x112   :  { %v411_v63 = vpop.f32.mrf.mxu0  ;;  %v604_v30 = vpop.f32.mrf.mxu1  ;;  %v601_v0 = vadd.f32 %v600_v59, %v5743_v54  ;;  %v402_v18 = vadd.f32 %v401_v46, %v5761_v8 }
 0x113   :  { %v747_v52 = vmax.f32 %v410_v39, 0.0  ;;  %v749_v23 = vmax.f32 %v603_v42, 0.0  ;;  %v605_v20 = vadd.f32 %v604_v30, %v5743_v54  ;;  %v735_v39 = vmax.f32 %v396_v47, 0.0 }
 0x114   :  { %v415_v55 = vpop.f32.mrf.mxu0  ;;  %v608_v53 = vpop.f32.mrf.mxu1  ;;  %v412_v44 = vadd.f32 %v411_v63, %v5761_v8  ;;  %v746_v47 = vmax.f32 %v601_v0, 0.0 }
 0x115   :  { %v5970_v60 = vmax.f32 %v741_v49, %v749_v23  ;;  %4832 = vrot.lane.b32.xlu0 %v4831_v25, %s5369_s15  ;;  %4837 = vrot.lane.b32.xlu1 %v4831_v25, %s5370_s22  ;;  %v5981_v34 = vmax.f32 %v739_v58, %v747_v52  ;;  %v750_v35 = vmax.f32 %v605_v20, 0.0  ;;  %v408_v49 = vadd.f32 %v407_v45, %v5761_v8 }
 0x116   :  { %v5974_v4 = vpop.f32.mrf.mxu0  ;;  %v5976_v10 = vpop.f32.mrf.mxu1  ;;  %v742_v25 = vmax.f32 %v595_v1, 0.0  ;;  %v5987_v23 = vmax.f32 %v735_v39, %v743_v12  ;;  %v398_v52 = vadd.f32 %v5920_v57, %v5761_v8  ;;  %v748_v20 = vmax.f32 %v412_v44, 0.0 }
 0x117   :  { %v4841_v30 = vpack.i.bf16 %v5970_v60, %v5967_v24  ;;  %v738_v58 = vmax.f32 %v591_v33, 0.0  ;;  %v740_v1 = vmax.f32 %v402_v18, 0.0  ;;  %v744_v12 = vmax.f32 %v408_v49, 0.0 }
 0x118   :  { %v419_v59 = vpop.f32.mrf.mxu0  ;;  %v612_v42 = vpop.f32.mrf.mxu1  ;;  %7870 = vst [vmem:[#allocation4_spill] sm:$0xff] %v5987_v23  ;;  %v5993_v38 = vmax.f32 %v742_v25, %v750_v35  ;;  %v4851_v45 = vpack.i.bf16 %v5981_v34, %v5987_v23  ;;  %v736_v33 = vmax.f32 %v398_v52, 0.0 }
 0x119   :  { %4842 = vrot.lane.b32.xlu0 %v4841_v30, %s5368_s0  ;;  %4847 = vrot.lane.b32.xlu1 %v4841_v30, %s5369_s15  ;;  %v5997_v0 = vmax.f32 %v738_v58, %v746_v47  ;;  %v6002_v35 = vmax.f32 %v740_v1, %v748_v20  ;;  %v609_v30 = vadd.f32 %v608_v53, %v5710_v32 }
 0x11a   :  { %v421_v7 = vpop.f32.mrf.mxu0  ;;  %v614_v63 = vpop.f32.mrf.mxu1  ;;  %7871 = vst [vmem:[#allocation5_spill] sm:$0xff] %v5993_v38  ;;  %v613_v25 = vadd.f32 %v612_v42, %v5710_v32  ;;  %v6008_v47 = vmax.f32 %v736_v33, %v744_v12  ;;  %v416_v1 = vadd.f32 %v415_v55, %v5705_v31 }
 0x11b   :  { %7872 = vst [vmem:[#allocation6_spill] sm:$0xff] %v6002_v35  ;;  %v4866_v49 = vpack.i.bf16 %v5993_v38, %v5997_v0  ;;  %v753_v21 = vmax.f32 %v609_v30, 0.0  ;;  %v615_v11 = vadd.f32 %v614_v63, %v5743_v54 }
 0x11c   :  { %v425_v46 = vpop.f32.mrf.mxu0  ;;  %v618_v50 = vpop.f32.mrf.mxu1  ;;  %7873 = vst [vmem:[#allocation7_spill] sm:$0xff] %v6008_v47  ;;  %v757_v12 = vmax.f32 %v613_v25, 0.0 }
 0x11d   :  { %v619_v39 = vadd.f32 %v618_v50, %v5710_v32  ;;  %4852 = vrot.lane.b32.xlu0 %v4851_v45, %s5368_s0  ;;  %4857 = vrot.lane.b32.xlu1 %v4851_v45, %s5369_s15  ;;  %v420_v50 = vadd.f32 %v419_v59, %v5705_v31  ;;  %v426_v58 = vadd.f32 %v425_v46, %v5705_v31 }
 0x11e   :  { %v427_v57 = vpop.f32.mrf.mxu0  ;;  %v620_v44 = vpop.f32.mrf.mxu1  ;;  %v4871_v59 = vpack.i.bf16 %v6002_v35, %v6008_v47 }
 0x11f   :  { %v761_v45 = vmax.f32 %v619_v39, 0.0  ;;  %v755_v2 = vmax.f32 %v420_v50, 0.0  ;;  %v621_v55 = vadd.f32 %v620_v44, %v5743_v54  ;;  %v611_v50 = vadd.f32 %v5976_v10, %v5743_v54 }
 0x120   :  { %v429_v22 = vpop.f32.mrf.mxu0  ;;  %v622_v18 = vpop.f32.mrf.mxu1 }
 0x121   :  { %v430_v52 = vadd.f32 %v429_v22, %v5705_v31  ;;  %v623_v20 = vadd.f32 %v622_v18, %v5710_v32  ;;  %4867 = vrot.lane.b32.xlu0 %v4866_v49, %s5370_s22  ;;  %4862 = vrot.lane.b32.xlu1 %v4866_v49, %s5369_s15  ;;  %v759_v49 = vmax.f32 %v426_v58, 0.0  ;;  %v6023_v23 = vmax.f32 %v753_v21, %v761_v45 }
 0x122   :  { %v431_v53 = vpop.f32.mrf.mxu0  ;;  %v624_v42 = vpop.f32.mrf.mxu1 }
 0x123   :  { %v763_v33 = vmax.f32 %v430_v52, 0.0  ;;  %v765_v46 = vmax.f32 %v623_v20, 0.0  ;;  %v625_v39 = vadd.f32 %v624_v42, %v5743_v54  ;;  %7874 = vst [vmem:[#allocation8_spill] sm:$0xff] %v6023_v23  ;;  %v751_v20 = vmax.f32 %v416_v1, 0.0 }
 0x124   :  { %v6020_v22 = vpop.f32.mrf.mxu0  ;;  %v628_v18 = vpop.f32.mrf.mxu1  ;;  %v432_v63 = vadd.f32 %v431_v53, %v5761_v8  ;;  %v762_v1 = vmax.f32 %v621_v55, 0.0  ;;  %v5177_v53 = vld [vmem:[%s7833_s3 + $0xe4] ss:$16 sps:$4 sm:$0xff]  }
 0x125   :  { %v6026_v30 = vmax.f32 %v757_v12, %v765_v46  ;;  %4872 = vrot.lane.b32.xlu0 %v4871_v59, %s5369_s15  ;;  %4877 = vrot.lane.b32.xlu1 %v4871_v59, %s5370_s22  ;;  %v6037_v21 = vmax.f32 %v755_v2, %v763_v33  ;;  %v766_v58 = vmax.f32 %v625_v39, 0.0  ;;  %v422_v12 = vadd.f32 %v421_v7, %v5761_v8  ;;  %v5180_v7 = vld [vmem:[%s7833_s3 + $0xec] ss:$16 sps:$4 sm:$0xff]  }
 0x126   :  { %v6030_v25 = vpop.f32.mrf.mxu0  ;;  %v6032_v52 = vpop.f32.mrf.mxu1  ;;  %v428_v59 = vadd.f32 %v427_v57, %v5761_v8  ;;  %v758_v46 = vmax.f32 %v615_v11, 0.0  ;;  %v6043_v35 = vmax.f32 %v751_v20, %v759_v49  ;;  %v418_v11 = vadd.f32 %v5974_v4, %v5761_v8  ;;  %2859 = vmatprep.subr.bf16.mxu0 %v5177_v53  ;;  %2972 = vmatprep.subr.bf16.mxu1 %v5180_v7 }
 0x127   :  { %7875 = vst [vmem:[#allocation9_spill] sm:$0xff] %v6026_v30  ;;  %7876 = vst [vmem:[#allocation10_spill] sm:$0xff] %v6037_v21  ;;  %v4881_v42 = vpack.i.bf16 %v6026_v30, %v6023_v23  ;;  %v764_v57 = vmax.f32 %v432_v63, 0.0  ;;  %v754_v33 = vmax.f32 %v611_v50, 0.0 }
 0x128   :  { %v439_v44 = vpop.f32.mrf.mxu0  ;;  %v632_v45 = vpop.f32.mrf.mxu1  ;;  %7877 = vst [vmem:[#allocation11_spill] sm:$0xff] %v6043_v35  ;;  %v6057_v39 = vmax.f32 %v758_v46, %v766_v58  ;;  %v4891_v20 = vpack.i.bf16 %v6037_v21, %v6043_v35  ;;  %v760_v23 = vmax.f32 %v428_v59, 0.0  ;;  %v752_v63 = vmax.f32 %v418_v11, 0.0 }
 0x129   :  { %4882 = vrot.lane.b32.xlu0 %v4881_v42, %s5368_s0  ;;  %4887 = vrot.lane.b32.xlu1 %v4881_v42, %s5369_s15  ;;  %v756_v42 = vmax.f32 %v422_v12, 0.0  ;;  %v6061_v30 = vmax.f32 %v754_v33, %v762_v1  ;;  %v629_v46 = vadd.f32 %v628_v18, %v5710_v32  ;;  %v633_v53 = vadd.f32 %v632_v45, %v5710_v32 }
 0x12a   :  { %v6047_v2 = vpop.f32.mrf.mxu0  ;;  %v634_v10 = vpop.f32.mrf.mxu1  ;;  %7878 = vst [vmem:[#allocation12_spill] sm:$0xff] %v6057_v39  ;;  %v6072_v1 = vmax.f32 %v752_v63, %v760_v23  ;;  %v440_v33 = vadd.f32 %v439_v44, %v5705_v31 }
 0x12b   :  { %7879 = vst [vmem:[#allocation13_spill] sm:$0xff] %v6061_v30  ;;  %v6066_v58 = vmax.f32 %v756_v42, %v764_v57  ;;  %v4906_v59 = vpack.i.bf16 %v6057_v39, %v6061_v30  ;;  %v436_v42 = vadd.f32 %v6020_v22, %v5705_v31  ;;  %v769_v23 = vmax.f32 %v629_v46, 0.0 }
 0x12c   :  { %v445_v49 = vpop.f32.mrf.mxu0  ;;  %v638_v55 = vpop.f32.mrf.mxu1  ;;  %7881 = vst [vmem:[#allocation15_spill] sm:$0xff] %v6072_v1  ;;  %v773_v63 = vmax.f32 %v633_v53, 0.0  ;;  %v771_v39 = vmax.f32 %v440_v33, 0.0  ;;  %v635_v30 = vadd.f32 %v634_v10, %v5743_v54  ;;  %v631_v33 = vadd.f32 %v6032_v52, %v5743_v54 }
 0x12d   :  { %v639_v47 = vadd.f32 %v638_v55, %v5710_v32  ;;  %4892 = vrot.lane.b32.xlu0 %v4891_v20, %s5368_s0  ;;  %4897 = vrot.lane.b32.xlu1 %v4891_v20, %s5369_s15  ;;  %7880 = vst [vmem:[#allocation14_spill] sm:$0xff] %v6066_v58  ;;  %v446_v55 = vadd.f32 %v445_v49, %v5705_v31 }
 0x12e   :  { %v447_v4 = vpop.f32.mrf.mxu0  ;;  %v640_v50 = vpop.f32.mrf.mxu1  ;;  %v4911_v44 = vpack.i.bf16 %v6066_v58, %v6072_v1 }
 0x12f   :  { %v777_v20 = vmax.f32 %v639_v47, 0.0  ;;  %v641_v38 = vadd.f32 %v640_v50, %v5743_v54 }
 0x130   :  { %v449_v7 = vpop.f32.mrf.mxu0  ;;  %v642_v12 = vpop.f32.mrf.mxu1 }
 0x131   :  { %v450_v11 = vadd.f32 %v449_v7, %v5705_v31  ;;  %v643_v57 = vadd.f32 %v642_v12, %v5710_v32  ;;  %4907 = vrot.lane.b32.xlu0 %v4906_v59, %s5370_s22  ;;  %4902 = vrot.lane.b32.xlu1 %v4906_v59, %s5369_s15  ;;  %v775_v59 = vmax.f32 %v446_v55, 0.0  ;;  %v6086_v21 = vmax.f32 %v769_v23, %v777_v20 }
 0x132   :  { %v451_v18 = vpop.f32.mrf.mxu0  ;;  %v644_v45 = vpop.f32.mrf.mxu1  ;;  %v442_v23 = vadd.f32 %v6047_v2, %v5761_v8 }
 0x133   :  { %v779_v49 = vmax.f32 %v450_v11, 0.0  ;;  %v781_v47 = vmax.f32 %v643_v57, 0.0  ;;  %v645_v7 = vadd.f32 %v644_v45, %v5743_v54  ;;  %7882 = vst [vmem:[#allocation16_spill] sm:$0xff] %v6086_v21  ;;  %v767_v11 = vmax.f32 %v436_v42, 0.0 }
 0x134   :  { %v455_v35 = vpop.f32.mrf.mxu0  ;;  %v648_v12 = vpop.f32.mrf.mxu1  ;;  %v452_v10 = vadd.f32 %v451_v18, %v5761_v8  ;;  %v438_v18 = vadd.f32 %v6030_v25, %v5761_v8 }
 0x135   :  { %v6089_v22 = vmax.f32 %v773_v63, %v781_v47  ;;  %4912 = vrot.lane.b32.xlu0 %v4911_v44, %s5369_s15  ;;  %4917 = vrot.lane.b32.xlu1 %v4911_v44, %s5370_s22  ;;  %v6100_v55 = vmax.f32 %v771_v39, %v779_v49  ;;  %v782_v20 = vmax.f32 %v645_v7, 0.0  ;;  %v448_v63 = vadd.f32 %v447_v4, %v5761_v8 }
 0x136   :  { %v6093_v46 = vpop.f32.mrf.mxu0  ;;  %v6095_v53 = vpop.f32.mrf.mxu1  ;;  %v774_v44 = vmax.f32 %v635_v30, 0.0  ;;  %v6107_v42 = vmax.f32 %v767_v11, %v775_v59  ;;  %v778_v47 = vmax.f32 %v641_v38, 0.0  ;;  %v780_v49 = vmax.f32 %v452_v10, 0.0 }
 0x137   :  { %7883 = vst [vmem:[#allocation17_spill] sm:$0xff] %v6089_v22  ;;  %7884 = vst [vmem:[#allocation18_spill] sm:$0xff] %v6100_v55  ;;  %v4921_v45 = vpack.i.bf16 %v6089_v22, %v6086_v21  ;;  %v770_v7 = vmax.f32 %v631_v33, 0.0  ;;  %v772_v4 = vmax.f32 %v442_v23, 0.0  ;;  %v776_v38 = vmax.f32 %v448_v63, 0.0 }
 0x138   :  { %v459_v50 = vpop.f32.mrf.mxu0  ;;  %v652_v57 = vpop.f32.mrf.mxu1  ;;  %7885 = vst [vmem:[#allocation19_spill] sm:$0xff] %v6107_v42  ;;  %v6113_v21 = vmax.f32 %v774_v44, %v782_v20  ;;  %v4931_v30 = vpack.i.bf16 %v6100_v55, %v6107_v42  ;;  %v768_v33 = vmax.f32 %v438_v18, 0.0 }
 0x139   :  { %4922 = vrot.lane.b32.xlu0 %v4921_v45, %s5368_s0  ;;  %4927 = vrot.lane.b32.xlu1 %v4921_v45, %s5369_s15  ;;  %v6117_v59 = vmax.f32 %v770_v7, %v778_v47  ;;  %v6122_v20 = vmax.f32 %v772_v4, %v780_v49  ;;  %v649_v45 = vadd.f32 %v648_v12, %v5710_v32 }
 0x13a   :  { %v461_v52 = vpop.f32.mrf.mxu0  ;;  %v654_v39 = vpop.f32.mrf.mxu1  ;;  %7886 = vst [vmem:[#allocation20_spill] sm:$0xff] %v6113_v21  ;;  %v653_v44 = vadd.f32 %v652_v57, %v5710_v32  ;;  %v6128_v47 = vmax.f32 %v768_v33, %v776_v38  ;;  %v456_v4 = vadd.f32 %v455_v35, %v5705_v31 }
 0x13b   :  { %7887 = vst [vmem:[#allocation21_spill] sm:$0xff] %v6117_v59  ;;  %v4946_v63 = vpack.i.bf16 %v6113_v21, %v6117_v59  ;;  %v785_v21 = vmax.f32 %v649_v45, 0.0  ;;  %v655_v55 = vadd.f32 %v654_v39, %v5743_v54 }
 0x13c   :  { %v465_v2 = vpop.f32.mrf.mxu0  ;;  %v658_v22 = vpop.f32.mrf.mxu1  ;;  %v789_v38 = vmax.f32 %v653_v44, 0.0 }
 0x13d   :  { %v659_v11 = vadd.f32 %v658_v22, %v5710_v32  ;;  %4932 = vrot.lane.b32.xlu0 %v4931_v30, %s5368_s0  ;;  %4937 = vrot.lane.b32.xlu1 %v4931_v30, %s5369_s15  ;;  %v460_v22 = vadd.f32 %v459_v50, %v5705_v31  ;;  %v466_v7 = vadd.f32 %v465_v2, %v5705_v31 }
 0x13e   :  { %v467_v25 = vpop.f32.mrf.mxu0  ;;  %v660_v10 = vpop.f32.mrf.mxu1  ;;  %v4951_v50 = vpack.i.bf16 %v6122_v20, %v6128_v47 }
 0x13f   :  { %v793_v30 = vmax.f32 %v659_v11, 0.0  ;;  %v791_v58 = vmax.f32 %v466_v7, 0.0  ;;  %v661_v1 = vadd.f32 %v660_v10, %v5743_v54 }
 0x140   :  { %v469_v42 = vpop.f32.mrf.mxu0  ;;  %v662_v23 = vpop.f32.mrf.mxu1 }
 0x141   :  { %v470_v18 = vadd.f32 %v469_v42, %v5705_v31  ;;  %v663_v49 = vadd.f32 %v662_v23, %v5710_v32  ;;  %4947 = vrot.lane.b32.xlu0 %v4946_v63, %s5370_s22  ;;  %4942 = vrot.lane.b32.xlu1 %v4946_v63, %s5369_s15  ;;  %v787_v23 = vmax.f32 %v460_v22, 0.0  ;;  %v6141_v63 = vmax.f32 %v785_v21, %v793_v30 }
 0x142   :  { %v471_v12 = vpop.f32.mrf.mxu0  ;;  %v664_v57 = vpop.f32.mrf.mxu1  ;;  %v651_v22 = vadd.f32 %v6095_v53, %v5743_v54 }
 0x143   :  { %v795_v33 = vmax.f32 %v470_v18, 0.0  ;;  %v797_v2 = vmax.f32 %v663_v49, 0.0  ;;  %v665_v11 = vadd.f32 %v664_v57, %v5743_v54  ;;  %7888 = vst [vmem:[#allocation22_spill] sm:$0xff] %v6141_v63  ;;  %v783_v18 = vmax.f32 %v456_v4, 0.0 }
 0x144   :  { %v475_v42 = vpop.f32.mrf.mxu0  ;;  %v668_v59 = vpop.f32.mrf.mxu1  ;;  %v472_v39 = vadd.f32 %v471_v12, %v5761_v8  ;;  %v468_v57 = vadd.f32 %v467_v25, %v5761_v8  ;;  %v794_v4 = vmax.f32 %v661_v1, 0.0 }
 0x145   :  { %v6144_v35 = vmax.f32 %v789_v38, %v797_v2  ;;  %4952 = vrot.lane.b32.xlu0 %v4951_v50, %s5369_s15  ;;  %4957 = vrot.lane.b32.xlu1 %v4951_v50, %s5370_s22  ;;  %v6155_v21 = vmax.f32 %v787_v23, %v795_v33  ;;  %v798_v7 = vmax.f32 %v665_v11, 0.0  ;;  %v462_v38 = vadd.f32 %v461_v52, %v5761_v8 }
 0x146   :  { %v6148_v45 = vpop.f32.mrf.mxu0  ;;  %v6150_v44 = vpop.f32.mrf.mxu1  ;;  %v790_v50 = vmax.f32 %v655_v55, 0.0  ;;  %v6161_v2 = vmax.f32 %v783_v18, %v791_v58  ;;  %v458_v33 = vadd.f32 %v6093_v46, %v5761_v8  ;;  %v786_v11 = vmax.f32 %v651_v22, 0.0 }
 0x147   :  { %7889 = vst [vmem:[#allocation23_spill] sm:$0xff] %v6144_v35  ;;  %7890 = vst [vmem:[#allocation24_spill] sm:$0xff] %v6155_v21  ;;  %v4961_v49 = vpack.i.bf16 %v6144_v35, %v6141_v63  ;;  %v796_v23 = vmax.f32 %v472_v39, 0.0  ;;  %v792_v55 = vmax.f32 %v468_v57, 0.0  ;;  %v788_v1 = vmax.f32 %v462_v38, 0.0 }
 0x148   :  { %v479_v10 = vpop.f32.mrf.mxu0  ;;  %v672_v30 = vpop.f32.mrf.mxu1  ;;  %7891 = vst [vmem:[#allocation25_spill] sm:$0xff] %v6161_v2  ;;  %v6167_v63 = vmax.f32 %v790_v50, %v798_v7  ;;  %v4971_v58 = vpack.i.bf16 %v6155_v21, %v6161_v2  ;;  %v6171_v52 = vmax.f32 %v786_v11, %v794_v4  ;;  %v784_v39 = vmax.f32 %v458_v33, 0.0 }
 0x149   :  { %4962 = vrot.lane.b32.xlu0 %v4961_v49, %s5368_s0  ;;  %4967 = vrot.lane.b32.xlu1 %v4961_v49, %s5369_s15  ;;  %v669_v7 = vadd.f32 %v668_v59, %v5710_v32  ;;  %v673_v49 = vadd.f32 %v672_v30, %v5710_v32  ;;  %v6178_v50 = vmax.f32 %v788_v1, %v796_v23 }
 0x14a   :  { %v481_v53 = vpop.f32.mrf.mxu0  ;;  %v674_v12 = vpop.f32.mrf.mxu1  ;;  %7892 = vst [vmem:[#allocation26_spill] sm:$0xff] %v6167_v63  ;;  %7893 = vst [vmem:[#allocation27_spill] sm:$0xff] %v6171_v52  ;;  %v4986_v38 = vpack.i.bf16 %v6167_v63, %v6171_v52  ;;  %v6182_v4 = vmax.f32 %v784_v39, %v792_v55  ;;  %v476_v23 = vadd.f32 %v475_v42, %v5705_v31 }
 0x14b   :  { %v801_v1 = vmax.f32 %v669_v7, 0.0  ;;  %v805_v63 = vmax.f32 %v673_v49, 0.0 }
 0x14c   :  { %v485_v25 = vpop.f32.mrf.mxu0  ;;  %v678_v35 = vpop.f32.mrf.mxu1  ;;  %v799_v49 = vmax.f32 %v476_v23, 0.0 }
 0x14d   :  { %v679_v18 = vadd.f32 %v678_v35, %v5710_v32  ;;  %4972 = vrot.lane.b32.xlu0 %v4971_v58, %s5368_s0  ;;  %4977 = vrot.lane.b32.xlu1 %v4971_v58, %s5369_s15  ;;  %v480_v35 = vadd.f32 %v479_v10, %v5705_v31  ;;  %v486_v11 = vadd.f32 %v485_v25, %v5705_v31 }
 0x14e   :  { %v487_v46 = vpop.f32.mrf.mxu0  ;;  %v680_v22 = vpop.f32.mrf.mxu1  ;;  %v4991_v25 = vpack.i.bf16 %v6178_v50, %v6182_v4 }
 0x14f   :  { %v809_v58 = vmax.f32 %v679_v18, 0.0  ;;  %v803_v18 = vmax.f32 %v480_v35, 0.0  ;;  %v482_v35 = vadd.f32 %v481_v53, %v5761_v8 }
 0x150   :  { %v489_v2 = vpop.f32.mrf.mxu0  ;;  %v682_v57 = vpop.f32.mrf.mxu1 }
 0x151   :  { %v490_v33 = vadd.f32 %v489_v2, %v5705_v31  ;;  %v683_v59 = vadd.f32 %v682_v57, %v5710_v32  ;;  %4987 = vrot.lane.b32.xlu0 %v4986_v38, %s5370_s22  ;;  %4982 = vrot.lane.b32.xlu1 %v4986_v38, %s5369_s15  ;;  %v675_v2 = vadd.f32 %v674_v12, %v5743_v54  ;;  %v807_v57 = vmax.f32 %v486_v11, 0.0 }
 0x152   :  { %v684_v30 = vpop.f32.mrf.mxu1  ;;  %v491_v52 = vpop.f32.mrf.mxu0  ;;  %v681_v32 = vadd.f32 %v680_v22, %v5743_v54  ;;  %v6196_v38 = vmax.f32 %v801_v1, %v809_v58  ;;  %v671_v31 = vadd.f32 %v6150_v44, %v5743_v54  ;;  %v488_v11 = vadd.f32 %v487_v46, %v5761_v8 }
 0x153   :  { %v685_v55 = vadd.f32 %v684_v30, %v5743_v54  ;;  %v811_v39 = vmax.f32 %v490_v33, 0.0  ;;  %v813_v10 = vmax.f32 %v683_v59, 0.0  ;;  %v492_v42 = vadd.f32 %v491_v52, %v5761_v8 }
 0x154   :  { %v810_v58 = vmax.f32 %v681_v32, 0.0  ;;  %v6211_v33 = vmax.f32 %v799_v49, %v807_v57  ;;  %v478_v54 = vadd.f32 %v6148_v45, %v5761_v8  ;;  %v802_v44 = vmax.f32 %v671_v31, 0.0 }
 0x155   :  { %v6198_v21 = vmax.f32 %v805_v63, %v813_v10  ;;  %4992 = vrot.lane.b32.xlu0 %v4991_v25, %s5369_s15  ;;  %4997 = vrot.lane.b32.xlu1 %v4991_v25, %s5370_s22  ;;  %v814_v7 = vmax.f32 %v685_v55, 0.0  ;;  %v6205_v12 = vmax.f32 %v803_v18, %v811_v39  ;;  %v806_v63 = vmax.f32 %v675_v2, 0.0 }
 0x156   :  { %v812_v52 = vmax.f32 %v492_v42, 0.0  ;;  %v804_v46 = vmax.f32 %v482_v35, 0.0  ;;  %v808_v1 = vmax.f32 %v488_v11, 0.0  ;;  %v6221_v55 = vmax.f32 %v802_v44, %v810_v58 }
 0x157   :  { %v5001_v22 = vpack.i.bf16 %v6198_v21, %v6196_v38  ;;  %v6217_v59 = vmax.f32 %v806_v63, %v814_v7  ;;  %v5011_v53 = vpack.i.bf16 %v6205_v12, %v6211_v33  ;;  %v800_v39 = vmax.f32 %v478_v54, 0.0 }
 0x158   :  { %v6225_v10 = vmax.f32 %v804_v46, %v812_v52 }
 0x159   :  { %5002 = vrot.lane.b32.xlu0 %v5001_v22, %s5368_s0  ;;  %5007 = vrot.lane.b32.xlu1 %v5001_v22, %s5369_s15  ;;  %v5026_v8 = vpack.i.bf16 %v6217_v59, %v6221_v55  ;;  %v6229_v31 = vmax.f32 %v800_v39, %v808_v1 }
 0x15b   :  { %v4723_v30 = vpop.permute.xlu0 %4722  ;;  %v4733_v23 = vpop.permute.xlu1 %4732  ;;  %v5031_v49 = vpack.i.bf16 %v6225_v10, %v6229_v31 }
 0x15c   :  { %v4725_v45 = vunpack.i.h.bf16 %v4723_v30  ;;  %v4724_v25 = vunpack.i.l.bf16 %v4723_v30  ;;  %v4735_v2 = vunpack.i.h.bf16 %v4733_v23  ;;  %v4734_v32 = vunpack.i.l.bf16 %v4733_v23 }
 0x15d   :  { %5012 = vrot.lane.b32.xlu0 %v5011_v53, %s5368_s0  ;;  %5017 = vrot.lane.b32.xlu1 %v5011_v53, %s5369_s15 }
 0x15e   :  { %v1283_v22 = vsel %vm1231_vm2, %v5777_v16, %v4725_v45  ;;  %v1282_v35 = vsel %vm1231_vm2, %v5773_v15, %v4724_v25  ;;  %v1233_v63 = vsel %vm1231_vm2, %v5775_v19, %v4735_v2  ;;  %v1232_v11 = vsel %vm1231_vm2, %v5771_v14, %v4734_v32 }
 0x15f   :  { %v4728_v18 = vpop.permute.xlu0 %4727  ;;  %v4738_v57 = vpop.permute.xlu1 %4737 }
 0x160   :  { %v4730_v42 = vunpack.i.h.bf16 %v4728_v18  ;;  %v4729_v7 = vunpack.i.l.bf16 %v4728_v18  ;;  %v4740_v16 = vunpack.i.h.bf16 %v4738_v57  ;;  %v4739_v1 = vunpack.i.l.bf16 %v4738_v57 }
 0x161   :  { %5027 = vrot.lane.b32.xlu0 %v5026_v8, %s5370_s22  ;;  %5022 = vrot.lane.b32.xlu1 %v5026_v8, %s5369_s15 }
 0x162   :  { %v1474_v53 = vsel %vm1231_vm2, %v4724_v25, %v4729_v7  ;;  %v1475_v46 = vsel %vm1231_vm2, %v4725_v45, %v4730_v42 }
 0x163   :  { %v4748_v58 = vpop.permute.xlu0 %4747  ;;  %v4743_v54 = vpop.permute.xlu1 %4742 }
 0x164   :  { %v4750_v44 = vunpack.i.h.bf16 %v4748_v58  ;;  %v4749_v52 = vunpack.i.l.bf16 %v4748_v58  ;;  %v4745_v30 = vunpack.i.h.bf16 %v4743_v54  ;;  %v4744_v23 = vunpack.i.l.bf16 %v4743_v54 }
 0x165   :  { %5032 = vrot.lane.b32.xlu0 %v5031_v49, %s5369_s15  ;;  %5037 = vrot.lane.b32.xlu1 %v5031_v49, %s5370_s22 }
 0x166   :  { %v1490_v15 = vsel %vm1248_vm3, %v1474_v53, %v4749_v52  ;;  %v1491_v14 = vsel %vm1248_vm3, %v1475_v46, %v4750_v44  ;;  %v1299_v19 = vsel %vm1248_vm3, %v1283_v22, %v4745_v30  ;;  %v1298_v39 = vsel %vm1248_vm3, %v1282_v35, %v4744_v23 }
 0x167   :  { %v1506_v8 = vsel %vm1265_vm4, %v1490_v15, %v5823_v56  ;;  %v1507_v45 = vsel %vm1265_vm4, %v1491_v14, %v5818_v48  ;;  %v1315_v25 = vsel %vm1265_vm4, %v1299_v19, %v4750_v44  ;;  %v1314_v18 = vsel %vm1265_vm4, %v1298_v39, %v4749_v52  ;;  %v4753_v57 = vpop.permute.xlu0 %4752  ;;  %v4758_v42 = vpop.permute.xlu1 %4757  ;;  %v5178_v19 = vld [vmem:[%s7833_s3 + $0xe8] ss:$16 sps:$4 sm:$0xff]  }
 0x168   :  { %v4755_v7 = vunpack.i.h.bf16 %v4753_v57  ;;  %v4754_v49 = vunpack.i.l.bf16 %v4753_v57  ;;  %v4760_v58 = vunpack.i.h.bf16 %v4758_v42  ;;  %v4759_v54 = vunpack.i.l.bf16 %v4758_v42  ;;  %v5186_v42 = vld [vmem:[%s7833_s3 + $0xcc] ss:$16 sps:$4 sm:$0xff]  }
 0x169   :  { %v1426_v22 = vsel %vm1231_vm2, %v4734_v32, %v4739_v1  ;;  %v1427_v35 = vsel %vm1231_vm2, %v4735_v2, %v4740_v16  ;;  %v1523_v30 = vmax.f32 %v1314_v18, %v1506_v8  ;;  %v1525_v23 = vmax.f32 %v1315_v25, %v1507_v45 }
 0x16a   :  { %v1249_v56 = vsel %vm1248_vm3, %v1232_v11, %v4754_v49  ;;  %v1250_v48 = vsel %vm1248_vm3, %v1233_v63, %v4755_v7  ;;  %v1442_v44 = vsel %vm1248_vm3, %v1426_v22, %v4759_v54  ;;  %v1443_v52 = vsel %vm1248_vm3, %v1427_v35, %v4760_v58  ;;  %v5175_v63 = vld [vmem:[%s7833_s3 + $0xe0] ss:$16 sps:$4 sm:$0xff]   ;;  %v5189_v22 = vld [vmem:[%s7833_s3 + $0xa4] ss:$16 sps:$4 sm:$0xff]  }
 0x16b   :  { %v1266_v53 = vsel %vm1265_vm4, %v1249_v56, %v4759_v54  ;;  %v1267_v46 = vsel %vm1265_vm4, %v1250_v48, %v4760_v58  ;;  %v1458_v15 = vsel %vm1265_vm4, %v1442_v44, %v5844_v9  ;;  %v1459_v2 = vsel %vm1265_vm4, %v1443_v52, %v5834_v62  ;;  %v4763_v32 = vpop.permute.xlu0 %4762  ;;  %v4768_v16 = vpop.permute.xlu1 %4767  ;;  %v5183_v62 = vld [vmem:[%s7833_s3 + $0xc4] ss:$16 sps:$4 sm:$0xff]   ;;  %v5181_v58 = vld [vmem:[%s7833_s3 + $0xc0] ss:$16 sps:$4 sm:$0xff]   ;;  %v5184_v54 = vld [vmem:[%s7833_s3 + $0xc8] ss:$16 sps:$4 sm:$0xff]  }
 0x16c   :  { %v1522_v1 = vmax.f32 %v1266_v53, %v1458_v15  ;;  %v1524_v11 = vmax.f32 %v1267_v46, %v1459_v2  ;;  %v6269_v14 = vpack.c.bf16 %v1525_v23, %v1523_v30  ;;  %v4765_v9 = vunpack.i.h.bf16 %v4763_v32  ;;  %v5192_v52 = vld [vmem:[%s7833_s3 + $0xac] ss:$16 sps:$4 sm:$0xff]  }
 0x16d   :  { %v4764_v8 = vunpack.i.l.bf16 %v4763_v32  ;;  %v4770_v45 = vunpack.i.h.bf16 %v4768_v16  ;;  %v4769_v25 = vunpack.i.l.bf16 %v4768_v16 }
 0x16e   :  { %v6277_v39 = vpack.c.bf16 %v1524_v11, %v1522_v1  ;;  %2265 = vmatprep.mubr.bf16.mxu0 %v6269_v14  ;;  %2378 = vmatprep.mubr.bf16.mxu1 %v6269_v14  ;;  %v1285_v35 = vsel %vm1231_vm2, %v5861_v6, %v4765_v9  ;;  %v5187_v1 = vld [vmem:[%s7833_s3 + $0xa0] ss:$16 sps:$4 sm:$0xff]   ;;  %v5190_v11 = vld [vmem:[%s7833_s3 + $0xa8] ss:$16 sps:$4 sm:$0xff]  }
 0x16f   :  { %v4773_v18 = vpop.permute.xlu0 %4772  ;;  %v4778_v57 = vpop.permute.xlu1 %4777  ;;  %v1284_v30 = vsel %vm1231_vm2, %v5858_v40, %v4764_v8  ;;  %v1477_v23 = vsel %vm1231_vm2, %v4765_v9, %v4770_v45  ;;  %v1476_v56 = vsel %vm1231_vm2, %v4764_v8, %v4769_v25  ;;  %v5198_v9 = vld [vmem:[%s7833_s3 + $0x8c] ss:$16 sps:$4 sm:$0xff]  }
 0x170   :  { %2266 = vmatmul.mubr.bf16.vlgmr.msra.gmra.mxu0 %v6277_v39  ;;  %2379 = vmatmul.mubr.bf16.vlgmr.msra.gmra.mxu1 %v6277_v39  ;;  %v4775_v7 = vunpack.i.h.bf16 %v4773_v18  ;;  %v4774_v49 = vunpack.i.l.bf16 %v4773_v18  ;;  %v4780_v32 = vunpack.i.h.bf16 %v4778_v57  ;;  %v4779_v16 = vunpack.i.l.bf16 %v4778_v57 }
 0x171   :  { %2860 = vmatpush1.bf16.msra.mxu0 %v5175_v63  ;;  %2973 = vmatpush1.bf16.msra.mxu1 %v5178_v19 }
 0x172   :  { %2861 = vmatprep.subr.bf16.mxu0 %v5183_v62  ;;  %2974 = vmatprep.subr.bf16.mxu1 %v5186_v42  ;;  %v1235_v6 = vsel %vm1231_vm2, %v5872_v51, %v4775_v7  ;;  %v1234_v40 = vsel %vm1231_vm2, %v5879_v61, %v4774_v49  ;;  %v5195_v62 = vld [vmem:[%s7833_s3 + $0x84] ss:$16 sps:$4 sm:$0xff]  }
 0x173   :  { %v4788_v48 = vpop.permute.xlu0 %4787  ;;  %v4783_v44 = vpop.permute.xlu1 %4782 }
 0x174   :  { %v4790_v53 = vunpack.i.h.bf16 %v4788_v48  ;;  %v4789_v46 = vunpack.i.l.bf16 %v4788_v48  ;;  %v4785_v15 = vunpack.i.h.bf16 %v4783_v44  ;;  %v4784_v2 = vunpack.i.l.bf16 %v4783_v44  ;;  %v5196_v48 = vld [vmem:[%s7833_s3 + $0x88] ss:$16 sps:$4 sm:$0xff]  }
 0x175   :  { %2862 = vmatpush1.bf16.msra.mxu0 %v5181_v58  ;;  %2975 = vmatpush1.bf16.msra.mxu1 %v5184_v54 }
 0x176   :  { %v1492_v63 = vsel %vm1248_vm3, %v1476_v56, %v4789_v46  ;;  %v1493_v19 = vsel %vm1248_vm3, %v1477_v23, %v4790_v53  ;;  %v1301_v51 = vsel %vm1248_vm3, %v1285_v35, %v4785_v15  ;;  %v1300_v61 = vsel %vm1248_vm3, %v1284_v30, %v4784_v2  ;;  %2863 = vmatprep.subr.bf16.mxu0 %v5189_v22 }
 0x177   :  { %v1508_v8 = vsel %vm1265_vm4, %v1492_v63, %v5889_v13  ;;  %v1509_v45 = vsel %vm1265_vm4, %v1493_v19, %v5885_v5  ;;  %v1317_v25 = vsel %vm1265_vm4, %v1301_v51, %v4790_v53  ;;  %v1316_v18 = vsel %vm1265_vm4, %v1300_v61, %v4789_v46  ;;  %v4793_v57 = vpop.permute.xlu0 %4792  ;;  %v4798_v42 = vpop.permute.xlu1 %4797  ;;  %2976 = vmatprep.subr.bf16.mxu1 %v5192_v52  ;;  %v5193_v5 = vld [vmem:[%s7833_s3 + $0x80] ss:$16 sps:$4 sm:$0xff]   ;;  %v5204_v53 = vld [vmem:[%s7833_s3 + $0x6c] ss:$16 sps:$4 sm:$0xff]  }
 0x178   :  { %v1527_v58 = vmax.f32 %v1316_v18, %v1508_v8  ;;  %v1529_v54 = vmax.f32 %v1317_v25, %v1509_v45  ;;  %v4795_v22 = vunpack.i.h.bf16 %v4793_v57  ;;  %v4794_v35 = vunpack.i.l.bf16 %v4793_v57  ;;  %v5199_v51 = vld [vmem:[%s7833_s3 + $0x60] ss:$16 sps:$4 sm:$0xff]   ;;  %v5202_v45 = vld [vmem:[%s7833_s3 + $0x68] ss:$16 sps:$4 sm:$0xff]   ;;  %v5207_v25 = vld [vmem:[%s7833_s3 + $0x44] ss:$16 sps:$4 sm:$0xff]  }
 0x179   :  { %v1429_v30 = vsel %vm1231_vm2, %v4775_v7, %v4780_v32  ;;  %v1428_v23 = vsel %vm1231_vm2, %v4774_v49, %v4779_v16  ;;  %v4800_v56 = vunpack.i.h.bf16 %v4798_v42  ;;  %v4799_v13 = vunpack.i.l.bf16 %v4798_v42  ;;  %2864 = vmatpush1.bf16.msra.mxu0 %v5187_v1  ;;  %2977 = vmatpush1.bf16.msra.mxu1 %v5190_v11  ;;  %v5201_v49 = vld [vmem:[%s7833_s3 + $0x64] ss:$16 sps:$4 sm:$0xff]   ;;  %v5210_v18 = vld [vmem:[%s7833_s3 + $0x4c] ss:$16 sps:$4 sm:$0xff]  }
 0x17a   :  { %v6341_v44 = vpack.c.bf16 %v1529_v54, %v1527_v58  ;;  %v1251_v52 = vsel %vm1248_vm3, %v1234_v40, %v4794_v35  ;;  %v1252_v7 = vsel %vm1248_vm3, %v1235_v6, %v4795_v22  ;;  %2865 = vmatprep.subr.bf16.mxu0 %v5195_v62  ;;  %2978 = vmatprep.subr.bf16.mxu1 %v5198_v9  ;;  %v5205_v58 = vld [vmem:[%s7833_s3 + $0x40] ss:$16 sps:$4 sm:$0xff]  }
 0x17b   :  { %v1269_v46 = vsel %vm1265_vm4, %v1252_v7, %v4800_v56  ;;  %v1268_v15 = vsel %vm1265_vm4, %v1251_v52, %v4799_v13  ;;  %v1444_v2 = vsel %vm1248_vm3, %v1428_v23, %v4799_v13  ;;  %v1445_v40 = vsel %vm1248_vm3, %v1429_v30, %v4800_v56  ;;  %v4803_v32 = vpop.permute.xlu0 %4802  ;;  %v4808_v6 = vpop.permute.xlu1 %4807  ;;  %v5216_v52 = vld [vmem:[%s7833_s3 + $0x2c] ss:$16 sps:$4 sm:$0xff]  }
 0x17c   :  { %v1460_v16 = vsel %vm1265_vm4, %v1444_v2, %v5900_v36  ;;  %v1461_v1 = vsel %vm1265_vm4, %v1445_v40, %v5894_v27  ;;  %2275 = vmatprep.mubr.bf16.mxu0 %v6341_v44  ;;  %2388 = vmatprep.mubr.bf16.mxu1 %v6341_v44  ;;  %v4805_v19 = vunpack.i.h.bf16 %v4803_v32  ;;  %v4804_v36 = vunpack.i.l.bf16 %v4803_v32 }
 0x17d   :  { %v1526_v11 = vmax.f32 %v1268_v15, %v1460_v16  ;;  %v1528_v63 = vmax.f32 %v1269_v46, %v1461_v1  ;;  %2866 = vmatpush1.bf16.msra.mxu0 %v5193_v5  ;;  %2979 = vmatpush1.bf16.msra.mxu1 %v5196_v48  ;;  %v4810_v62 = vunpack.i.h.bf16 %v4808_v6  ;;  %v4809_v27 = vunpack.i.l.bf16 %v4808_v6  ;;  %v5211_v6 = vld [vmem:[%s7833_s3 + $0x20] ss:$16 sps:$4 sm:$0xff]  }
 0x17e   :  { %2867 = vmatprep.subr.bf16.mxu0 %v5201_v49  ;;  %2980 = vmatprep.subr.bf16.mxu1 %v5204_v53  ;;  %v1287_v42 = vsel %vm1231_vm2, %v5916_v37, %v4805_v19  ;;  %v1286_v54 = vsel %vm1231_vm2, %v5913_v29, %v4804_v36  ;;  %v5208_v37 = vld [vmem:[%s7833_s3 + $0x48] ss:$16 sps:$4 sm:$0xff]   ;;  %v5213_v29 = vld [vmem:[%s7833_s3 + $0x24] ss:$16 sps:$4 sm:$0xff]  }
 0x17f   :  { %v6364_v61 = vpack.c.bf16 %v1528_v63, %v1526_v11  ;;  %v4813_v9 = vpop.permute.xlu0 %4812  ;;  %v4818_v8 = vpop.permute.xlu1 %4817  ;;  %v1479_v22 = vsel %vm1231_vm2, %v4805_v19, %v4810_v62  ;;  %v1478_v35 = vsel %vm1231_vm2, %v4804_v36, %v4809_v27 }
 0x180   :  { %v4815_v57 = vunpack.i.h.bf16 %v4813_v9  ;;  %v4814_v49 = vunpack.i.l.bf16 %v4813_v9  ;;  %v4820_v53 = vunpack.i.h.bf16 %v4818_v8  ;;  %v4819_v46 = vunpack.i.l.bf16 %v4818_v8 }
 0x181   :  { %2276 = vmatmul.mubr.bf16.gmra.mxu0 %v6364_v61  ;;  %2389 = vmatmul.mubr.bf16.gmra.mxu1 %v6364_v61 }
 0x182   :  { %2868 = vmatpush1.bf16.msra.mxu0 %v5199_v51  ;;  %2981 = vmatpush1.bf16.msra.mxu1 %v5202_v45  ;;  %v1237_v7 = vsel %vm1231_vm2, %v5927_v26, %v4815_v57  ;;  %v5214_v51 = vld [vmem:[%s7833_s3 + $0x28] ss:$16 sps:$4 sm:$0xff]  }
 0x183   :  { %v4828_v30 = vpop.permute.xlu0 %4827  ;;  %v4823_v23 = vpop.permute.xlu1 %4822  ;;  %2869 = vmatprep.subr.bf16.mxu0 %v5207_v25  ;;  %2982 = vmatprep.subr.bf16.mxu1 %v5210_v18  ;;  %v5219_v25 = vld [vmem:[%s7833_s3 + $0x4] ss:$16 sps:$4 sm:$0xff]   ;;  %v5222_v18 = vld [vmem:[%s7833_s3 + $0xc] ss:$16 sps:$4 sm:$0xff]  }
 0x184   :  { %v4830_v56 = vunpack.i.h.bf16 %v4828_v30  ;;  %v4829_v13 = vunpack.i.l.bf16 %v4828_v30  ;;  %v4825_v5 = vunpack.i.h.bf16 %v4823_v23  ;;  %v4824_v48 = vunpack.i.l.bf16 %v4823_v23 }
 0x186   :  { %v1494_v15 = vsel %vm1248_vm3, %v1478_v35, %v4829_v13  ;;  %v1495_v2 = vsel %vm1248_vm3, %v1479_v22, %v4830_v56  ;;  %v1303_v40 = vsel %vm1248_vm3, %v1287_v42, %v4825_v5  ;;  %v1302_v32 = vsel %vm1248_vm3, %v1286_v54, %v4824_v48  ;;  %2870 = vmatpush1.bf16.msra.mxu0 %v5205_v58  ;;  %v5225_v5 = vld [vmem:[%s7833_s3 + $0x1e4] ss:$16 sps:$4 sm:$0xff]  }
 0x187   :  { %v1510_v16 = vsel %vm1265_vm4, %v1494_v15, %v5943_v17  ;;  %v1511_v26 = vsel %vm1265_vm4, %v1495_v2, %v5939_v43  ;;  %v1319_v1 = vsel %vm1265_vm4, %v1303_v40, %v4830_v56  ;;  %v1318_v11 = vsel %vm1265_vm4, %v1302_v32, %v4829_v13  ;;  %v4833_v63 = vpop.permute.xlu0 %4832  ;;  %v4838_v19 = vpop.permute.xlu1 %4837  ;;  %2983 = vmatpush1.bf16.msra.mxu1 %v5208_v37  ;;  %v5220_v13 = vld [vmem:[%s7833_s3 + $0x8] ss:$16 sps:$4 sm:$0xff]  }
 0x188   :  { %v1531_v36 = vmax.f32 %v1318_v11, %v1510_v16  ;;  %v1533_v62 = vmax.f32 %v1319_v1, %v1511_v26  ;;  %v4835_v27 = vunpack.i.h.bf16 %v4833_v63  ;;  %v4834_v9 = vunpack.i.l.bf16 %v4833_v63  ;;  %2871 = vmatprep.subr.bf16.mxu0 %v5213_v29  ;;  %2984 = vmatprep.subr.bf16.mxu1 %v5216_v52  ;;  %v5228_v52 = vld [vmem:[%s7833_s3 + $0x1ec] ss:$16 sps:$4 sm:$0xff]   ;;  %v5231_v16 = vld [vmem:[%s7833_s3 + $0x1c4] ss:$16 sps:$4 sm:$0xff]   ;;  %v5229_v63 = vld [vmem:[%s7833_s3 + $0x1c0] ss:$16 sps:$4 sm:$0xff]  }
 0x189   :  { %v1236_v43 = vsel %vm1231_vm2, %v5933_v41, %v4814_v49  ;;  %v1431_v17 = vsel %vm1231_vm2, %v4815_v57, %v4820_v53  ;;  %v4840_v8 = vunpack.i.h.bf16 %v4838_v19  ;;  %v4839_v45 = vunpack.i.l.bf16 %v4838_v19  ;;  %v5217_v57 = vld [vmem:[%s7833_s3] ss:$16 sps:$4 sm:$0xff]   ;;  %v5234_v26 = vld [vmem:[%s7833_s3 + $0x1cc] ss:$16 sps:$4 sm:$0xff]  }
 0x18a   :  { %v1430_v42 = vsel %vm1231_vm2, %v4814_v49, %v4819_v46  ;;  %v6423_v58 = vpack.c.bf16 %v1533_v62, %v1531_v36  ;;  %v1253_v54 = vsel %vm1248_vm3, %v1236_v43, %v4834_v9  ;;  %v1254_v41 = vsel %vm1248_vm3, %v1237_v7, %v4835_v27  ;;  %2872 = vmatpush1.bf16.msra.mxu0 %v5211_v6  ;;  %v5226_v6 = vld [vmem:[%s7833_s3 + $0x1e8] ss:$16 sps:$4 sm:$0xff]  }
 0x18b   :  { %v1271_v22 = vsel %vm1265_vm4, %v1254_v41, %v4840_v8  ;;  %v1270_v35 = vsel %vm1265_vm4, %v1253_v54, %v4839_v45  ;;  %v1446_v30 = vsel %vm1248_vm3, %v1430_v42, %v4839_v45  ;;  %v1447_v23 = vsel %vm1248_vm3, %v1431_v17, %v4840_v8  ;;  %v4843_v37 = vpop.permute.xlu0 %4842  ;;  %v4848_v56 = vpop.permute.xlu1 %4847  ;;  %2985 = vmatpush1.bf16.msra.mxu1 %v5214_v51  ;;  %v5240_v45 = vld [vmem:[%s7833_s3 + $0x1ac] ss:$16 sps:$4 sm:$0xff]  }
 0x18c   :  { %v1462_v48 = vsel %vm1265_vm4, %v1446_v30, %v5954_v28  ;;  %v1463_v29 = vsel %vm1265_vm4, %v1447_v23, %v5948_v3  ;;  %2285 = vmatprep.mubr.bf16.mxu0 %v6423_v58  ;;  %2398 = vmatprep.mubr.bf16.mxu1 %v6423_v58  ;;  %v4845_v53 = vunpack.i.h.bf16 %v4843_v37  ;;  %v5223_v28 = vld [vmem:[%s7833_s3 + $0x1e0] ss:$16 sps:$4 sm:$0xff]   ;;  %v4844_v3 = vunpack.i.l.bf16 %v4843_v37 }
 0x18d   :  { %v1530_v7 = vmax.f32 %v1270_v35, %v1462_v48  ;;  %v1532_v49 = vmax.f32 %v1271_v22, %v1463_v29  ;;  %2873 = vmatprep.subr.bf16.mxu0 %v5219_v25  ;;  %2986 = vmatprep.subr.bf16.mxu1 %v5222_v18  ;;  %v4850_v15 = vunpack.i.h.bf16 %v4848_v56  ;;  %v4849_v2 = vunpack.i.l.bf16 %v4848_v56  ;;  %v5235_v30 = vld [vmem:[%s7833_s3 + $0x1a0] ss:$16 sps:$4 sm:$0xff]   ;;  %v5238_v29 = vld [vmem:[%s7833_s3 + $0x1a8] ss:$16 sps:$4 sm:$0xff]  }
 0x18e   :  { %2874 = vmatpush1.bf16.msra.mxu0 %v5217_v57  ;;  %v1289_v11 = vsel %vm1231_vm2, %v5970_v60, %v4845_v53  ;;  %v1288_v19 = vsel %vm1231_vm2, %v5967_v24, %v4844_v3  ;;  %v5232_v60 = vld [vmem:[%s7833_s3 + $0x1c8] ss:$16 sps:$4 sm:$0xff]   ;;  %v5237_v24 = vld [vmem:[%s7833_s3 + $0x1a4] ss:$16 sps:$4 sm:$0xff]  }
 0x18f   :  { %v6452_v46 = vpack.c.bf16 %v1532_v49, %v1530_v7  ;;  %v4853_v40 = vpop.permute.xlu0 %4852  ;;  %v4858_v32 = vpop.permute.xlu1 %4857  ;;  %2987 = vmatpush1.bf16.msra.mxu1 %v5220_v13  ;;  %2875 = vmatprep.subr.bf16.mxu0 %v5225_v5  ;;  %v1481_v51 = vsel %vm1231_vm2, %v4845_v53, %v4850_v15  ;;  %v1480_v36 = vsel %vm1231_vm2, %v4844_v3, %v4849_v2 }
 0x190   :  { %2988 = vmatprep.subr.bf16.mxu1 %v5228_v52  ;;  %v4855_v1 = vunpack.i.h.bf16 %v4853_v40  ;;  %v4854_v18 = vunpack.i.l.bf16 %v4853_v40  ;;  %v4860_v42 = vunpack.i.h.bf16 %v4858_v32  ;;  %v4859_v54 = vunpack.i.l.bf16 %v4858_v32  ;;  %v5243_v40 = vld [vmem:[%s7833_s3 + $0x184] ss:$16 sps:$4 sm:$0xff]   ;;  %v5246_v32 = vld [vmem:[%s7833_s3 + $0x18c] ss:$16 sps:$4 sm:$0xff]  }
 0x191   :  { %2286 = vmatmul.mubr.bf16.gmra.mxu0 %v6452_v46  ;;  %2399 = vmatmul.mubr.bf16.gmra.mxu1 %v6452_v46 }
 0x192   :  { %2876 = vmatpush2.bf16.msra.mxu0 %v5223_v28  ;;  %v1239_v25 = vsel %vm1231_vm2, %v5981_v34, %v4855_v1  ;;  %v7894_v34 = vld [vmem:[#allocation5_spill] sm:$0xff]  ;;  %v1433_v3 = vsel %vm1231_vm2, %v4855_v1, %v4860_v42 }
 0x193   :  { %v4868_v62 = vpop.permute.xlu0 %4867  ;;  %v4863_v27 = vpop.permute.xlu1 %4862  ;;  %2989 = vmatpush2.bf16.msra.mxu1 %v5226_v6  ;;  %2877 = vmatprep.subr.bf16.mxu0 %v5231_v16  ;;  %v1432_v6 = vsel %vm1231_vm2, %v4854_v18, %v4859_v54  ;;  %v5241_v1 = vld [vmem:[%s7833_s3 + $0x180] ss:$16 sps:$4 sm:$0xff]  }
 0x194   :  { %v4870_v9 = vunpack.i.h.bf16 %v4868_v62  ;;  %v4869_v43 = vunpack.i.l.bf16 %v4868_v62  ;;  %v4865_v17 = vunpack.i.h.bf16 %v4863_v27  ;;  %v4864_v8 = vunpack.i.l.bf16 %v4863_v27  ;;  %2990 = vmatprep.subr.bf16.mxu1 %v5234_v26  ;;  %v5247_v54 = vld [vmem:[%s7833_s3 + $0x160] ss:$16 sps:$4 sm:$0xff]  }
 0x196   :  { %v1496_v41 = vsel %vm1248_vm3, %v1480_v36, %v4869_v43  ;;  %v1497_v57 = vsel %vm1248_vm3, %v1481_v51, %v4870_v9  ;;  %v1305_v22 = vsel %vm1248_vm3, %v1289_v11, %v4865_v17  ;;  %v1304_v35 = vsel %vm1248_vm3, %v1288_v19, %v4864_v8  ;;  %2878 = vmatpush2.bf16.msra.mxu0 %v5229_v63  ;;  %v7897_v8 = vld [vmem:[#allocation6_spill] sm:$0xff] }
 0x197   :  { %v1512_v23 = vsel %vm1265_vm4, %v1496_v41, %v5997_v0  ;;  %v1513_v37 = vsel %vm1265_vm4, %v1497_v57, %v7894_v34  ;;  %v1321_v56 = vsel %vm1265_vm4, %v1305_v22, %v4870_v9  ;;  %v1320_v13 = vsel %vm1265_vm4, %v1304_v35, %v4869_v43  ;;  %v4873_v5 = vpop.permute.xlu0 %4872  ;;  %v4878_v48 = vpop.permute.xlu1 %4877  ;;  %2991 = vmatpush2.bf16.msra.mxu1 %v5232_v60  ;;  %v7895_v0 = vld [vmem:[#allocation4_spill] sm:$0xff]  ;;  %v5249_v9 = vld [vmem:[%s7833_s3 + $0x164] ss:$16 sps:$4 sm:$0xff]  }
 0x198   :  { %v1535_v52 = vmax.f32 %v1320_v13, %v1512_v23  ;;  %v1537_v7 = vmax.f32 %v1321_v56, %v1513_v37  ;;  %v4875_v49 = vunpack.i.h.bf16 %v4873_v5  ;;  %v4874_v53 = vunpack.i.l.bf16 %v4873_v5  ;;  %2879 = vmatprep.subr.bf16.mxu0 %v5237_v24  ;;  %2992 = vmatprep.subr.bf16.mxu1 %v5240_v45  ;;  %v5244_v60 = vld [vmem:[%s7833_s3 + $0x188] ss:$16 sps:$4 sm:$0xff]   ;;  %v7896_v43 = vld [vmem:[#allocation7_spill] sm:$0xff]  ;;  %v5252_v45 = vld [vmem:[%s7833_s3 + $0x16c] ss:$16 sps:$4 sm:$0xff]  }
 0x199   :  { %v1238_v28 = vsel %vm1231_vm2, %v7895_v0, %v4854_v18  ;;  %v4880_v15 = vunpack.i.h.bf16 %v4878_v48  ;;  %v4879_v2 = vunpack.i.l.bf16 %v4878_v48  ;;  %v5250_v34 = vld [vmem:[%s7833_s3 + $0x168] ss:$16 sps:$4 sm:$0xff]   ;;  %v5255_v37 = vld [vmem:[%s7833_s3 + $0x144] ss:$16 sps:$4 sm:$0xff]   ;;  %v5258_v56 = vld [vmem:[%s7833_s3 + $0x14c] ss:$16 sps:$4 sm:$0xff]  }
 0x19a   :  { %v6511_v16 = vpack.c.bf16 %v1537_v7, %v1535_v52  ;;  %v1255_v26 = vsel %vm1248_vm3, %v1238_v28, %v4874_v53  ;;  %v1256_v11 = vsel %vm1248_vm3, %v1239_v25, %v4875_v49  ;;  %2880 = vmatpush2.bf16.msra.mxu0 %v5235_v30  ;;  %v7898_v5 = vld [vmem:[#allocation9_spill] sm:$0xff]  ;;  %v7899_v52 = vld [vmem:[#allocation8_spill] sm:$0xff] }
 0x19b   :  { %v1273_v63 = vsel %vm1265_vm4, %v1256_v11, %v4880_v15  ;;  %v1272_v19 = vsel %vm1265_vm4, %v1255_v26, %v4879_v2  ;;  %v1448_v51 = vsel %vm1248_vm3, %v1432_v6, %v4879_v2  ;;  %v1449_v36 = vsel %vm1248_vm3, %v1433_v3, %v4880_v15  ;;  %v4883_v62 = vpop.permute.xlu0 %4882  ;;  %v4888_v27 = vpop.permute.xlu1 %4887  ;;  %2993 = vmatpush2.bf16.msra.mxu1 %v5238_v29  ;;  %v5253_v29 = vld [vmem:[%s7833_s3 + $0x140] ss:$16 sps:$4 sm:$0xff]   ;;  %v5256_v3 = vld [vmem:[%s7833_s3 + $0x148] ss:$16 sps:$4 sm:$0xff]   ;;  %v5261_v6 = vld [vmem:[%s7833_s3 + $0x124] ss:$16 sps:$4 sm:$0xff]  }
 0x19c   :  { %v1464_v17 = vsel %vm1265_vm4, %v1448_v51, %v7896_v43  ;;  %v1465_v24 = vsel %vm1265_vm4, %v1449_v36, %v7897_v8  ;;  %2295 = vmatprep.mubr.bf16.mxu0 %v6511_v16  ;;  %2408 = vmatprep.mubr.bf16.mxu1 %v6511_v16  ;;  %v4885_v42 = vunpack.i.h.bf16 %v4883_v62  ;;  %v4884_v57 = vunpack.i.l.bf16 %v4883_v62  ;;  %v5264_v26 = vld [vmem:[%s7833_s3 + $0x12c] ss:$16 sps:$4 sm:$0xff]   ;;  %v7901_v43 = vld [vmem:[#allocation13_spill] sm:$0xff] }
 0x19d   :  { %v1534_v25 = vmax.f32 %v1272_v19, %v1464_v17  ;;  %v1536_v18 = vmax.f32 %v1273_v63, %v1465_v24  ;;  %2881 = vmatprep.subr.bf16.mxu0 %v5243_v40  ;;  %2994 = vmatprep.subr.bf16.mxu1 %v5246_v32  ;;  %v4890_v22 = vunpack.i.h.bf16 %v4888_v27  ;;  %v4889_v35 = vunpack.i.l.bf16 %v4888_v27  ;;  %v7900_v11 = vld [vmem:[#allocation10_spill] sm:$0xff]  ;;  %v7902_v8 = vld [vmem:[#allocation12_spill] sm:$0xff] }
 0x19e   :  { %2882 = vmatpush2.bf16.msra.mxu0 %v5241_v1  ;;  %v1291_v48 = vsel %vm1231_vm2, %v7898_v5, %v4885_v42  ;;  %v1290_v7 = vsel %vm1231_vm2, %v7899_v52, %v4884_v57 }
 0x19f   :  { %v6540_v41 = vpack.c.bf16 %v1536_v18, %v1534_v25  ;;  %v4893_v30 = vpop.permute.xlu0 %4892  ;;  %v4898_v23 = vpop.permute.xlu1 %4897  ;;  %2995 = vmatpush2.bf16.msra.mxu1 %v5244_v60  ;;  %2883 = vmatprep.subr.bf16.mxu0 %v5249_v9  ;;  %v1483_v49 = vsel %vm1231_vm2, %v4885_v42, %v4890_v22  ;;  %v1482_v53 = vsel %vm1231_vm2, %v4884_v57, %v4889_v35  ;;  %v5259_v9 = vld [vmem:[%s7833_s3 + $0x120] ss:$16 sps:$4 sm:$0xff]  }
 0x1a0   :  { %2996 = vmatprep.subr.bf16.mxu1 %v5252_v45  ;;  %v4895_v13 = vunpack.i.h.bf16 %v4893_v30  ;;  %v4894_v63 = vunpack.i.l.bf16 %v4893_v30  ;;  %v4900_v19 = vunpack.i.h.bf16 %v4898_v23  ;;  %v4899_v51 = vunpack.i.l.bf16 %v4898_v23  ;;  %v7903_v23 = vld [vmem:[#allocation11_spill] sm:$0xff] }
 0x1a1   :  { %2296 = vmatmul.mubr.bf16.gmra.mxu0 %v6540_v41  ;;  %2409 = vmatmul.mubr.bf16.gmra.mxu1 %v6540_v41 }
 0x1a2   :  { %2884 = vmatpush2.bf16.msra.mxu0 %v5247_v54  ;;  %v1241_v1 = vsel %vm1231_vm2, %v7900_v11, %v4895_v13  ;;  %v5262_v54 = vld [vmem:[%s7833_s3 + $0x128] ss:$16 sps:$4 sm:$0xff]   ;;  %v1434_v52 = vsel %vm1231_vm2, %v4894_v63, %v4899_v51 }
 0x1a3   :  { %v4908_v0 = vpop.permute.xlu0 %4907  ;;  %v4903_v28 = vpop.permute.xlu1 %4902  ;;  %2997 = vmatpush2.bf16.msra.mxu1 %v5250_v34  ;;  %2885 = vmatprep.subr.bf16.mxu0 %v5255_v37  ;;  %v1240_v34 = vsel %vm1231_vm2, %v7903_v23, %v4894_v63  ;;  %v1435_v37 = vsel %vm1231_vm2, %v4895_v13, %v4900_v19  ;;  %v5265_v13 = vld [vmem:[%s7833_s3 + $0x100] ss:$16 sps:$4 sm:$0xff]   ;;  %v5276_v19 = vld [vmem:[%s7833_s3 + $0x4ec] ss:$16 sps:$4 sm:$0xff]  }
 0x1a4   :  { %v4910_v15 = vunpack.i.h.bf16 %v4908_v0  ;;  %v4909_v2 = vunpack.i.l.bf16 %v4908_v0  ;;  %v4905_v40 = vunpack.i.h.bf16 %v4903_v28  ;;  %v4904_v32 = vunpack.i.l.bf16 %v4903_v28  ;;  %2998 = vmatprep.subr.bf16.mxu1 %v5258_v56 }
 0x1a6   :  { %v1498_v36 = vsel %vm1248_vm3, %v1482_v53, %v4909_v2  ;;  %v1499_v62 = vsel %vm1248_vm3, %v1483_v49, %v4910_v15  ;;  %v1307_v27 = vsel %vm1248_vm3, %v1291_v48, %v4905_v40  ;;  %v1306_v60 = vsel %vm1248_vm3, %v1290_v7, %v4904_v32  ;;  %2886 = vmatpush2.bf16.msra.mxu0 %v5253_v29  ;;  %v5267_v48 = vld [vmem:[%s7833_s3 + $0x104] ss:$16 sps:$4 sm:$0xff]   ;;  %v5270_v29 = vld [vmem:[%s7833_s3 + $0x10c] ss:$16 sps:$4 sm:$0xff]   ;;  %v5268_v32 = vld [vmem:[%s7833_s3 + $0x108] ss:$16 sps:$4 sm:$0xff]  }
 0x1a7   :  { %v1514_v17 = vsel %vm1265_vm4, %v1498_v36, %v7901_v43  ;;  %v1515_v24 = vsel %vm1265_vm4, %v1499_v62, %v7902_v8  ;;  %v1323_v45 = vsel %vm1265_vm4, %v1307_v27, %v4910_v15  ;;  %v1322_v25 = vsel %vm1265_vm4, %v1306_v60, %v4909_v2  ;;  %v4913_v18 = vpop.permute.xlu0 %4912  ;;  %v4918_v42 = vpop.permute.xlu1 %4917  ;;  %2999 = vmatpush2.bf16.msra.mxu1 %v5256_v3 }
 0x1a8   :  { %v1539_v57 = vmax.f32 %v1322_v25, %v1514_v17  ;;  %v1541_v22 = vmax.f32 %v1323_v45, %v1515_v24  ;;  %v4915_v35 = vunpack.i.h.bf16 %v4913_v18  ;;  %v4914_v30 = vunpack.i.l.bf16 %v4913_v18  ;;  %2887 = vmatprep.subr.bf16.mxu0 %v5261_v6  ;;  %3000 = vmatprep.subr.bf16.mxu1 %v5264_v26  ;;  %v5273_v6 = vld [vmem:[%s7833_s3 + $0x4e4] ss:$16 sps:$4 sm:$0xff]   ;;  %v7907_v18 = vld [vmem:[#allocation16_spill] sm:$0xff] }
 0x1a9   :  { %v4920_v56 = vunpack.i.h.bf16 %v4918_v42  ;;  %v4919_v5 = vunpack.i.l.bf16 %v4918_v42  ;;  %v7904_v26 = vld [vmem:[#allocation15_spill] sm:$0xff]  ;;  %v7906_v45 = vld [vmem:[#allocation17_spill] sm:$0xff] }
 0x1aa   :  { %v6599_v7 = vpack.c.bf16 %v1541_v22, %v1539_v57  ;;  %v1257_v49 = vsel %vm1248_vm3, %v1240_v34, %v4914_v30  ;;  %v1258_v53 = vsel %vm1248_vm3, %v1241_v1, %v4915_v35  ;;  %2888 = vmatpush2.bf16.msra.mxu0 %v5259_v9  ;;  %v7905_v1 = vld [vmem:[#allocation14_spill] sm:$0xff] }
 0x1ab   :  { %v1275_v0 = vsel %vm1265_vm4, %v1258_v53, %v4920_v56  ;;  %v1274_v28 = vsel %vm1265_vm4, %v1257_v49, %v4919_v5  ;;  %v1450_v3 = vsel %vm1248_vm3, %v1434_v52, %v4919_v5  ;;  %v1451_v15 = vsel %vm1248_vm3, %v1435_v37, %v4920_v56  ;;  %v4923_v2 = vpop.permute.xlu0 %4922  ;;  %v4928_v40 = vpop.permute.xlu1 %4927  ;;  %3001 = vmatpush2.bf16.msra.mxu1 %v5262_v54  ;;  %v7908_v56 = vld [vmem:[#allocation18_spill] sm:$0xff] }
 0x1ac   :  { %v1466_v11 = vsel %vm1265_vm4, %v1450_v3, %v7904_v26  ;;  %v1467_v63 = vsel %vm1265_vm4, %v1451_v15, %v7905_v1  ;;  %2305 = vmatprep.mubr.bf16.mxu0 %v6599_v7  ;;  %2418 = vmatprep.mubr.bf16.mxu1 %v6599_v7  ;;  %v4925_v62 = vunpack.i.h.bf16 %v4923_v2  ;;  %v4924_v60 = vunpack.i.l.bf16 %v4923_v2  ;;  %v7910_v15 = vld [vmem:[#allocation20_spill] sm:$0xff] }
 0x1ad   :  { %v1538_v51 = vmax.f32 %v1274_v28, %v1466_v11  ;;  %v1540_v36 = vmax.f32 %v1275_v0, %v1467_v63  ;;  %2889 = vmatprep.subr.bf16.mxu0 %v5267_v48  ;;  %3002 = vmatprep.subr.bf16.mxu1 %v5270_v29  ;;  %v4930_v9 = vunpack.i.h.bf16 %v4928_v40  ;;  %v4929_v43 = vunpack.i.l.bf16 %v4928_v40  ;;  %v7909_v28 = vld [vmem:[#allocation21_spill] sm:$0xff] }
 0x1ae   :  { %2890 = vmatpush2.bf16.msra.mxu0 %v5265_v13  ;;  %v1293_v25 = vsel %vm1231_vm2, %v7906_v45, %v4925_v62  ;;  %v1292_v42 = vsel %vm1231_vm2, %v7907_v18, %v4924_v60 }
 0x1af   :  { %v6625_v27 = vpack.c.bf16 %v1540_v36, %v1538_v51  ;;  %v4933_v17 = vpop.permute.xlu0 %4932  ;;  %v4938_v8 = vpop.permute.xlu1 %4937  ;;  %3003 = vmatpush2.bf16.msra.mxu1 %v5268_v32  ;;  %3567 = vmatprep.subr.bf16.mxu0 %v5273_v6  ;;  %v1485_v54 = vsel %vm1231_vm2, %v4925_v62, %v4930_v9  ;;  %v1484_v57 = vsel %vm1231_vm2, %v4924_v60, %v4929_v43  ;;  %v7911_v51 = vld [vmem:[#allocation19_spill] sm:$0xff] }
 0x1b0   :  { %3680 = vmatprep.subr.bf16.mxu1 %v5276_v19  ;;  %v4935_v24 = vunpack.i.h.bf16 %v4933_v17  ;;  %v4934_v48 = vunpack.i.l.bf16 %v4933_v17  ;;  %v4940_v29 = vunpack.i.h.bf16 %v4938_v8  ;;  %v4939_v52 = vunpack.i.l.bf16 %v4938_v8 }
 0x1b1   :  { %2306 = vmatmul.mubr.bf16.gmra.mxu0 %v6625_v27  ;;  %2419 = vmatmul.mubr.bf16.gmra.mxu1 %v6625_v27 }
 0x1b2   :  { %v1243_v5 = vsel %vm1231_vm2, %v7908_v56, %v4935_v24  ;;  %v1242_v36 = vsel %vm1231_vm2, %v7911_v51, %v4934_v48  ;;  %v1437_v62 = vsel %vm1231_vm2, %v4935_v24, %v4940_v29  ;;  %v1436_v43 = vsel %vm1231_vm2, %v4934_v48, %v4939_v52 }
 0x1b3   :  { %v4948_v22 = vpop.permute.xlu0 %4947  ;;  %v4943_v35 = vpop.permute.xlu1 %4942 }
 0x1b4   :  { %v4950_v30 = vunpack.i.h.bf16 %v4948_v22  ;;  %v4949_v23 = vunpack.i.l.bf16 %v4948_v22  ;;  %v4945_v34 = vunpack.i.h.bf16 %v4943_v35  ;;  %v4944_v37 = vunpack.i.l.bf16 %v4943_v35 }
 0x1b6   :  { %v1500_v49 = vsel %vm1248_vm3, %v1484_v57, %v4949_v23  ;;  %v1501_v53 = vsel %vm1248_vm3, %v1485_v54, %v4950_v30  ;;  %v1309_v13 = vsel %vm1248_vm3, %v1293_v25, %v4945_v34  ;;  %v1308_v0 = vsel %vm1248_vm3, %v1292_v42, %v4944_v37 }
 0x1b7   :  { %v1516_v3 = vsel %vm1265_vm4, %v1500_v49, %v7909_v28  ;;  %v1517_v2 = vsel %vm1265_vm4, %v1501_v53, %v7910_v15  ;;  %v1325_v40 = vsel %vm1265_vm4, %v1309_v13, %v4950_v30  ;;  %v1324_v32 = vsel %vm1265_vm4, %v1308_v0, %v4949_v23  ;;  %v4953_v6 = vpop.permute.xlu0 %4952  ;;  %v4958_v26 = vpop.permute.xlu1 %4957  ;;  %v7913_v53 = vld [vmem:[#allocation22_spill] sm:$0xff] }
 0x1b8   :  { %v1543_v11 = vmax.f32 %v1324_v32, %v1516_v3  ;;  %v1545_v1 = vmax.f32 %v1325_v40, %v1517_v2  ;;  %v4955_v63 = vunpack.i.h.bf16 %v4953_v6  ;;  %v4954_v19 = vunpack.i.l.bf16 %v4953_v6 }
 0x1b9   :  { %v4960_v60 = vunpack.i.h.bf16 %v4958_v26  ;;  %v4959_v9 = vunpack.i.l.bf16 %v4958_v26  ;;  %v7914_v26 = vld [vmem:[#allocation24_spill] sm:$0xff] }
 0x1ba   :  { %v6651_v17 = vpack.c.bf16 %v1545_v1, %v1543_v11  ;;  %v1259_v8 = vsel %vm1248_vm3, %v1242_v36, %v4954_v19  ;;  %v1260_v45 = vsel %vm1248_vm3, %v1243_v5, %v4955_v63 }
 0x1bb   :  { %v1277_v25 = vsel %vm1265_vm4, %v1260_v45, %v4960_v60  ;;  %v1276_v18 = vsel %vm1265_vm4, %v1259_v8, %v4959_v9  ;;  %v1452_v42 = vsel %vm1248_vm3, %v1436_v43, %v4959_v9  ;;  %v1453_v54 = vsel %vm1248_vm3, %v1437_v62, %v4960_v60  ;;  %v4963_v57 = vpop.permute.xlu0 %4962  ;;  %v4968_v24 = vpop.permute.xlu1 %4967  ;;  %v7915_v9 = vld [vmem:[#allocation27_spill] sm:$0xff]  ;;  %v7916_v8 = vld [vmem:[#allocation26_spill] sm:$0xff] }
 0x1bc   :  { %v1468_v22 = vsel %vm1265_vm4, %v1452_v42, %v6128_v47  ;;  %v1469_v35 = vsel %vm1265_vm4, %v1453_v54, %v6122_v20  ;;  %2315 = vmatprep.mubr.bf16.mxu0 %v6651_v17  ;;  %2428 = vmatprep.mubr.bf16.mxu1 %v6651_v17  ;;  %v4965_v34 = vunpack.i.h.bf16 %v4963_v57  ;;  %v4964_v56 = vunpack.i.l.bf16 %v4963_v57  ;;  %v7912_v20 = vld [vmem:[#allocation23_spill] sm:$0xff] }
 0x1bd   :  { %v1542_v30 = vmax.f32 %v1276_v18, %v1468_v22  ;;  %v1544_v23 = vmax.f32 %v1277_v25, %v1469_v35  ;;  %v4970_v5 = vunpack.i.h.bf16 %v4968_v24  ;;  %v4969_v48 = vunpack.i.l.bf16 %v4968_v24 }
 0x1be   :  { %v1295_v47 = vsel %vm1231_vm2, %v7912_v20, %v4965_v34  ;;  %v1294_v13 = vsel %vm1231_vm2, %v7913_v53, %v4964_v56 }
 0x1bf   :  { %v6665_v37 = vpack.c.bf16 %v1544_v23, %v1542_v30  ;;  %v4973_v29 = vpop.permute.xlu0 %4972  ;;  %v4978_v52 = vpop.permute.xlu1 %4977  ;;  %v1487_v0 = vsel %vm1231_vm2, %v4965_v34, %v4970_v5  ;;  %v1486_v28 = vsel %vm1231_vm2, %v4964_v56, %v4969_v48  ;;  %v7917_v30 = vld [vmem:[#allocation25_spill] sm:$0xff] }
 0x1c0   :  { %v4975_v49 = vunpack.i.h.bf16 %v4973_v29  ;;  %v4974_v1 = vunpack.i.l.bf16 %v4973_v29  ;;  %v4980_v63 = vunpack.i.h.bf16 %v4978_v52  ;;  %v4979_v19 = vunpack.i.l.bf16 %v4978_v52 }
 0x1c1   :  { %2316 = vmatmul.mubr.bf16.gmra.mxu0 %v6665_v37  ;;  %2429 = vmatmul.mubr.bf16.gmra.mxu1 %v6665_v37 }
 0x1c2   :  { %v1245_v11 = vsel %vm1231_vm2, %v7914_v26, %v4975_v49  ;;  %v1244_v23 = vsel %vm1231_vm2, %v7917_v30, %v4974_v1  ;;  %v1439_v34 = vsel %vm1231_vm2, %v4975_v49, %v4980_v63  ;;  %v1438_v48 = vsel %vm1231_vm2, %v4974_v1, %v4979_v19 }
 0x1c3   :  { %v4988_v3 = vpop.permute.xlu0 %4987  ;;  %v4983_v15 = vpop.permute.xlu1 %4982 }
 0x1c4   :  { %v4990_v2 = vunpack.i.h.bf16 %v4988_v3  ;;  %v4989_v40 = vunpack.i.l.bf16 %v4988_v3  ;;  %v4985_v32 = vunpack.i.h.bf16 %v4983_v15  ;;  %v4984_v6 = vunpack.i.l.bf16 %v4983_v15 }
 0x1c6   :  { %v1502_v51 = vsel %vm1248_vm3, %v1486_v28, %v4989_v40  ;;  %v1503_v36 = vsel %vm1248_vm3, %v1487_v0, %v4990_v2  ;;  %v1311_v62 = vsel %vm1248_vm3, %v1295_v47, %v4985_v32  ;;  %v1310_v60 = vsel %vm1248_vm3, %v1294_v13, %v4984_v6 }
 0x1c7   :  { %v1518_v43 = vsel %vm1265_vm4, %v1502_v51, %v7915_v9  ;;  %v1519_v45 = vsel %vm1265_vm4, %v1503_v36, %v7916_v8  ;;  %v1327_v25 = vsel %vm1265_vm4, %v1311_v62, %v4990_v2  ;;  %v1326_v18 = vsel %vm1265_vm4, %v1310_v60, %v4989_v40  ;;  %v4993_v42 = vpop.permute.xlu0 %4992  ;;  %v4998_v54 = vpop.permute.xlu1 %4997 }
 0x1c8   :  { %v1547_v57 = vmax.f32 %v1326_v18, %v1518_v43  ;;  %v1549_v24 = vmax.f32 %v1327_v25, %v1519_v45  ;;  %v4995_v22 = vunpack.i.h.bf16 %v4993_v42  ;;  %v4994_v35 = vunpack.i.l.bf16 %v4993_v42 }
 0x1c9   :  { %v5000_v56 = vunpack.i.h.bf16 %v4998_v54  ;;  %v4999_v5 = vunpack.i.l.bf16 %v4998_v54 }
 0x1ca   :  { %v6691_v29 = vpack.c.bf16 %v1549_v24, %v1547_v57  ;;  %v1261_v52 = vsel %vm1248_vm3, %v1244_v23, %v4994_v35  ;;  %v1262_v20 = vsel %vm1248_vm3, %v1245_v11, %v4995_v22 }
 0x1cb   :  { %v1279_v47 = vsel %vm1265_vm4, %v1262_v20, %v5000_v56  ;;  %v1278_v53 = vsel %vm1265_vm4, %v1261_v52, %v4999_v5  ;;  %v1454_v13 = vsel %vm1248_vm3, %v1438_v48, %v4999_v5  ;;  %v1455_v0 = vsel %vm1248_vm3, %v1439_v34, %v5000_v56  ;;  %v5003_v28 = vpop.permute.xlu0 %5002  ;;  %v5008_v49 = vpop.permute.xlu1 %5007 }
 0x1cc   :  { %v1470_v3 = vsel %vm1265_vm4, %v1454_v13, %v6182_v4  ;;  %v1471_v15 = vsel %vm1265_vm4, %v1455_v0, %v6178_v50  ;;  %2325 = vmatprep.mubr.bf16.mxu0 %v6691_v29  ;;  %2438 = vmatprep.mubr.bf16.mxu1 %v6691_v29  ;;  %v5005_v32 = vunpack.i.h.bf16 %v5003_v28  ;;  %v5004_v26 = vunpack.i.l.bf16 %v5003_v28 }
 0x1cd   :  { %v1546_v2 = vmax.f32 %v1278_v53, %v1470_v3  ;;  %v1548_v40 = vmax.f32 %v1279_v47, %v1471_v15  ;;  %v5010_v11 = vunpack.i.h.bf16 %v5008_v49  ;;  %v5009_v1 = vunpack.i.l.bf16 %v5008_v49 }
 0x1ce   :  { %v1297_v50 = vsel %vm1231_vm2, %v6198_v21, %v5005_v32  ;;  %v1296_v4 = vsel %vm1231_vm2, %v6196_v38, %v5004_v26 }
 0x1cf   :  { %v6705_v6 = vpack.c.bf16 %v1548_v40, %v1546_v2  ;;  %v5013_v63 = vpop.permute.xlu0 %5012  ;;  %v5018_v19 = vpop.permute.xlu1 %5017  ;;  %v1489_v62 = vsel %vm1231_vm2, %v5005_v32, %v5010_v11  ;;  %v1488_v60 = vsel %vm1231_vm2, %v5004_v26, %v5009_v1  ;;  %v7918_v1 = vmov 0  }
 0x1d0   :  { %v5015_v51 = vunpack.i.h.bf16 %v5013_v63  ;;  %v5014_v36 = vunpack.i.l.bf16 %v5013_v63  ;;  %v5020_v21 = vunpack.i.h.bf16 %v5018_v19  ;;  %v5019_v57 = vunpack.i.l.bf16 %v5018_v19 }
 0x1d1   :  { %2326 = vmatmul.mubr.bf16.gmra.mxu0 %v6705_v6  ;;  %2439 = vmatmul.mubr.bf16.gmra.mxu1 %v6705_v6  ;;  %v6745_v63 = vcombine.high %v7918_v1, %v7918_v1 }
 0x1d2   :  { %v1247_v42 = vsel %vm1231_vm2, %v6205_v12, %v5015_v51  ;;  %v1246_v54 = vsel %vm1231_vm2, %v6211_v33, %v5014_v36  ;;  %v1441_v47 = vsel %vm1231_vm2, %v5015_v51, %v5020_v21  ;;  %v1440_v53 = vsel %vm1231_vm2, %v5014_v36, %v5019_v57  ;;  %v5274_v51 = vld [vmem:[%s7833_s3 + $0x4e8] ss:$16 sps:$4 sm:$0xff]   ;;  %v5279_v36 = vld [vmem:[%s7833_s3 + $0x4c4] ss:$16 sps:$4 sm:$0xff]  }
 0x1d3   :  { %v5028_v9 = vpop.permute.xlu0 %5027  ;;  %v5023_v43 = vpop.permute.xlu1 %5022  ;;  %v5298_v21 = vld [vmem:[%s7833_s3 + $0x468] ss:$16 sps:$4 sm:$0xff]   ;;  %v5303_v57 = vld [vmem:[%s7833_s3 + $0x444] ss:$16 sps:$4 sm:$0xff]  }
 0x1d4   :  { %v5030_v8 = vunpack.i.h.bf16 %v5028_v9  ;;  %v5029_v45 = vunpack.i.l.bf16 %v5028_v9  ;;  %v5025_v25 = vunpack.i.h.bf16 %v5023_v43  ;;  %v5024_v18 = vunpack.i.l.bf16 %v5023_v43  ;;  %v5288_v9 = vld [vmem:[%s7833_s3 + $0x4ac] ss:$16 sps:$4 sm:$0xff]   ;;  %v5286_v43 = vld [vmem:[%s7833_s3 + $0x4a8] ss:$16 sps:$4 sm:$0xff]  }
 0x1d6   :  { %v1504_v38 = vsel %vm1248_vm3, %v1488_v60, %v5029_v45  ;;  %v1505_v24 = vsel %vm1248_vm3, %v1489_v62, %v5030_v8  ;;  %v1313_v22 = vsel %vm1248_vm3, %v1297_v50, %v5025_v25  ;;  %v1312_v35 = vsel %vm1248_vm3, %v1296_v4, %v5024_v18  ;;  %v5282_v50 = vld [vmem:[%s7833_s3 + $0x4cc] ss:$16 sps:$4 sm:$0xff]   ;;  %v5277_v4 = vld [vmem:[%s7833_s3 + $0x4c0] ss:$16 sps:$4 sm:$0xff]   ;;  %v5280_v62 = vld [vmem:[%s7833_s3 + $0x4c8] ss:$16 sps:$4 sm:$0xff]  }
 0x1d7   :  { %v1520_v30 = vsel %vm1265_vm4, %v1504_v38, %v6221_v55  ;;  %v1521_v23 = vsel %vm1265_vm4, %v1505_v24, %v6217_v59  ;;  %v1329_v12 = vsel %vm1265_vm4, %v1313_v22, %v5030_v8  ;;  %v1328_v33 = vsel %vm1265_vm4, %v1312_v35, %v5029_v45  ;;  %v5033_v34 = vpop.permute.xlu0 %5032  ;;  %v5038_v56 = vpop.permute.xlu1 %5037  ;;  %v5285_v60 = vld [vmem:[%s7833_s3 + $0x4a4] ss:$16 sps:$4 sm:$0xff]   ;;  %v5294_v45 = vld [vmem:[%s7833_s3 + $0x48c] ss:$16 sps:$4 sm:$0xff]   ;;  %v5289_v25 = vld [vmem:[%s7833_s3 + $0x480] ss:$16 sps:$4 sm:$0xff]  }
 0x1d8   :  { %v5035_v5 = vunpack.i.h.bf16 %v5033_v34  ;;  %v5034_v48 = vunpack.i.l.bf16 %v5033_v34  ;;  %v5040_v52 = vunpack.i.h.bf16 %v5038_v56  ;;  %v5039_v20 = vunpack.i.l.bf16 %v5038_v56  ;;  %v5291_v8 = vld [vmem:[%s7833_s3 + $0x484] ss:$16 sps:$4 sm:$0xff]   ;;  %v5292_v18 = vld [vmem:[%s7833_s3 + $0x488] ss:$16 sps:$4 sm:$0xff]   ;;  %v5306_v38 = vld [vmem:[%s7833_s3 + $0x44c] ss:$16 sps:$4 sm:$0xff]  }
 0x1d9   :  { %v1551_v13 = vmax.f32 %v1328_v33, %v1520_v30  ;;  %v1553_v0 = vmax.f32 %v1329_v12, %v1521_v23  ;;  %v5301_v24 = vld [vmem:[%s7833_s3 + $0x440] ss:$16 sps:$4 sm:$0xff]   ;;  %v5304_v22 = vld [vmem:[%s7833_s3 + $0x448] ss:$16 sps:$4 sm:$0xff]   ;;  %v5309_v35 = vld [vmem:[%s7833_s3 + $0x424] ss:$16 sps:$4 sm:$0xff]  }
 0x1da   :  { %v1263_v55 = vsel %vm1248_vm3, %v1246_v54, %v5034_v48  ;;  %v1264_v59 = vsel %vm1248_vm3, %v1247_v42, %v5035_v5  ;;  %v1456_v28 = vsel %vm1248_vm3, %v1440_v53, %v5039_v20  ;;  %v1457_v49 = vsel %vm1248_vm3, %v1441_v47, %v5040_v52  ;;  %v5297_v42 = vld [vmem:[%s7833_s3 + $0x464] ss:$16 sps:$4 sm:$0xff]   ;;  %v5295_v54 = vld [vmem:[%s7833_s3 + $0x460] ss:$16 sps:$4 sm:$0xff]   ;;  %v5312_v30 = vld [vmem:[%s7833_s3 + $0x42c] ss:$16 sps:$4 sm:$0xff]  }
 0x1db   :  { %v1281_v3 = vsel %vm1265_vm4, %v1264_v59, %v5040_v52  ;;  %v1280_v15 = vsel %vm1265_vm4, %v1263_v55, %v5039_v20  ;;  %v1472_v2 = vsel %vm1265_vm4, %v1456_v28, %v6229_v31  ;;  %v1473_v40 = vsel %vm1265_vm4, %v1457_v49, %v6225_v10  ;;  %v5271_v31 = vld [vmem:[%s7833_s3 + $0x4e0] ss:$16 sps:$4 sm:$0xff]   ;;  %v5310_v12 = vld [vmem:[%s7833_s3 + $0x428] ss:$16 sps:$4 sm:$0xff]   ;;  %v5315_v33 = vld [vmem:[%s7833_s3 + $0x404] ss:$16 sps:$4 sm:$0xff]  }
 0x1dc   :  { %v1550_v32 = vmax.f32 %v1280_v15, %v1472_v2  ;;  %v1552_v26 = vmax.f32 %v1281_v3, %v1473_v40  ;;  %v6741_v11 = vpack.c.bf16 %v1553_v0, %v1551_v13  ;;  %v6757_v10 = vcombine.low %v7918_v1, %v7918_v1  ;;  %v5307_v23 = vld [vmem:[%s7833_s3 + $0x420] ss:$16 sps:$4 sm:$0xff]   ;;  %v5318_v34 = vld [vmem:[%s7833_s3 + $0x40c] ss:$16 sps:$4 sm:$0xff]   ;;  %v5316_v5 = vld [vmem:[%s7833_s3 + $0x408] ss:$16 sps:$4 sm:$0xff]  }
 0x1dd   :  { %v5313_v56 = vld [vmem:[%s7833_s3 + $0x400] ss:$16 sps:$4 sm:$0xff]   ;;  %v5321_v48 = vld [vmem:[%s7833_s3 + $0x5e4] ss:$16 sps:$4 sm:$0xff]   ;;  %v5324_v52 = vld [vmem:[%s7833_s3 + $0x5ec] ss:$16 sps:$4 sm:$0xff]  }
 0x1de   :  { %2335 = vmatprep.mubr.bf16.mxu0 %v6741_v11  ;;  %2448 = vmatprep.mubr.bf16.mxu1 %v6741_v11  ;;  %v6749_v19 = vpack.c.bf16 %v1552_v26, %v1550_v32  ;;  %v5319_v20 = vld [vmem:[%s7833_s3 + $0x5e0] ss:$16 sps:$4 sm:$0xff]   ;;  %v5322_v47 = vld [vmem:[%s7833_s3 + $0x5e8] ss:$16 sps:$4 sm:$0xff]   ;;  %v5327_v53 = vld [vmem:[%s7833_s3 + $0x5c4] ss:$16 sps:$4 sm:$0xff]  }
 0x1df   :  { %v5330_v13 = vld [vmem:[%s7833_s3 + $0x5cc] ss:$16 sps:$4 sm:$0xff]   ;;  %v5325_v0 = vld [vmem:[%s7833_s3 + $0x5c0] ss:$16 sps:$4 sm:$0xff]   ;;  %v5328_v55 = vld [vmem:[%s7833_s3 + $0x5c8] ss:$16 sps:$4 sm:$0xff]  }
 0x1e0   :  { %2336 = vmatmul.mubr.bf16.gmra.mxu0 %v6749_v19  ;;  %2449 = vmatmul.mubr.bf16.gmra.mxu1 %v6749_v19  ;;  %v5333_v59 = vld [vmem:[%s7833_s3 + $0x5a4] ss:$16 sps:$4 sm:$0xff]   ;;  %v5336_v28 = vld [vmem:[%s7833_s3 + $0x5ac] ss:$16 sps:$4 sm:$0xff]   ;;  %v5331_v49 = vld [vmem:[%s7833_s3 + $0x5a0] ss:$16 sps:$4 sm:$0xff]  }
 0x1e1   :  { %2891 = vmatprep.mubr.bf16.mxu0 %v6745_v63  ;;  %3004 = vmatprep.mubr.bf16.mxu1 %v6745_v63  ;;  %v5334_v3 = vld [vmem:[%s7833_s3 + $0x5a8] ss:$16 sps:$4 sm:$0xff]   ;;  %v5339_v15 = vld [vmem:[%s7833_s3 + $0x584] ss:$16 sps:$4 sm:$0xff]   ;;  %v5342_v2 = vld [vmem:[%s7833_s3 + $0x58c] ss:$16 sps:$4 sm:$0xff]  }
 0x1e2   :  { %v5337_v40 = vld [vmem:[%s7833_s3 + $0x580] ss:$16 sps:$4 sm:$0xff]   ;;  %v5340_v32 = vld [vmem:[%s7833_s3 + $0x588] ss:$16 sps:$4 sm:$0xff]   ;;  %v5345_v26 = vld [vmem:[%s7833_s3 + $0x564] ss:$16 sps:$4 sm:$0xff]  }
 0x1e3   :  { %v5348_v1 = vld [vmem:[%s7833_s3 + $0x56c] ss:$16 sps:$4 sm:$0xff]  }
 0x1e8   :  { %2892 = vmatmul.mubr.bf16.vlgmr.msra.gmra.mxu0 %v6757_v10  ;;  %3005 = vmatmul.mubr.bf16.vlgmr.msra.gmra.mxu1 %v6757_v10 }
 0x1e9   :  { %3568 = vmatpush1.bf16.msra.mxu0 %v5271_v31  ;;  %2901 = vmatprep.mubr.bf16.mxu0 %v6269_v14  ;;  %v5343_v31 = vld [vmem:[%s7833_s3 + $0x560] ss:$16 sps:$4 sm:$0xff]  }
 0x1ea   :  { %3014 = vmatprep.mubr.bf16.mxu1 %v6269_v14  ;;  %3681 = vmatpush1.bf16.msra.mxu1 %v5274_v51  ;;  %v5283_v14 = vld [vmem:[%s7833_s3 + $0x4a0] ss:$16 sps:$4 sm:$0xff]   ;;  %v5346_v51 = vld [vmem:[%s7833_s3 + $0x568] ss:$16 sps:$4 sm:$0xff]  }
 0x1eb   :  { %3569 = vmatprep.subr.bf16.mxu0 %v5279_v36  ;;  %3682 = vmatprep.subr.bf16.mxu1 %v5282_v50  ;;  %v5351_v36 = vld [vmem:[%s7833_s3 + $0x544] ss:$16 sps:$4 sm:$0xff]   ;;  %v5354_v50 = vld [vmem:[%s7833_s3 + $0x54c] ss:$16 sps:$4 sm:$0xff]  }
 0x1ed   :  { %3570 = vmatpush1.bf16.msra.mxu0 %v5277_v4  ;;  %v5349_v4 = vld [vmem:[%s7833_s3 + $0x540] ss:$16 sps:$4 sm:$0xff]  }
 0x1ee   :  { %3683 = vmatpush1.bf16.msra.mxu1 %v5280_v62  ;;  %3571 = vmatprep.subr.bf16.mxu0 %v5285_v60  ;;  %v5352_v62 = vld [vmem:[%s7833_s3 + $0x548] ss:$16 sps:$4 sm:$0xff]   ;;  %v5357_v60 = vld [vmem:[%s7833_s3 + $0x524] ss:$16 sps:$4 sm:$0xff]  }
 0x1ef   :  { %3684 = vmatprep.subr.bf16.mxu1 %v5288_v9  ;;  %v5360_v9 = vld [vmem:[%s7833_s3 + $0x52c] ss:$16 sps:$4 sm:$0xff]  }
 0x1f0   :  { %2902 = vmatmul.mubr.bf16.gmra.mxu0 %v6277_v39  ;;  %3015 = vmatmul.mubr.bf16.gmra.mxu1 %v6277_v39  ;;  %v5300_v39 = vld [vmem:[%s7833_s3 + $0x46c] ss:$16 sps:$4 sm:$0xff]  }
 0x1f1   :  { %3572 = vmatpush1.bf16.msra.mxu0 %v5283_v14  ;;  %2911 = vmatprep.mubr.bf16.mxu0 %v6341_v44  ;;  %v5355_v14 = vld [vmem:[%s7833_s3 + $0x520] ss:$16 sps:$4 sm:$0xff]  }
 0x1f2   :  { %3024 = vmatprep.mubr.bf16.mxu1 %v6341_v44  ;;  %3685 = vmatpush1.bf16.msra.mxu1 %v5286_v43  ;;  %v5358_v43 = vld [vmem:[%s7833_s3 + $0x528] ss:$16 sps:$4 sm:$0xff]  }
 0x1f3   :  { %3573 = vmatprep.subr.bf16.mxu0 %v5291_v8  ;;  %3686 = vmatprep.subr.bf16.mxu1 %v5294_v45  ;;  %v5363_v8 = vld [vmem:[%s7833_s3 + $0x504] ss:$16 sps:$4 sm:$0xff]   ;;  %v5366_v45 = vld [vmem:[%s7833_s3 + $0x50c] ss:$16 sps:$4 sm:$0xff]  }
 0x1f5   :  { %3574 = vmatpush1.bf16.msra.mxu0 %v5289_v25  ;;  %v5361_v25 = vld [vmem:[%s7833_s3 + $0x500] ss:$16 sps:$4 sm:$0xff]  }
 0x1f6   :  { %3687 = vmatpush1.bf16.msra.mxu1 %v5292_v18  ;;  %3575 = vmatprep.subr.bf16.mxu0 %v5297_v42  ;;  %v5364_v18 = vld [vmem:[%s7833_s3 + $0x508] ss:$16 sps:$4 sm:$0xff]  }
 0x1f7   :  { %3688 = vmatprep.subr.bf16.mxu1 %v5300_v39 }
 0x1f8   :  { %2912 = vmatmul.mubr.bf16.gmra.mxu0 %v6364_v61  ;;  %3025 = vmatmul.mubr.bf16.gmra.mxu1 %v6364_v61 }
 0x1f9   :  { %3576 = vmatpush1.bf16.msra.mxu0 %v5295_v54  ;;  %2921 = vmatprep.mubr.bf16.mxu0 %v6423_v58 }
 0x1fa   :  { %3034 = vmatprep.mubr.bf16.mxu1 %v6423_v58  ;;  %3689 = vmatpush1.bf16.msra.mxu1 %v5298_v21 }
 0x1fb   :  { %3577 = vmatprep.subr.bf16.mxu0 %v5303_v57  ;;  %3690 = vmatprep.subr.bf16.mxu1 %v5306_v38 }
 0x1fd   :  { %3578 = vmatpush1.bf16.msra.mxu0 %v5301_v24 }
 0x1fe   :  { %3691 = vmatpush1.bf16.msra.mxu1 %v5304_v22  ;;  %3579 = vmatprep.subr.bf16.mxu0 %v5309_v35 }
 0x1ff   :  { %3692 = vmatprep.subr.bf16.mxu1 %v5312_v30 }
 0x200   :  { %2922 = vmatmul.mubr.bf16.gmra.mxu0 %v6452_v46  ;;  %3035 = vmatmul.mubr.bf16.gmra.mxu1 %v6452_v46 }
 0x201   :  { %3580 = vmatpush1.bf16.msra.mxu0 %v5307_v23  ;;  %2931 = vmatprep.mubr.bf16.mxu0 %v6511_v16 }
 0x202   :  { %3044 = vmatprep.mubr.bf16.mxu1 %v6511_v16  ;;  %3693 = vmatpush1.bf16.msra.mxu1 %v5310_v12 }
 0x203   :  { %3581 = vmatprep.subr.bf16.mxu0 %v5315_v33  ;;  %3694 = vmatprep.subr.bf16.mxu1 %v5318_v34 }
 0x205   :  { %3582 = vmatpush1.bf16.msra.mxu0 %v5313_v56 }
 0x206   :  { %3695 = vmatpush1.bf16.msra.mxu1 %v5316_v5  ;;  %3583 = vmatprep.subr.bf16.mxu0 %v5321_v48 }
 0x207   :  { %3696 = vmatprep.subr.bf16.mxu1 %v5324_v52 }
 0x208   :  { %2932 = vmatmul.mubr.bf16.gmra.mxu0 %v6540_v41  ;;  %3045 = vmatmul.mubr.bf16.gmra.mxu1 %v6540_v41 }
 0x209   :  { %3584 = vmatpush2.bf16.msra.mxu0 %v5319_v20  ;;  %2941 = vmatprep.mubr.bf16.mxu0 %v6599_v7 }
 0x20a   :  { %3054 = vmatprep.mubr.bf16.mxu1 %v6599_v7  ;;  %3697 = vmatpush2.bf16.msra.mxu1 %v5322_v47 }
 0x20b   :  { %3585 = vmatprep.subr.bf16.mxu0 %v5327_v53  ;;  %3698 = vmatprep.subr.bf16.mxu1 %v5330_v13 }
 0x20d   :  { %3586 = vmatpush2.bf16.msra.mxu0 %v5325_v0 }
 0x20e   :  { %3699 = vmatpush2.bf16.msra.mxu1 %v5328_v55  ;;  %3587 = vmatprep.subr.bf16.mxu0 %v5333_v59 }
 0x20f   :  { %3700 = vmatprep.subr.bf16.mxu1 %v5336_v28 }
 0x210   :  { %2942 = vmatmul.mubr.bf16.gmra.mxu0 %v6625_v27  ;;  %3055 = vmatmul.mubr.bf16.gmra.mxu1 %v6625_v27 }
 0x211   :  { %3588 = vmatpush2.bf16.msra.mxu0 %v5331_v49  ;;  %2951 = vmatprep.mubr.bf16.mxu0 %v6651_v17 }
 0x212   :  { %3064 = vmatprep.mubr.bf16.mxu1 %v6651_v17  ;;  %3701 = vmatpush2.bf16.msra.mxu1 %v5334_v3 }
 0x213   :  { %3589 = vmatprep.subr.bf16.mxu0 %v5339_v15  ;;  %3702 = vmatprep.subr.bf16.mxu1 %v5342_v2 }
 0x215   :  { %3590 = vmatpush2.bf16.msra.mxu0 %v5337_v40 }
 0x216   :  { %3703 = vmatpush2.bf16.msra.mxu1 %v5340_v32  ;;  %3591 = vmatprep.subr.bf16.mxu0 %v5345_v26 }
 0x217   :  { %3704 = vmatprep.subr.bf16.mxu1 %v5348_v1 }
 0x218   :  { %2952 = vmatmul.mubr.bf16.gmra.mxu0 %v6665_v37  ;;  %3065 = vmatmul.mubr.bf16.gmra.mxu1 %v6665_v37 }
 0x219   :  { %3592 = vmatpush2.bf16.msra.mxu0 %v5343_v31  ;;  %2961 = vmatprep.mubr.bf16.mxu0 %v6691_v29 }
 0x21a   :  { %3074 = vmatprep.mubr.bf16.mxu1 %v6691_v29  ;;  %3705 = vmatpush2.bf16.msra.mxu1 %v5346_v51 }
 0x21b   :  { %3593 = vmatprep.subr.bf16.mxu0 %v5351_v36  ;;  %3706 = vmatprep.subr.bf16.mxu1 %v5354_v50 }
 0x21d   :  { %3594 = vmatpush2.bf16.msra.mxu0 %v5349_v4 }
 0x21e   :  { %3707 = vmatpush2.bf16.msra.mxu1 %v5352_v62  ;;  %3595 = vmatprep.subr.bf16.mxu0 %v5357_v60 }
 0x21f   :  { %3708 = vmatprep.subr.bf16.mxu1 %v5360_v9 }
 0x220   :  { %2962 = vmatmul.mubr.bf16.gmra.mxu0 %v6705_v6  ;;  %3075 = vmatmul.mubr.bf16.gmra.mxu1 %v6705_v6 }
 0x221   :  { %3596 = vmatpush2.bf16.msra.mxu0 %v5355_v14  ;;  %3599 = vmatprep.mubr.bf16.mxu0 %v6341_v44 }
 0x222   :  { %3709 = vmatpush2.bf16.msra.mxu1 %v5358_v43  ;;  %3712 = vmatprep.mubr.bf16.mxu1 %v6341_v44 }
 0x223   :  { %3597 = vmatprep.subr.bf16.mxu0 %v5363_v8  ;;  %3710 = vmatprep.subr.bf16.mxu1 %v5366_v45 }
 0x225   :  { %3598 = vmatpush2.bf16.msra.mxu0 %v5361_v25 }
 0x226   :  { %3711 = vmatpush2.bf16.msra.mxu1 %v5364_v18 }
 0x228   :  { %3600 = vmatmul.mubr.bf16.vlgmr.msra.gmra.mxu0 %v6364_v61 }
 0x229   :  { %3713 = vmatmul.mubr.bf16.vlgmr.msra.gmra.mxu1 %v6364_v61  ;;  %3609 = vmatprep.mubr.bf16.mxu0 %v6423_v58 }
 0x22a   :  { %3722 = vmatprep.mubr.bf16.mxu1 %v6423_v58 }
 0x230   :  { %3610 = vmatmul.mubr.bf16.gmra.mxu0 %v6452_v46  ;;  %v6989_v44 = vpop.f32.mrf.mxu0  ;;  %v6991_v61 = vpop.f32.mrf.mxu1 }
 0x231   :  { %3723 = vmatmul.mubr.bf16.gmra.mxu1 %v6452_v46  ;;  %3619 = vmatprep.mubr.bf16.mxu0 %v6511_v16 }
 0x232   :  { %3732 = vmatprep.mubr.bf16.mxu1 %v6511_v16  ;;  %v6996_v58 = vpop.f32.mrf.mxu0  ;;  %v6998_v46 = vpop.f32.mrf.mxu1 }
 0x234   :  { %v7001_v16 = vpop.f32.mrf.mxu0 }
 0x238   :  { %3620 = vmatmul.mubr.bf16.gmra.mxu0 %v6540_v41 }
 0x239   :  { %3733 = vmatmul.mubr.bf16.gmra.mxu1 %v6540_v41  ;;  %3629 = vmatprep.mubr.bf16.mxu0 %v6599_v7  ;;  %v7003_v41 = vpop.f32.mrf.mxu1 }
 0x23a   :  { %3742 = vmatprep.mubr.bf16.mxu1 %v6599_v7  ;;  %v7008_v7 = vpop.f32.mrf.mxu0 }
 0x240   :  { %3630 = vmatmul.mubr.bf16.gmra.mxu0 %v6625_v27 }
 0x241   :  { %3743 = vmatmul.mubr.bf16.gmra.mxu1 %v6625_v27  ;;  %3639 = vmatprep.mubr.bf16.mxu0 %v6651_v17  ;;  %v7010_v27 = vpop.f32.mrf.mxu1  ;;  %v7013_v42 = vpop.f32.mrf.mxu0 }
 0x242   :  { %3752 = vmatprep.mubr.bf16.mxu1 %v6651_v17 }
 0x243   :  { %v7015_v39 = vpop.f32.mrf.mxu1  ;;  %v7017_v17 = vpop.f32.mrf.mxu0 }
 0x245   :  { %v7019_v54 = vpop.f32.mrf.mxu1 }
 0x247   :  { %v7027_v21 = vpop.f32.mrf.mxu1 }
 0x248   :  { %3640 = vmatmul.mubr.bf16.gmra.mxu0 %v6665_v37 }
 0x249   :  { %3753 = vmatmul.mubr.bf16.gmra.mxu1 %v6665_v37  ;;  %3649 = vmatprep.mubr.bf16.mxu0 %v6691_v29  ;;  %v7025_v37 = vpop.f32.mrf.mxu0  ;;  %v7031_v57 = vpop.f32.mrf.mxu1 }
 0x24a   :  { %3762 = vmatprep.mubr.bf16.mxu1 %v6691_v29 }
 0x24b   :  { %v7029_v29 = vpop.f32.mrf.mxu0 }
 0x250   :  { %3650 = vmatmul.mubr.bf16.gmra.mxu0 %v6705_v6 }
 0x251   :  { %3763 = vmatmul.mubr.bf16.gmra.mxu1 %v6705_v6  ;;  %3659 = vmatprep.mubr.bf16.mxu0 %v6741_v11  ;;  %v7036_v38 = vpop.f32.mrf.mxu0  ;;  %v7038_v6 = vpop.f32.mrf.mxu1 }
 0x252   :  { %3772 = vmatprep.mubr.bf16.mxu1 %v6741_v11 }
 0x253   :  { %v7041_v11 = vpop.f32.mrf.mxu0  ;;  %v7043_v24 = vpop.f32.mrf.mxu1 }
 0x255   :  { %v7047_v22 = vpop.f32.mrf.mxu0  ;;  %v7049_v35 = vpop.f32.mrf.mxu1 }
 0x257   :  { %v7053_v30 = vpop.f32.mrf.mxu1 }
 0x258   :  { %3660 = vmatmul.mubr.bf16.gmra.mxu0 %v6749_v19  ;;  %7919 = vst [vmem:[#allocation5_spill] sm:$0xff] %v7053_v30 }
 0x259   :  { %3773 = vmatmul.mubr.bf16.gmra.mxu1 %v6749_v19  ;;  %3669 = vmatprep.mubr.bf16.mxu0 %v6745_v63  ;;  %v7051_v19 = vpop.f32.mrf.mxu0 }
 0x25a   :  { %3782 = vmatprep.mubr.bf16.mxu1 %v6745_v63 }
 0x260   :  { %3670 = vmatmul.mubr.bf16.gmra.mxu0 %v6757_v10 }
 0x261   :  { %3783 = vmatmul.mubr.bf16.gmra.mxu1 %v6757_v10  ;;  %v7055_v23 = vpop.f32.mrf.mxu0  ;;  %v7057_v12 = vpop.f32.mrf.mxu1 }
 0x262   :  { %7920 = vst [vmem:[#allocation4_spill] sm:$0xff] %v7055_v23  ;;  %7921 = vst [vmem:[#allocation7_spill] sm:$0xff] %v7057_v12 }
 0x263   :  { %v7059_v63 = vpop.f32.mrf.mxu0  ;;  %v7061_v33 = vpop.f32.mrf.mxu1 }
 0x264   :  { %7922 = vst [vmem:[#allocation6_spill] sm:$0xff] %v7059_v63  ;;  %7923 = vst [vmem:[#allocation9_spill] sm:$0xff] %v7061_v33 }
 0x265   :  { %v7063_v34 = vpop.f32.mrf.mxu0  ;;  %v7065_v56 = vpop.f32.mrf.mxu1 }
 0x266   :  { %7924 = vst [vmem:[#allocation8_spill] sm:$0xff] %v7063_v34  ;;  %7925 = vst [vmem:[#allocation10_spill] sm:$0xff] %v7065_v56 }
 0x267   :  { %v7067_v10 = vpop.f32.mrf.mxu0  ;;  %v7069_v5 = vpop.f32.mrf.mxu1 }
 0x268   :  { %7926 = vst [vmem:[#allocation13_spill] sm:$0xff] %v7067_v10  ;;  %7927 = vst [vmem:[#allocation12_spill] sm:$0xff] %v7069_v5 }
 0x271   :  { %v7071_v48 = vpop.f32.mrf.mxu0  ;;  %v7073_v52 = vpop.f32.mrf.mxu1 }
 0x272   :  { %7928 = vst [vmem:[#allocation11_spill] sm:$0xff] %v7071_v48  ;;  %7929 = vst [vmem:[#allocation15_spill] sm:$0xff] %v7073_v52 }
 0x273   :  { %v7075_v20 = vpop.f32.mrf.mxu0  ;;  %v7077_v47 = vpop.f32.mrf.mxu1 }
 0x274   :  { %7930 = vst [vmem:[#allocation14_spill] sm:$0xff] %v7075_v20  ;;  %7931 = vst [vmem:[#allocation17_spill] sm:$0xff] %v7077_v47 }
 0x275   :  { %v7079_v53 = vpop.f32.mrf.mxu0  ;;  %v7081_v13 = vpop.f32.mrf.mxu1 }
 0x276   :  { %7932 = vst [vmem:[#allocation16_spill] sm:$0xff] %v7079_v53  ;;  %7933 = vst [vmem:[#allocation18_spill] sm:$0xff] %v7081_v13 }
 0x277   :  { %v7083_v0 = vpop.f32.mrf.mxu0  ;;  %v7085_v55 = vpop.f32.mrf.mxu1 }
 0x278   :  { %7934 = vst [vmem:[#allocation21_spill] sm:$0xff] %v7083_v0  ;;  %7935 = vst [vmem:[#allocation20_spill] sm:$0xff] %v7085_v55 }
 0x281   :  { %v7087_v59 = vpop.f32.mrf.mxu0  ;;  %v7089_v28 = vpop.f32.mrf.mxu1 }
 0x282   :  { %7936 = vst [vmem:[#allocation19_spill] sm:$0xff] %v7087_v59  ;;  %7937 = vst [vmem:[#allocation23_spill] sm:$0xff] %v7089_v28 }
 0x283   :  { %v7091_v49 = vpop.f32.mrf.mxu0  ;;  %v7093_v3 = vpop.f32.mrf.mxu1 }
 0x284   :  { %7938 = vst [vmem:[#allocation22_spill] sm:$0xff] %v7091_v49  ;;  %7939 = vst [vmem:[#allocation24_spill] sm:$0xff] %v7093_v3 }
 0x285   :  { %v7095_v15 = vpop.f32.mrf.mxu0  ;;  %v7097_v2 = vpop.f32.mrf.mxu1 }
 0x286   :  { %7940 = vst [vmem:[#allocation27_spill] sm:$0xff] %v7095_v15  ;;  %7941 = vst [vmem:[#allocation26_spill] sm:$0xff] %v7097_v2 }
 0x287   :  { %v7099_v40 = vpop.f32.mrf.mxu0  ;;  %v7101_v32 = vpop.f32.mrf.mxu1 }
 0x288   :  { %7942 = vst [vmem:[#allocation25_spill] sm:$0xff] %v7099_v40  ;;  %7943 = vst [vmem:[#allocation28_spill] sm:$0xff] %v7101_v32 }
 0x291   :  { %v7103_v26 = vpop.f32.mrf.mxu0  ;;  %v7105_v1 = vpop.f32.mrf.mxu1 }
 0x292   :  { %7944 = vst [vmem:[#allocation29_spill] sm:$0xff] %v7103_v26  ;;  %7945 = vst [vmem:[#allocation30_spill] sm:$0xff] %v7105_v1 }
 0x293   :  { %v7107_v31 = vpop.f32.mrf.mxu0  ;;  %v7109_v51 = vpop.f32.mrf.mxu1 }
 0x294   :  { %7946 = vst [vmem:[#allocation31_spill] sm:$0xff] %v7107_v31  ;;  %7947 = vst [vmem:[#allocation32_spill] sm:$0xff] %v7109_v51 }
 0x295   :  { %v7111_v36 = vpop.f32.mrf.mxu0  ;;  %v7113_v50 = vpop.f32.mrf.mxu1 }
 0x296   :  { %7948 = vst [vmem:[#allocation33_spill] sm:$0xff] %v7111_v36  ;;  %7949 = vst [vmem:[#allocation34_spill] sm:$0xff] %v7113_v50 }
 0x297   :  { %v7115_v4 = vpop.f32.mrf.mxu0  ;;  %v7117_v62 = vpop.f32.mrf.mxu1 }
 0x2a0   :  { %v7119_v60 = vpop.f32.mrf.mxu0  ;;  %v7121_v9 = vpop.f32.mrf.mxu1 }
 0x2a1   :  { %7950 = vst [vmem:[#allocation35_spill] sm:$0xff] %v7119_v60 }
 0x2a2   :  { %v7123_v14 = vpop.f32.mrf.mxu0  ;;  %v7125_v43 = vpop.f32.mrf.mxu1 }
 0x2a4   :  { %v7127_v8 = vpop.f32.mrf.mxu0  ;;  %v7129_v45 = vpop.f32.mrf.mxu1 }
 0x2a5   :  { %7951 = vst [vmem:[#allocation36_spill] sm:$0xff] %v7127_v8 }
 0x2a6   :  { %v7131_v25 = vpop.f32.mrf.mxu0  ;;  %v7133_v18 = vpop.f32.mrf.mxu1 }
 0x2a8   :  { %v7135_v50 = vpop.f32.mrf.mxu0  ;;  %v7137_v36 = vpop.f32.mrf.mxu1 }
 0x2aa   :  { %v7139_v51 = vpop.f32.mrf.mxu0  ;;  %v7141_v60 = vpop.f32.mrf.mxu1 }
 0x2ac   :  { %v7143_v31 = vpop.f32.mrf.mxu0  ;;  %v7145_v1 = vpop.f32.mrf.mxu1 }
 0x2ae   :  { %v7147_v26 = vpop.f32.mrf.mxu0  ;;  %v7149_v8 = vpop.f32.mrf.mxu1 }
 0x2b0   :  { %v7151_v32 = vpop.f32.mrf.mxu0  ;;  %v7153_v40 = vpop.f32.mrf.mxu1 }
 0x2b2   :  { %v7155_v2 = vpop.f32.mrf.mxu0  ;;  %v7157_v15 = vpop.f32.mrf.mxu1 }
 0x2b4   :  { %v7159_v3 = vpop.f32.mrf.mxu0  ;;  %v7161_v49 = vpop.f32.mrf.mxu1 }
 0x2b6   :  { %v7163_v28 = vpop.f32.mrf.mxu0  ;;  %v7165_v59 = vpop.f32.mrf.mxu1 }
 0x2b8   :  { %v7167_v55 = vpop.f32.mrf.mxu0  ;;  %v7169_v0 = vpop.f32.mrf.mxu1 }
 0x2ba   :  { %v7171_v13 = vpop.f32.mrf.mxu0  ;;  %v7173_v53 = vpop.f32.mrf.mxu1 }
 0x2bc   :  { %v7175_v47 = vpop.f32.mrf.mxu0  ;;  %v7177_v20 = vpop.f32.mrf.mxu1 }
 0x2be   :  { %v7179_v52 = vpop.f32.mrf.mxu0  ;;  %v7181_v48 = vpop.f32.mrf.mxu1 }
 0x2bf   :  { %7952 = vst [vmem:[#allocation37_spill] sm:$0xff] %v7179_v52  ;;  %7953 = vst [vmem:[#allocation38_spill] sm:$0xff] %v7181_v48 }
 0x2c0   :  { %v7183_v5 = vpop.f32.mrf.mxu0  ;;  %v7185_v10 = vpop.f32.mrf.mxu1 }
 0x2c1   :  { %7954 = vst [vmem:[#allocation39_spill] sm:$0xff] %v7183_v5  ;;  %7955 = vst [vmem:[#allocation40_spill] sm:$0xff] %v7185_v10 }
 0x2c2   :  { %v7187_v56 = vpop.f32.mrf.mxu0  ;;  %v7189_v34 = vpop.f32.mrf.mxu1 }
 0x2c3   :  { %7956 = vst [vmem:[#allocation41_spill] sm:$0xff] %v7187_v56  ;;  %7957 = vst [vmem:[#allocation42_spill] sm:$0xff] %v7189_v34 }
 0x2c4   :  { %v7191_v33 = vpop.f32.mrf.mxu0  ;;  %v7193_v63 = vpop.f32.mrf.mxu1 }
 0x2c5   :  { %7958 = vst [vmem:[#allocation43_spill] sm:$0xff] %v7191_v33  ;;  %7959 = vst [vmem:[#allocation44_spill] sm:$0xff] %v7193_v63 }
 0x2c6   :  { %v7195_v12 = vpop.f32.mrf.mxu0  ;;  %v7197_v23 = vpop.f32.mrf.mxu1 }
 0x2c7   :  { %7960 = vst [vmem:[#allocation45_spill] sm:$0xff] %v7195_v12  ;;  %7961 = vst [vmem:[#allocation46_spill] sm:$0xff] %v7197_v23 }
 0x2c8   :  { %v7199_v30 = vpop.f32.mrf.mxu0  ;;  %v7201_v52 = vpop.f32.mrf.mxu1 }
 0x2c9   :  { %7962 = vst [vmem:[#allocation47_spill] sm:$0xff] %v7199_v30  ;;  %7963 = vst [vmem:[#allocation48_spill] sm:$0xff] %v7201_v52 }
 0x2ca   :  { %v7203_v48 = vpop.f32.mrf.mxu0  ;;  %v7205_v5 = vpop.f32.mrf.mxu1 }
 0x2cb   :  { %7964 = vst [vmem:[#allocation49_spill] sm:$0xff] %v7203_v48  ;;  %7965 = vst [vmem:[#allocation50_spill] sm:$0xff] %v7205_v5 }
 0x2cc   :  { %v7207_v10 = vpop.f32.mrf.mxu0  ;;  %v7209_v56 = vpop.f32.mrf.mxu1 }
 0x2cd   :  { %7966 = vst [vmem:[#allocation51_spill] sm:$0xff] %v7207_v10  ;;  %7967 = vst [vmem:[#allocation52_spill] sm:$0xff] %v7209_v56 }
 0x2ce   :  { %v7211_v34 = vpop.f32.mrf.mxu0  ;;  %v7213_v33 = vpop.f32.mrf.mxu1 }
 0x2cf   :  { %7968 = vst [vmem:[#allocation53_spill] sm:$0xff] %v7211_v34  ;;  %7969 = vst [vmem:[#allocation54_spill] sm:$0xff] %v7213_v33 }
 0x2d0   :  { %v7215_v63 = vpop.f32.mrf.mxu0  ;;  %v7217_v12 = vpop.f32.mrf.mxu1 }
 0x2d1   :  { %7970 = vst [vmem:[#allocation55_spill] sm:$0xff] %v7215_v63  ;;  %7971 = vst [vmem:[#allocation56_spill] sm:$0xff] %v7217_v12 }
 0x2d2   :  { %v7219_v23 = vpop.f32.mrf.mxu0  ;;  %v7221_v30 = vpop.f32.mrf.mxu1 }
 0x2d3   :  { %7972 = vst [vmem:[#allocation57_spill] sm:$0xff] %v7219_v23  ;;  %7973 = vst [vmem:[#allocation58_spill] sm:$0xff] %v7221_v30 }
 0x2d4   :  { %v7223_v52 = vpop.f32.mrf.mxu0  ;;  %v7225_v48 = vpop.f32.mrf.mxu1 }
 0x2d5   :  { %7974 = vst [vmem:[#allocation59_spill] sm:$0xff] %v7223_v52  ;;  %7975 = vst [vmem:[#allocation60_spill] sm:$0xff] %v7225_v48 }
 0x2d6   :  { %v7227_v5 = vpop.f32.mrf.mxu0  ;;  %v7229_v10 = vpop.f32.mrf.mxu1 }
 0x2d7   :  { %7976 = vst [vmem:[#allocation61_spill] sm:$0xff] %v7227_v5  ;;  %7977 = vst [vmem:[#allocation62_spill] sm:$0xff] %v7229_v10 }
 0x2d8   :  { %v7231_v56 = vpop.f32.mrf.mxu0  ;;  %v7233_v34 = vpop.f32.mrf.mxu1 }
 0x2d9   :  { %7978 = vst [vmem:[#allocation63_spill] sm:$0xff] %v7231_v56  ;;  %7979 = vst [vmem:[#allocation64_spill] sm:$0xff] %v7233_v34 }
 0x2da   :  { %v7235_v33 = vpop.f32.mrf.mxu0  ;;  %v7237_v63 = vpop.f32.mrf.mxu1 }
 0x2db   :  { %7980 = vst [vmem:[#allocation65_spill] sm:$0xff] %v7235_v33  ;;  %7981 = vst [vmem:[#allocation66_spill] sm:$0xff] %v7237_v63  ;;  %v3857_v33 = vld [vmem:[%s7835_s4] sm:$0xf] }
 0x2dc   :  { %v7239_v12 = vpop.f32.mrf.mxu0  ;;  %v7241_v23 = vpop.f32.mrf.mxu1 }
 0x2dd   :  { %7982 = vst [vmem:[#allocation67_spill] sm:$0xff] %v7239_v12  ;;  %7983 = vst [vmem:[#allocation68_spill] sm:$0xff] %v7241_v23 }
 0x2de   :  { %v2959_v30 = vpop.f32.mrf.mxu0  ;;  %v3072_v52 = vpop.f32.mrf.mxu1 }
 0x2df   :  { %v7244_v48 = vadd.f32 %v2959_v30, %v7115_v4  ;;  %v7247_v5 = vadd.f32 %v3072_v52, %v7117_v62  ;;  %v7987_v52 = vld [vmem:[#allocation3_spill] sm:$0xff] }
 0x2e0   :  { %v7249_v10 = vpop.f32.mrf.mxu0  ;;  %v3076_v56 = vpop.f32.mrf.mxu1  ;;  %v7988_v4 = vsub.s32 0, %v7987_v52 }
 0x2e1   :  { %7984 = vst [vmem:[#allocation69_spill] sm:$0xff] %v7244_v48  ;;  %7985 = vst [vmem:[#allocation70_spill] sm:$0xff] %v7247_v5  ;;  %v7255_v63 = vadd.f32 %v3076_v56, %v7121_v9  ;;  %v7989_v5 = vsub.s32 2, %v7987_v52  ;;  %v2894_v56 = vadd.f32 %v7135_v50, %v6989_v44  ;;  %v3007_v9 = vadd.f32 %v7137_v36, %v6991_v61 }
 0x2e2   :  { %v2965_v12 = vpop.f32.mrf.mxu0  ;;  %v3078_v23 = vpop.f32.mrf.mxu1  ;;  %v7265_v62 = vrot.slane %v3857_v33, %v7988_v4  ;;  %v3009_v44 = vadd.f32 %v7141_v60, %v6998_v46  ;;  %v2898_v61 = vadd.f32 %v7143_v31, %v7001_v16  ;;  %v3011_v50 = vadd.f32 %v7145_v1, %v7003_v41 }
 0x2e3   :  { %7986 = vst [vmem:[#allocation71_spill] sm:$0xff] %v7255_v63  ;;  %v7258_v34 = vadd.f32 %v2965_v12, %v7123_v14  ;;  %v7261_v30 = vadd.f32 %v3078_v23, %v7125_v43  ;;  %v7269_v48 = vrot.slane %v3857_v33, %v7989_v5  ;;  %v7990_v23 = vsub.s32 1, %v7987_v52 }
 0x2e4   :  { %v7275_v63 = vpop.f32.mrf.mxu0  ;;  %v3080_v12 = vpop.f32.mrf.mxu1  ;;  %v7991_v43 = vsub.s32 3, %v7987_v52  ;;  %v2896_v5 = vadd.f32 %v7139_v51, %v6996_v58  ;;  %v2900_v52 = vadd.f32 %v7147_v26, %v7008_v7  ;;  %v2904_v58 = vadd.f32 %v7151_v32, %v7013_v42  ;;  %v8001_v32 = vld [vmem:[#allocation40_spill] sm:$0xff] }
 0x2e5   :  { %v7279_v14 = vrot.slane %v3857_v33, %v7990_v23  ;;  %v7292_v36 = vadd.f32 %v3080_v12, %v7129_v45  ;;  %v3017_v16 = vadd.f32 %v7153_v40, %v7015_v39  ;;  %v2906_v31 = vadd.f32 %v7155_v2, %v7017_v17  ;;  %v8000_v40 = vld [vmem:[#allocation7_spill] sm:$0xff]  ;;  %v8004_v45 = vld [vmem:[#allocation9_spill] sm:$0xff]  ;;  %v8008_v23 = vld [vmem:[#allocation10_spill] sm:$0xff] }
 0x2e6   :  { %v7283_v4 = vrot.slane %v3857_v33, %v7991_v43  ;;  %v3013_v33 = vadd.f32 %v7149_v8, %v7010_v27  ;;  %v2969_v51 = vpop.f32.mrf.mxu0  ;;  %v3082_v46 = vpop.f32.mrf.mxu1  ;;  %v7314_v7 = vadd.f32 %v7157_v15, %v7019_v54  ;;  %v7318_v27 = vadd.f32 %v7159_v3, %v7025_v37  ;;  %v7998_v15 = vld [vmem:[#allocation4_spill] sm:$0xff] }
 0x2e7   :  { %7992 = vst [vmem:[#allocation3_spill] sm:$0xff] %v7292_v36  ;;  %v7307_v60 = vadd.f32 %v2969_v51, %v7131_v25  ;;  %v7310_v41 = vadd.f32 %v3082_v46, %v7133_v18  ;;  %v7322_v42 = vadd.f32 %v7161_v49, %v7027_v21  ;;  %v7326_v39 = vadd.f32 %v7163_v28, %v7029_v29  ;;  %v7997_v28 = vld [vmem:[#allocation38_spill] sm:$0xff]  ;;  %v8009_v43 = vld [vmem:[#allocation44_spill] sm:$0xff] }
 0x2e8   :  { %v3601_v17 = vpop.f32.mrf.mxu0  ;;  %v7330_v2 = vadd.f32 %v7165_v59, %v7031_v57  ;;  %v7334_v54 = vadd.f32 %v7167_v55, %v7036_v38  ;;  %v7338_v37 = vadd.f32 %v7169_v0, %v7038_v6  ;;  %v7342_v21 = vadd.f32 %v7171_v13, %v7041_v11  ;;  %v7995_v0 = vld [vmem:[#allocation37_spill] sm:$0xff]  ;;  %v8005_v25 = vld [vmem:[#allocation42_spill] sm:$0xff] }
 0x2e9   :  { %7993 = vst [vmem:[#allocation72_spill] sm:$0xff] %v7307_v60  ;;  %7994 = vst [vmem:[#allocation73_spill] sm:$0xff] %v7310_v41  ;;  %v3714_v49 = vpop.f32.mrf.mxu1  ;;  %v7346_v29 = vadd.f32 %v7173_v53, %v7043_v24  ;;  %v7350_v57 = vadd.f32 %v7175_v47, %v7047_v22  ;;  %v3793_v59 = vadd.f32 %v3601_v17, %v2894_v56  ;;  %v7996_v13 = vld [vmem:[#allocation5_spill] sm:$0xff]  ;;  %v7999_v22 = vld [vmem:[#allocation39_spill] sm:$0xff] }
 0x2ea   :  { %v3795_v38 = vadd.f32 %v3714_v49, %v3007_v9  ;;  %v3603_v55 = vpop.f32.mrf.mxu0  ;;  %v7354_v6 = vadd.f32 %v7177_v20, %v7049_v35  ;;  %v7358_v11 = vadd.f32 %v7995_v0, %v7051_v19  ;;  %v7362_v3 = vadd.f32 %v7997_v28, %v7996_v13  ;;  %v8002_v35 = vld [vmem:[#allocation6_spill] sm:$0xff]  ;;  %v8003_v20 = vld [vmem:[#allocation41_spill] sm:$0xff]  ;;  %v8006_v56 = vld [vmem:[#allocation8_spill] sm:$0xff] }
 0x2eb   :  { %v3794_v24 = vadd.f32 %v3603_v55, %v2896_v5  ;;  %v3716_v53 = vpop.f32.mrf.mxu1  ;;  %v7366_v47 = vadd.f32 %v7999_v22, %v7998_v15  ;;  %v7370_v26 = vadd.f32 %v8001_v32, %v8000_v40  ;;  %v7374_v1 = vadd.f32 %v8003_v20, %v8002_v35  ;;  %v8007_v9 = vld [vmem:[#allocation43_spill] sm:$0xff]  ;;  %v8010_v17 = vld [vmem:[#allocation13_spill] sm:$0xff]  ;;  %v8013_v0 = vld [vmem:[#allocation46_spill] sm:$0xff] }
 0x2ec   :  { %v3796_v19 = vadd.f32 %v3716_v53, %v3009_v44  ;;  %v3605_v8 = vpop.f32.mrf.mxu0  ;;  %v7378_v18 = vadd.f32 %v8005_v25, %v8004_v45  ;;  %v7382_v12 = vadd.f32 %v8007_v9, %v8006_v56  ;;  %v7386_v5 = vadd.f32 %v8009_v43, %v8008_v23  ;;  %v8011_v49 = vld [vmem:[#allocation45_spill] sm:$0xff]  ;;  %v8012_v44 = vld [vmem:[#allocation12_spill] sm:$0xff]  ;;  %v8014_v22 = vld [vmem:[#allocation11_spill] sm:$0xff] }
 0x2ed   :  { %v3797_v51 = vadd.f32 %v3605_v8, %v2898_v61  ;;  %v3718_v46 = vpop.f32.mrf.mxu1  ;;  %v7390_v55 = vadd.f32 %v8011_v49, %v8010_v17  ;;  %v7394_v13 = vadd.f32 %v8013_v0, %v8012_v44  ;;  %v3879_v28 = vadd.f32 %v7265_v62, %v3793_v59  ;;  %v8015_v40 = vld [vmem:[#allocation47_spill] sm:$0xff]  ;;  %v8017_v61 = vld [vmem:[#allocation48_spill] sm:$0xff]  ;;  %v8018_v56 = vld [vmem:[#allocation14_spill] sm:$0xff] }
 0x2ee   :  { %v3881_v53 = vadd.f32 %v7269_v48, %v3795_v38  ;;  %v3607_v15 = vpop.f32.mrf.mxu0  ;;  %v7400_v32 = vadd.f32 %v8015_v40, %v8014_v22  ;;  %v8016_v35 = vld [vmem:[#allocation15_spill] sm:$0xff]  ;;  %v3880_v8 = vadd.f32 %v7279_v14, %v3794_v24  ;;  %v3882_v45 = vadd.f32 %v7283_v4, %v3796_v19  ;;  %v8019_v9 = vld [vmem:[#allocation49_spill] sm:$0xff]  ;;  %v8021_v38 = vld [vmem:[#allocation50_spill] sm:$0xff] }
 0x2ef   :  { %v7404_v20 = vadd.f32 %v8017_v61, %v8016_v35  ;;  %v3720_v25 = vpop.f32.mrf.mxu1  ;;  %v7410_v23 = vadd.f32 %v8019_v9, %v8018_v56  ;;  %v8020_v59 = vld [vmem:[#allocation17_spill] sm:$0xff]  ;;  %v3799_v17 = vadd.f32 %v3718_v46, %v3011_v50  ;;  %v3798_v49 = vadd.f32 %v3607_v15, %v2900_v52  ;;  %v8022_v0 = vld [vmem:[#allocation16_spill] sm:$0xff]  ;;  %v8023_v22 = vld [vmem:[#allocation51_spill] sm:$0xff] }
 0x2f0   :  { %v7414_v43 = vadd.f32 %v8021_v38, %v8020_v59  ;;  %v3611_v44 = vpop.f32.mrf.mxu0  ;;  %v7418_v40 = vadd.f32 %v8023_v22, %v8022_v0  ;;  %v8024_v35 = vld [vmem:[#allocation18_spill] sm:$0xff]  ;;  %v8025_v24 = vld [vmem:[#allocation52_spill] sm:$0xff]  ;;  %v3883_v19 = vadd.f32 %v7265_v62, %v3797_v51  ;;  %v3943_v9 = vmax.f32 %v3879_v28, 0.0 }
 0x2f1   :  { %v7422_v61 = vadd.f32 %v8025_v24, %v8024_v35  ;;  %v3801_v41 = vadd.f32 %v3611_v44, %v2904_v58  ;;  %v3724_v56 = vpop.f32.mrf.mxu1  ;;  %v3945_v60 = vmax.f32 %v3881_v53, 0.0  ;;  %v3800_v36 = vadd.f32 %v3720_v25, %v3013_v33 }
 0x2f2   :  { %v3803_v59 = vadd.f32 %v3724_v56, %v3017_v16  ;;  %v3613_v38 = vpop.f32.mrf.mxu0  ;;  %v3944_v50 = vmax.f32 %v3880_v8, 0.0  ;;  %v3946_v52 = vmax.f32 %v3882_v45, 0.0  ;;  %v7427_v22 = vadd.f32 %v7269_v48, %v3799_v17 }
 0x2f3   :  { %v3887_v46 = vadd.f32 %v7265_v62, %v3801_v41  ;;  %v3802_v15 = vadd.f32 %v3613_v38, %v2906_v31  ;;  %v3726_v0 = vpop.f32.mrf.mxu1  ;;  %v3884_v35 = vadd.f32 %v7279_v14, %v3798_v49  ;;  %v3947_v53 = vmax.f32 %v3883_v19, 0.0 }
 0x2f4   :  { %v3889_v51 = vadd.f32 %v7269_v48, %v3803_v59  ;;  %v3804_v58 = vadd.f32 %v3726_v0, %v7314_v7  ;;  %v3615_v28 = vpop.f32.mrf.mxu0  ;;  %v3886_v31 = vadd.f32 %v7283_v4, %v3800_v36 }
 0x2f5   :  { %v3951_v33 = vmax.f32 %v3887_v46, 0.0  ;;  %v3888_v16 = vadd.f32 %v7279_v14, %v3802_v15  ;;  %v3805_v8 = vadd.f32 %v3615_v28, %v7318_v27  ;;  %v3728_v45 = vpop.f32.mrf.mxu1  ;;  %v3948_v59 = vmax.f32 %v3884_v35, 0.0 }
 0x2f6   :  { %v3953_v41 = vmax.f32 %v3889_v51, 0.0  ;;  %v3890_v25 = vadd.f32 %v7283_v4, %v3804_v58  ;;  %v3807_v17 = vadd.f32 %v3728_v45, %v7322_v42  ;;  %v3617_v49 = vpop.f32.mrf.mxu0 }
 0x2f7   :  { %v3952_v44 = vmax.f32 %v3888_v16, 0.0  ;;  %v3891_v24 = vadd.f32 %v7265_v62, %v3805_v8  ;;  %v3806_v7 = vadd.f32 %v3617_v49, %v7326_v39  ;;  %v3730_v19 = vpop.f32.mrf.mxu1  ;;  %v7439_v56 = vmax.f32 %v3943_v9, %v3951_v33 }
 0x2f8   :  { %v3954_v38 = vmax.f32 %v3890_v25, 0.0  ;;  %v3893_v27 = vadd.f32 %v7269_v48, %v3807_v17  ;;  %v3808_v36 = vadd.f32 %v3730_v19, %v7330_v2  ;;  %v3621_v46 = vpop.f32.mrf.mxu0  ;;  %v7446_v51 = vmax.f32 %v3945_v60, %v3953_v41  ;;  %v8026_v60 = vld [vmem:[#allocation21_spill] sm:$0xff] }
 0x2f9   :  { %v3955_v15 = vmax.f32 %v3891_v24, 0.0  ;;  %v3892_v0 = vadd.f32 %v7279_v14, %v3806_v7  ;;  %v3734_v42 = vpop.f32.mrf.mxu1  ;;  %4127 = vrot.lane.b32.xlu0 %v7439_v56, %s5369_s15  ;;  %v7448_v39 = vmax.f32 %v3944_v50, %v3952_v44  ;;  %v3809_v35 = vadd.f32 %v3621_v46, %v7334_v54  ;;  %v8027_v41 = vld [vmem:[#allocation53_spill] sm:$0xff]  ;;  %v8029_v24 = vld [vmem:[#allocation54_spill] sm:$0xff] }
 0x2fa   :  { %v3894_v9 = vadd.f32 %v7283_v4, %v3808_v36  ;;  %v3811_v58 = vadd.f32 %v3734_v42, %v7338_v37  ;;  %v3623_v28 = vpop.f32.mrf.mxu0  ;;  %v7453_v2 = vmax.f32 %v3946_v52, %v3954_v38  ;;  %v3957_v33 = vmax.f32 %v3893_v27, 0.0  ;;  %v8028_v37 = vld [vmem:[#allocation20_spill] sm:$0xff] }
 0x2fb   :  { %v3956_v16 = vmax.f32 %v3892_v0, 0.0  ;;  %v3810_v8 = vadd.f32 %v3623_v28, %v7342_v21  ;;  %v3736_v45 = vpop.f32.mrf.mxu1  ;;  %v7456_v25 = vmax.f32 %v3947_v53, %v3955_v15  ;;  %v7460_v50 = vadd.f32 %v8027_v41, %v8026_v60  ;;  %v8033_v15 = vld [vmem:[#allocation56_spill] sm:$0xff]  ;;  %v8037_v60 = vld [vmem:[#allocation58_spill] sm:$0xff] }
 0x2fc   :  { %v3950_v17 = vmax.f32 %v3886_v31, 0.0  ;;  %v3958_v49 = vmax.f32 %v3894_v9, 0.0  ;;  %v3812_v54 = vadd.f32 %v3736_v45, %v7346_v29  ;;  %v3625_v44 = vpop.f32.mrf.mxu0  ;;  %v7465_v52 = vadd.f32 %v8029_v24, %v8028_v37  ;;  %v8030_v31 = vld [vmem:[#allocation19_spill] sm:$0xff]  ;;  %v8035_v45 = vld [vmem:[#allocation57_spill] sm:$0xff] }
 0x2fd   :  { %v3949_v7 = vmax.f32 %v7427_v22, 0.0  ;;  %v3813_v21 = vadd.f32 %v3625_v44, %v7350_v57  ;;  %v3738_v19 = vpop.f32.mrf.mxu1  ;;  %4129 = vrot.lane.b32.xlu1 %v7456_v25, %s5369_s15  ;;  %4159 = vrot.lane.b32.xlu0 %v7446_v51, %s5369_s15  ;;  %v7473_v53 = vmax.f32 %v3948_v59, %v3956_v16  ;;  %v8031_v29 = vld [vmem:[#allocation55_spill] sm:$0xff]  ;;  %v3895_v27 = vadd.f32 %v7265_v62, %v3809_v35  ;;  %v8034_v16 = vld [vmem:[#allocation22_spill] sm:$0xff] }
 0x2fe   :  { %v7477_v38 = vadd.f32 %v8031_v29, %v8030_v31  ;;  %v3897_v36 = vadd.f32 %v7269_v48, %v3811_v58  ;;  %v3627_v22 = vpop.f32.mrf.mxu0  ;;  %v7481_v46 = vmax.f32 %v3950_v17, %v3958_v49  ;;  %v8032_v57 = vld [vmem:[#allocation23_spill] sm:$0xff]  ;;  %v3896_v42 = vadd.f32 %v7279_v14, %v3810_v8  ;;  %v8036_v58 = vld [vmem:[#allocation24_spill] sm:$0xff] }
 0x2ff   :  { %v7485_v0 = vadd.f32 %v8033_v15, %v8032_v57  ;;  %v7489_v59 = vadd.f32 %v7283_v4, %v3812_v54  ;;  %v3740_v9 = vpop.f32.mrf.mxu1  ;;  %v7491_v28 = vmax.f32 %v3949_v7, %v3957_v33  ;;  %v7495_v35 = vadd.f32 %v8035_v45, %v8034_v16  ;;  %v8038_v8 = vld [vmem:[#allocation27_spill] sm:$0xff] }
 0x300   :  { %v7499_v41 = vadd.f32 %v8037_v60, %v8036_v58  ;;  %v3815_v17 = vadd.f32 %v3738_v19, %v7354_v6  ;;  %v3814_v49 = vadd.f32 %v3627_v22, %v7358_v11  ;;  %v3631_v44 = vpop.f32.mrf.mxu0  ;;  %v8039_v37 = vld [vmem:[#allocation59_spill] sm:$0xff]  ;;  %v3899_v33 = vadd.f32 %v7265_v62, %v3813_v21 }
 0x301   :  { %v7505_v54 = vadd.f32 %v8039_v37, %v8038_v8  ;;  %v3817_v24 = vadd.f32 %v3631_v44, %v7366_v47  ;;  %v3744_v7 = vpop.f32.mrf.mxu1  ;;  %4161 = vrot.lane.b32.xlu1 %v7491_v28, %s5369_s15  ;;  %4047 = vrot.lane.b32.xlu0 %v7448_v39, %s5369_s15  ;;  %v3959_v31 = vmax.f32 %v3895_v27, 0.0  ;;  %v3961_v6 = vmax.f32 %v3897_v36, 0.0 }
 0x302   :  { %v3816_v11 = vadd.f32 %v3740_v9, %v7362_v3  ;;  %v3819_v19 = vadd.f32 %v3744_v7, %v7370_v26  ;;  %v3633_v29 = vpop.f32.mrf.mxu0  ;;  %v3960_v22 = vmax.f32 %v3896_v42, 0.0  ;;  %v3962_v57 = vmax.f32 %v7489_v59, 0.0 }
 0x303   :  { %v3903_v21 = vadd.f32 %v7265_v62, %v3817_v24  ;;  %v3818_v47 = vadd.f32 %v3633_v29, %v7374_v1  ;;  %v3746_v15 = vpop.f32.mrf.mxu1  ;;  %v7519_v16 = vadd.f32 %v7269_v48, %v3815_v17  ;;  %v3900_v45 = vadd.f32 %v7279_v14, %v3814_v49 }
 0x304   :  { %v3905_v27 = vadd.f32 %v7269_v48, %v3819_v19  ;;  %v3820_v3 = vadd.f32 %v3746_v15, %v7378_v18  ;;  %v3635_v36 = vpop.f32.mrf.mxu0  ;;  %v3963_v26 = vmax.f32 %v3899_v33, 0.0  ;;  %v3902_v1 = vadd.f32 %v7283_v4, %v3816_v11 }
 0x305   :  { %v3967_v9 = vmax.f32 %v3903_v21, 0.0  ;;  %v3904_v42 = vadd.f32 %v7279_v14, %v3818_v47  ;;  %v3821_v59 = vadd.f32 %v3635_v36, %v7382_v12  ;;  %v3748_v58 = vpop.f32.mrf.mxu1  ;;  %4049 = vrot.lane.b32.xlu1 %v7473_v53, %s5369_s15  ;;  %4079 = vrot.lane.b32.xlu0 %v7453_v2, %s5369_s15  ;;  %v3964_v24 = vmax.f32 %v3900_v45, 0.0 }
 0x306   :  { %v3969_v60 = vmax.f32 %v3905_v27, 0.0  ;;  %v3906_v17 = vadd.f32 %v7283_v4, %v3820_v3  ;;  %v3823_v18 = vadd.f32 %v3748_v58, %v7386_v5  ;;  %v3637_v49 = vpop.f32.mrf.mxu0 }
 0x307   :  { %v3968_v44 = vmax.f32 %v3904_v42, 0.0  ;;  %v3907_v8 = vadd.f32 %v7265_v62, %v3821_v59  ;;  %v3822_v12 = vadd.f32 %v3637_v49, %v7390_v55  ;;  %v3750_v37 = vpop.f32.mrf.mxu1  ;;  %v7535_v33 = vmax.f32 %v3959_v31, %v3967_v9 }
 0x308   :  { %v3970_v7 = vmax.f32 %v3906_v17, 0.0  ;;  %v3909_v19 = vadd.f32 %v7269_v48, %v3823_v18  ;;  %v3824_v11 = vadd.f32 %v3750_v37, %v7394_v13  ;;  %v3641_v29 = vpop.f32.mrf.mxu0  ;;  %v7544_v55 = vmax.f32 %v3961_v6, %v3969_v60  ;;  %v8040_v6 = vld [vmem:[#allocation26_spill] sm:$0xff]  ;;  %v8041_v60 = vld [vmem:[#allocation60_spill] sm:$0xff] }
 0x309   :  { %v3971_v21 = vmax.f32 %v3907_v8, 0.0  ;;  %v3908_v47 = vadd.f32 %v7279_v14, %v3822_v12  ;;  %v3754_v5 = vpop.f32.mrf.mxu1  ;;  %4081 = vrot.lane.b32.xlu1 %v7481_v46, %s5369_s15  ;;  %4131 = vrot.lane.b32.xlu0 %v7535_v33, %s5369_s15  ;;  %v7546_v31 = vmax.f32 %v3960_v22, %v3968_v44  ;;  %v3825_v45 = vadd.f32 %v3641_v29, %v7400_v32  ;;  %v8042_v44 = vld [vmem:[#allocation25_spill] sm:$0xff]  ;;  %v8047_v29 = vld [vmem:[#allocation63_spill] sm:$0xff] }
 0x30a   :  { %v3910_v15 = vadd.f32 %v7283_v4, %v3824_v11  ;;  %v3827_v13 = vadd.f32 %v3754_v5, %v7404_v20  ;;  %v3643_v27 = vpop.f32.mrf.mxu0  ;;  %v7551_v3 = vmax.f32 %v3962_v57, %v3970_v7  ;;  %v3973_v36 = vmax.f32 %v3909_v19, 0.0  ;;  %v8043_v20 = vld [vmem:[#allocation61_spill] sm:$0xff] }
 0x30b   :  { %v3972_v9 = vmax.f32 %v3908_v47, 0.0  ;;  %v3826_v42 = vadd.f32 %v3643_v27, %v7410_v23  ;;  %v3756_v59 = vpop.f32.mrf.mxu1  ;;  %v7554_v58 = vmax.f32 %v3963_v26, %v3971_v21  ;;  %v3061_v22 = vadd.f32 %v8041_v60, %v8040_v6  ;;  %v8044_v26 = vld [vmem:[#allocation28_spill] sm:$0xff]  ;;  %v8048_v27 = vld [vmem:[#allocation30_spill] sm:$0xff]  ;;  %v8051_v6 = vld [vmem:[#allocation65_spill] sm:$0xff] }
 0x30c   :  { %v3966_v17 = vmax.f32 %v3902_v1, 0.0  ;;  %v3974_v18 = vmax.f32 %v3910_v15, 0.0  ;;  %v3828_v49 = vadd.f32 %v3756_v59, %v7414_v43  ;;  %v3645_v32 = vpop.f32.mrf.mxu0  ;;  %v2950_v8 = vadd.f32 %v8043_v20, %v8042_v44  ;;  %v8045_v1 = vld [vmem:[#allocation62_spill] sm:$0xff] }
 0x30d   :  { %v3965_v57 = vmax.f32 %v7519_v16, 0.0  ;;  %v3829_v12 = vadd.f32 %v3645_v32, %v7418_v40  ;;  %v3758_v37 = vpop.f32.mrf.mxu1  ;;  %4133 = vrot.lane.b32.xlu1 %v7554_v58, %s5369_s15  ;;  %4163 = vrot.lane.b32.xlu0 %v7544_v55, %s5369_s15  ;;  %v7567_v23 = vmax.f32 %v3964_v24, %v3972_v9  ;;  %v3063_v43 = vadd.f32 %v8045_v1, %v8044_v26  ;;  %v8046_v40 = vld [vmem:[#allocation29_spill] sm:$0xff]  ;;  %v8049_v9 = vld [vmem:[#allocation64_spill] sm:$0xff]  ;;  %v8053_v44 = vld [vmem:[#allocation66_spill] sm:$0xff] }
 0x30e   :  { %v3911_v7 = vadd.f32 %v7265_v62, %v3825_v45  ;;  %v3913_v19 = vadd.f32 %v7269_v48, %v3827_v13  ;;  %v3647_v11 = vpop.f32.mrf.mxu0  ;;  %v7573_v16 = vmax.f32 %v3966_v17, %v3974_v18  ;;  %v2954_v21 = vadd.f32 %v8047_v29, %v8046_v40  ;;  %v8050_v45 = vld [vmem:[#allocation31_spill] sm:$0xff]  ;;  %v8052_v32 = vld [vmem:[#allocation32_spill] sm:$0xff] }
 0x30f   :  { %v3912_v47 = vadd.f32 %v7279_v14, %v3826_v42  ;;  %v7579_v5 = vadd.f32 %v7283_v4, %v3828_v49  ;;  %v3760_v24 = vpop.f32.mrf.mxu1  ;;  %v7581_v15 = vmax.f32 %v3965_v57, %v3973_v36  ;;  %v3067_v59 = vadd.f32 %v8049_v9, %v8048_v27 }
 0x310   :  { %v2956_v13 = vadd.f32 %v8051_v6, %v8050_v45  ;;  %v3831_v60 = vadd.f32 %v3758_v37, %v7422_v61  ;;  %v3830_v17 = vadd.f32 %v3647_v11, %v7460_v50  ;;  %v3651_v18 = vpop.f32.mrf.mxu0  ;;  %v3069_v42 = vadd.f32 %v8053_v44, %v8052_v32 }
 0x311   :  { %v3915_v49 = vadd.f32 %v7265_v62, %v3829_v12  ;;  %v3833_v20 = vadd.f32 %v3651_v18, %v7477_v38  ;;  %v3764_v36 = vpop.f32.mrf.mxu1  ;;  %4165 = vrot.lane.b32.xlu1 %v7581_v15, %s5369_s15  ;;  %4051 = vrot.lane.b32.xlu0 %v7546_v31, %s5369_s15  ;;  %v3975_v57 = vmax.f32 %v3911_v7, 0.0  ;;  %v3977_v26 = vmax.f32 %v3913_v19, 0.0 }
 0x312   :  { %v3832_v61 = vadd.f32 %v3760_v24, %v7465_v52  ;;  %v3835_v50 = vadd.f32 %v3764_v36, %v7485_v0  ;;  %v3653_v37 = vpop.f32.mrf.mxu0  ;;  %v3976_v1 = vmax.f32 %v3912_v47, 0.0  ;;  %v3978_v11 = vmax.f32 %v7579_v5, 0.0 }
 0x313   :  { %v3919_v12 = vadd.f32 %v7265_v62, %v3833_v20  ;;  %v3834_v38 = vadd.f32 %v3653_v37, %v7495_v35  ;;  %v3766_v40 = vpop.f32.mrf.mxu1  ;;  %v7603_v29 = vadd.f32 %v7269_v48, %v3831_v60  ;;  %v3916_v27 = vadd.f32 %v7279_v14, %v3830_v17 }
 0x314   :  { %v3921_v7 = vadd.f32 %v7269_v48, %v3835_v50  ;;  %v3836_v52 = vadd.f32 %v3766_v40, %v7499_v41  ;;  %v3655_v19 = vpop.f32.mrf.mxu0  ;;  %v3979_v0 = vmax.f32 %v3915_v49, 0.0  ;;  %v3918_v35 = vadd.f32 %v7283_v4, %v3832_v61 }
 0x315   :  { %v3983_v24 = vmax.f32 %v3919_v12, 0.0  ;;  %v3920_v47 = vadd.f32 %v7279_v14, %v3834_v38  ;;  %v3837_v5 = vadd.f32 %v3655_v19, %v7505_v54  ;;  %v3768_v9 = vpop.f32.mrf.mxu1  ;;  %4053 = vrot.lane.b32.xlu1 %v7567_v23, %s5369_s15  ;;  %4083 = vrot.lane.b32.xlu0 %v7551_v3, %s5369_s15  ;;  %v3980_v49 = vmax.f32 %v3916_v27, 0.0 }
 0x316   :  { %v3985_v45 = vmax.f32 %v3921_v7, 0.0  ;;  %v3922_v6 = vadd.f32 %v7283_v4, %v3836_v52  ;;  %v3839_v41 = vadd.f32 %v3768_v9, %v3061_v22  ;;  %v3657_v60 = vpop.f32.mrf.mxu0  ;;  %v3982_v9 = vmax.f32 %v3918_v35, 0.0 }
 0x317   :  { %v3984_v17 = vmax.f32 %v3920_v47, 0.0  ;;  %v3923_v18 = vadd.f32 %v7265_v62, %v3837_v5  ;;  %v3838_v32 = vadd.f32 %v3657_v60, %v2950_v8  ;;  %v3770_v44 = vpop.f32.mrf.mxu1  ;;  %v7617_v54 = vmax.f32 %v3975_v57, %v3983_v24 }
 0x318   :  { %v3986_v20 = vmax.f32 %v3922_v6, 0.0  ;;  %v3925_v36 = vadd.f32 %v7269_v48, %v3839_v41  ;;  %v3840_v50 = vadd.f32 %v3770_v44, %v3063_v43  ;;  %v3661_v37 = vpop.f32.mrf.mxu0  ;;  %v7625_v22 = vmax.f32 %v3977_v26, %v3985_v45  ;;  %v8054_v45 = vld [vmem:[#allocation33_spill] sm:$0xff] }
 0x319   :  { %v3987_v12 = vmax.f32 %v3923_v18, 0.0  ;;  %v3924_v61 = vadd.f32 %v7279_v14, %v3838_v32  ;;  %v3774_v38 = vpop.f32.mrf.mxu1  ;;  %4085 = vrot.lane.b32.xlu1 %v7573_v16, %s5369_s15  ;;  %4135 = vrot.lane.b32.xlu0 %v7617_v54, %s5369_s15  ;;  %v7627_v8 = vmax.f32 %v3976_v1, %v3984_v17  ;;  %v3841_v40 = vadd.f32 %v3661_v37, %v2954_v21  ;;  %v8055_v1 = vld [vmem:[#allocation67_spill] sm:$0xff] }
 0x31a   :  { %v3926_v57 = vadd.f32 %v7283_v4, %v3840_v50  ;;  %v3843_v27 = vadd.f32 %v3774_v38, %v3067_v59  ;;  %v3663_v43 = vpop.f32.mrf.mxu0  ;;  %v7630_v7 = vmax.f32 %v3978_v11, %v3986_v20  ;;  %v3989_v52 = vmax.f32 %v3925_v36, 0.0  ;;  %v8057_v11 = vld [vmem:[#allocation68_spill] sm:$0xff] }
 0x31b   :  { %v3988_v19 = vmax.f32 %v3924_v61, 0.0  ;;  %v3842_v24 = vadd.f32 %v3663_v43, %v2956_v13  ;;  %v3776_v47 = vpop.f32.mrf.mxu1  ;;  %v7632_v5 = vmax.f32 %v3979_v0, %v3987_v12  ;;  %v2958_v60 = vadd.f32 %v8055_v1, %v8054_v45  ;;  %v8056_v13 = vld [vmem:[#allocation34_spill] sm:$0xff]  ;;  %v8059_v38 = vld [vmem:[#allocation36_spill] sm:$0xff] }
 0x31c   :  { %v3990_v6 = vmax.f32 %v3926_v57, 0.0  ;;  %v3844_v41 = vadd.f32 %v3776_v47, %v3069_v42  ;;  %v3665_v26 = vpop.f32.mrf.mxu0  ;;  %v3981_v17 = vmax.f32 %v7603_v29, 0.0  ;;  %v3071_v0 = vadd.f32 %v8057_v11, %v8056_v13  ;;  %v8058_v29 = vld [vmem:[#allocation35_spill] sm:$0xff] }
 0x31d   :  { %v3778_v21 = vpop.f32.mrf.mxu1  ;;  %4137 = vrot.lane.b32.xlu1 %v7632_v5, %s5369_s15  ;;  %4167 = vrot.lane.b32.xlu0 %v7625_v22, %s5369_s15  ;;  %v7641_v59 = vmax.f32 %v3980_v49, %v3988_v19  ;;  %v3927_v42 = vadd.f32 %v7265_v62, %v3841_v40  ;;  %v3929_v35 = vadd.f32 %v7269_v48, %v3843_v27  ;;  %v8060_v40 = vld [vmem:[#allocation69_spill] sm:$0xff] }
 0x31e   :  { %v3667_v18 = vpop.f32.mrf.mxu0  ;;  %v7647_v32 = vmax.f32 %v3982_v9, %v3990_v6  ;;  %v2964_v44 = vadd.f32 %v7249_v10, %v8058_v29  ;;  %v3928_v20 = vadd.f32 %v7279_v14, %v3842_v24  ;;  %v3845_v36 = vadd.f32 %v3665_v26, %v2958_v60  ;;  %v8061_v24 = vld [vmem:[#allocation70_spill] sm:$0xff]  ;;  %v8062_v9 = vld [vmem:[#allocation71_spill] sm:$0xff] }
 0x31f   :  { %v3780_v50 = vpop.f32.mrf.mxu1  ;;  %v7652_v37 = vmax.f32 %v3981_v17, %v3989_v52  ;;  %v3930_v49 = vadd.f32 %v7283_v4, %v3844_v41  ;;  %v3847_v12 = vadd.f32 %v3778_v21, %v3071_v0  ;;  %v2968_v57 = vadd.f32 %v7275_v63, %v8059_v38  ;;  %v8064_v38 = vld [vmem:[#allocation72_spill] sm:$0xff] }
 0x320   :  { %v3671_v61 = vpop.f32.mrf.mxu0  ;;  %v3846_v27 = vadd.f32 %v3667_v18, %v8060_v40  ;;  %v3991_v10 = vmax.f32 %v3927_v42, 0.0  ;;  %v3993_v52 = vmax.f32 %v3929_v35, 0.0  ;;  %v3848_v47 = vadd.f32 %v3780_v50, %v8061_v24  ;;  %v8065_v24 = vld [vmem:[#allocation73_spill] sm:$0xff] }
 0x321   :  { %v3849_v43 = vadd.f32 %v3671_v61, %v2964_v44  ;;  %v3784_v19 = vpop.f32.mrf.mxu1  ;;  %4169 = vrot.lane.b32.xlu1 %v7652_v37, %s5369_s15  ;;  %4055 = vrot.lane.b32.xlu0 %v7627_v8, %s5369_s15  ;;  %v3992_v26 = vmax.f32 %v3928_v20, 0.0  ;;  %v3931_v63 = vadd.f32 %v7265_v62, %v3845_v36  ;;  %v3994_v17 = vmax.f32 %v3930_v49, 0.0 }
 0x322   :  { %v3851_v6 = vadd.f32 %v3784_v19, %v8062_v9  ;;  %v3673_v41 = vpop.f32.mrf.mxu0  ;;  %v3933_v21 = vadd.f32 %v7269_v48, %v3847_v12  ;;  %v3932_v42 = vadd.f32 %v7279_v14, %v3846_v27 }
 0x323   :  { %v3935_v45 = vadd.f32 %v7265_v62, %v3849_v43  ;;  %v3850_v1 = vadd.f32 %v3673_v41, %v7258_v34  ;;  %v3786_v60 = vpop.f32.mrf.mxu1  ;;  %v3934_v34 = vadd.f32 %v7283_v4, %v3848_v47 }
 0x324   :  { %v3937_v13 = vadd.f32 %v7269_v48, %v3851_v6  ;;  %v3852_v11 = vadd.f32 %v3786_v60, %v7261_v30  ;;  %v3675_v0 = vpop.f32.mrf.mxu0  ;;  %v8063_v30 = vld [vmem:[#allocation3_spill] sm:$0xff]  ;;  %v3995_v6 = vmax.f32 %v3931_v63, 0.0 }
 0x325   :  { %v3999_v35 = vmax.f32 %v3935_v45, 0.0  ;;  %v3936_v18 = vadd.f32 %v7279_v14, %v3850_v1  ;;  %v3853_v29 = vadd.f32 %v3675_v0, %v2968_v57  ;;  %v3788_v44 = vpop.f32.mrf.mxu1  ;;  %4057 = vrot.lane.b32.xlu1 %v7641_v59, %s5369_s15  ;;  %4087 = vrot.lane.b32.xlu0 %v7630_v7, %s5369_s15 }
 0x326   :  { %v4001_v20 = vmax.f32 %v3937_v13, 0.0  ;;  %v3938_v36 = vadd.f32 %v7283_v4, %v3852_v11  ;;  %v3855_v50 = vadd.f32 %v3788_v44, %v8063_v30  ;;  %v3677_v49 = vpop.f32.mrf.mxu0  ;;  %v3998_v11 = vmax.f32 %v3934_v34, 0.0 }
 0x327   :  { %v4000_v12 = vmax.f32 %v3936_v18, 0.0  ;;  %v3939_v61 = vadd.f32 %v7265_v62, %v3853_v29  ;;  %v3854_v57 = vadd.f32 %v3677_v49, %v8064_v38  ;;  %v3790_v40 = vpop.f32.mrf.mxu1  ;;  %v7681_v27 = vmax.f32 %v3991_v10, %v3999_v35 }
 0x328   :  { %v4002_v43 = vmax.f32 %v3938_v36, 0.0  ;;  %v3941_v19 = vadd.f32 %v7269_v48, %v3855_v50  ;;  %v3856_v9 = vadd.f32 %v3790_v40, %v8065_v24  ;;  %v7685_v47 = vmax.f32 %v3993_v52, %v4001_v20 }
 0x329   :  { %v4003_v41 = vmax.f32 %v3939_v61, 0.0  ;;  %v3940_v45 = vadd.f32 %v7279_v14, %v3854_v57  ;;  %4089 = vrot.lane.b32.xlu1 %v7647_v32, %s5369_s15  ;;  %4139 = vrot.lane.b32.xlu0 %v7681_v27, %s5369_s15  ;;  %v7692_v62 = vmax.f32 %v3992_v26, %v4000_v12  ;;  %v3997_v10 = vmax.f32 %v3933_v21, 0.0 }
 0x32a   :  { %v4005_v1 = vmax.f32 %v3941_v19, 0.0  ;;  %v3942_v48 = vadd.f32 %v7283_v4, %v3856_v9  ;;  %v7695_v60 = vmax.f32 %v3994_v17, %v4002_v43  ;;  %v3996_v52 = vmax.f32 %v3932_v42, 0.0 }
 0x32b   :  { %v4004_v13 = vmax.f32 %v3940_v45, 0.0  ;;  %v7697_v63 = vmax.f32 %v3995_v6, %v4003_v41 }
 0x32c   :  { %v4006_v14 = vmax.f32 %v3942_v48, 0.0  ;;  %v7699_v0 = vmax.f32 %v3997_v10, %v4005_v1 }
 0x32d   :  { %4141 = vrot.lane.b32.xlu1 %v7697_v63, %s5369_s15  ;;  %4059 = vrot.lane.b32.xlu0 %v7692_v62, %s5369_s15  ;;  %v7705_v26 = vmax.f32 %v3996_v52, %v4004_v13 }
 0x32e   :  { %v7707_v21 = vmax.f32 %v3998_v11, %v4006_v14 }
 0x331   :  { %4061 = vrot.lane.b32.xlu1 %v7705_v26, %s5369_s15  ;;  %4091 = vrot.lane.b32.xlu0 %v7695_v60, %s5369_s15 }
 0x335   :  { %4093 = vrot.lane.b32.xlu1 %v7707_v21, %s5369_s15  ;;  %4171 = vrot.lane.b32.xlu0 %v7685_v47, %s5369_s15 }
 0x339   :  { %4173 = vrot.lane.b32.xlu1 %v7699_v0, %s5369_s15 }
 0x36b   :  { %v4128_v4 = vpop.permute.xlu0 %4127 }
 0x36c   :  { %v4183_v29 = vsel %vm1248_vm3, %v4128_v4, %v7448_v39 }
 0x36f   :  { %v4130_v17 = vpop.permute.xlu1 %4129  ;;  %v4160_v42 = vpop.permute.xlu0 %4159 }
 0x370   :  { %v4184_v30 = vsel %vm1248_vm3, %v4130_v17, %v7473_v53  ;;  %v4191_v50 = vsel %vm1248_vm3, %v4160_v42, %v7453_v2 }
 0x373   :  { %v4162_v35 = vpop.permute.xlu1 %4161  ;;  %v4048_v18 = vpop.permute.xlu0 %4047 }
 0x374   :  { %v4103_v44 = vsel %vm1248_vm3, %v7439_v56, %v4048_v18  ;;  %v4192_v2 = vsel %vm1248_vm3, %v4162_v35, %v7481_v46 }
 0x375   :  { %v4199_v34 = vmax.f32 %v4103_v44, %v4183_v29 }
 0x377   :  { %4215 = vst [vmem:[%s7836_s5] sm:$0xff] %v4199_v34  ;;  %v4050_v20 = vpop.permute.xlu1 %4049  ;;  %v4080_v36 = vpop.permute.xlu0 %4079 }
 0x378   :  { %v4104_v49 = vsel %vm1248_vm3, %v7456_v25, %v4050_v20  ;;  %v4111_v39 = vsel %vm1248_vm3, %v7446_v51, %v4080_v36 }
 0x379   :  { %v4201_v56 = vmax.f32 %v4104_v49, %v4184_v30  ;;  %v4200_v12 = vmax.f32 %v4111_v39, %v4191_v50 }
 0x37b   :  { %4217 = vst [vmem:[%s7836_s5 + $0x10] sm:$0xff] %v4201_v56  ;;  %4216 = vst [vmem:[%s7836_s5 + $0x8] sm:$0xff] %v4200_v12  ;;  %v4082_v53 = vpop.permute.xlu1 %4081  ;;  %v4132_v61 = vpop.permute.xlu0 %4131 }
 0x37c   :  { %v4112_v25 = vsel %vm1248_vm3, %v7491_v28, %v4082_v53  ;;  %v4185_v19 = vsel %vm1248_vm3, %v4132_v61, %v7546_v31 }
 0x37d   :  { %v4202_v38 = vmax.f32 %v4112_v25, %v4192_v2 }
 0x37f   :  { %4218 = vst [vmem:[%s7836_s5 + $0x18] sm:$0xff] %v4202_v38  ;;  %v4134_v51 = vpop.permute.xlu1 %4133  ;;  %v4164_v57 = vpop.permute.xlu0 %4163 }
 0x380   :  { %v4186_v6 = vsel %vm1248_vm3, %v4134_v51, %v7567_v23  ;;  %v4193_v41 = vsel %vm1248_vm3, %v4164_v57, %v7551_v3 }
 0x383   :  { %v4166_v40 = vpop.permute.xlu1 %4165  ;;  %v4052_v43 = vpop.permute.xlu0 %4051 }
 0x384   :  { %v4105_v24 = vsel %vm1248_vm3, %v7535_v33, %v4052_v43  ;;  %v4194_v3 = vsel %vm1248_vm3, %v4166_v40, %v7573_v16 }
 0x385   :  { %v4203_v9 = vmax.f32 %v4105_v24, %v4185_v19 }
 0x387   :  { %4219 = vst [vmem:[%s7836_s5 + $0x20] sm:$0xff] %v4203_v9  ;;  %v4054_v46 = vpop.permute.xlu1 %4053  ;;  %v4084_v28 = vpop.permute.xlu0 %4083 }
 0x388   :  { %v4106_v45 = vsel %vm1248_vm3, %v7554_v58, %v4054_v46  ;;  %v4113_v31 = vsel %vm1248_vm3, %v7544_v55, %v4084_v28 }
 0x389   :  { %v4205_v33 = vmax.f32 %v4106_v45, %v4186_v6  ;;  %v4204_v10 = vmax.f32 %v4113_v31, %v4193_v41 }
 0x38b   :  { %4221 = vst [vmem:[%s7836_s5 + $0x30] sm:$0xff] %v4205_v33  ;;  %4220 = vst [vmem:[%s7836_s5 + $0x28] sm:$0xff] %v4204_v10  ;;  %v4086_v23 = vpop.permute.xlu1 %4085  ;;  %v4136_v1 = vpop.permute.xlu0 %4135 }
 0x38c   :  { %v4114_v58 = vsel %vm1248_vm3, %v7581_v15, %v4086_v23  ;;  %v4187_v14 = vsel %vm1248_vm3, %v4136_v1, %v7627_v8 }
 0x38d   :  { %v4206_v48 = vmax.f32 %v4114_v58, %v4194_v3 }
 0x38f   :  { %4222 = vst [vmem:[%s7836_s5 + $0x38] sm:$0xff] %v4206_v48  ;;  %v4138_v55 = vpop.permute.xlu1 %4137  ;;  %v4168_v52 = vpop.permute.xlu0 %4167 }
 0x390   :  { %v4188_v42 = vsel %vm1248_vm3, %v4138_v55, %v7641_v59  ;;  %v4195_v35 = vsel %vm1248_vm3, %v4168_v52, %v7630_v7 }
 0x393   :  { %v4170_v13 = vpop.permute.xlu1 %4169  ;;  %v4056_v11 = vpop.permute.xlu0 %4055 }
 0x394   :  { %v4107_v4 = vsel %vm1248_vm3, %v7617_v54, %v4056_v11  ;;  %v4196_v7 = vsel %vm1248_vm3, %v4170_v13, %v7647_v32 }
 0x395   :  { %v4207_v17 = vmax.f32 %v4107_v4, %v4187_v14 }
 0x397   :  { %4223 = vst [vmem:[%s7836_s5 + $0x40] sm:$0xff] %v4207_v17  ;;  %v4058_v16 = vpop.permute.xlu1 %4057  ;;  %v4088_v15 = vpop.permute.xlu0 %4087 }
 0x398   :  { %v4108_v18 = vsel %vm1248_vm3, %v7632_v5, %v4058_v16  ;;  %v4115_v8 = vsel %vm1248_vm3, %v7625_v22, %v4088_v15 }
 0x399   :  { %v4209_v54 = vmax.f32 %v4108_v18, %v4188_v42  ;;  %v4208_v29 = vmax.f32 %v4115_v8, %v4195_v35 }
 0x39b   :  { %4225 = vst [vmem:[%s7836_s5 + $0x50] sm:$0xff] %v4209_v54  ;;  %4224 = vst [vmem:[%s7836_s5 + $0x48] sm:$0xff] %v4208_v29  ;;  %v4090_v59 = vpop.permute.xlu1 %4089  ;;  %v4140_v44 = vpop.permute.xlu0 %4139 }
 0x39c   :  { %v4116_v5 = vsel %vm1248_vm3, %v7652_v37, %v4090_v59  ;;  %v4189_v36 = vsel %vm1248_vm3, %v4140_v44, %v7692_v62 }
 0x39d   :  { %v4210_v34 = vmax.f32 %v4116_v5, %v4196_v7 }
 0x39f   :  { %4226 = vst [vmem:[%s7836_s5 + $0x58] sm:$0xff] %v4210_v34  ;;  %v4142_v22 = vpop.permute.xlu1 %4141  ;;  %v4060_v20 = vpop.permute.xlu0 %4059 }
 0x3a0   :  { %v4109_v30 = vsel %vm1248_vm3, %v7681_v27, %v4060_v20  ;;  %v4190_v49 = vsel %vm1248_vm3, %v4142_v22, %v7705_v26 }
 0x3a1   :  { %v4211_v50 = vmax.f32 %v4109_v30, %v4189_v36 }
 0x3a3   :  { %4227 = vst [vmem:[%s7836_s5 + $0x60] sm:$0xff] %v4211_v50  ;;  %v4062_v32 = vpop.permute.xlu1 %4061  ;;  %v4092_v37 = vpop.permute.xlu0 %4091 }
 0x3a4   :  { %v4110_v39 = vsel %vm1248_vm3, %v7697_v63, %v4062_v32  ;;  %v4117_v12 = vsel %vm1248_vm3, %v7685_v47, %v4092_v37 }
 0x3a5   :  { %v4213_v56 = vmax.f32 %v4110_v39, %v4190_v49 }
 0x3a7   :  { %4229 = vst [vmem:[%s7836_s5 + $0x70] sm:$0xff] %v4213_v56  ;;  %v4094_v62 = vpop.permute.xlu1 %4093  ;;  %v4172_v27 = vpop.permute.xlu0 %4171 }
 0x3a8   :  { %v4197_v53 = vsel %vm1248_vm3, %v4172_v27, %v7695_v60  ;;  %v4118_v63 = vsel %vm1248_vm3, %v7699_v0, %v4094_v62 }
 0x3a9   :  { %v4212_v61 = vmax.f32 %v4117_v12, %v4197_v53 }
 0x3ab   :  { %4228 = vst [vmem:[%s7836_s5 + $0x68] sm:$0xff] %v4212_v61  ;;  %v4174_v26 = vpop.permute.xlu1 %4173 }
 0x3ac   :  { %v4198_v2 = vsel %vm1248_vm3, %v4174_v26, %v7707_v21 }
 0x3ad   :  { %v4214_v25 = vmax.f32 %v4118_v63, %v4198_v2 }
 0x3af   :  { %4230 = vst [vmem:[%s7836_s5 + $0x78] sm:$0xff] %v4214_v25 }

</bundles_post_ra>
